<compile_context>
chip_gen: v7x
topology: tpu7x:2x2x1
jax: 0.10.0
libtpu: 0.0.40
codegen_flags: <defaults>
</compile_context>

<pallas_src>
import functools

import jax
import jax.numpy as jnp
from jax.experimental import pallas as pl
from jax.experimental.pallas import tpu as pltpu


# ---------------------------------------------------------------------------
# Pallas kernel: one batch element per grid step, full feature maps in VMEM.
# ---------------------------------------------------------------------------
def _bagnet_unit_kernel(x_ref, w1_ref, b1_ref, w2_ref, b2_ref, wf_ref, bf_ref,
                        o_ref, pat_ref, feat_ref, *, K, stride, Ho, Wo,
                        resize_identity):
    x = x_ref[0]                                   # (H, W, Cin) bf16
    H, W, Cin = x.shape
    Cmid = w1_ref.shape[1]
    Cout = o_ref.shape[3]
    hs = (Ho - 1) * stride + 1
    ws = (Wo - 1) * stride + 1

    # --- conv1: 1x1 + BN + ReLU (single MXU push, M = H*W) ----------------
    h1 = jnp.dot(x.reshape(H * W, Cin), w1_ref[...],
                 preferred_element_type=jnp.float32)
    h1 = jnp.maximum(h1 + b1_ref[...], 0.0)
    h1 = h1.reshape(H, W, Cmid).astype(jnp.bfloat16)

    # --- conv2: KxK, stride, pad=0 as ONE im2col matmul -------------------
    # Assemble the (Ho*Wo, K*K*Cmid) patch matrix in VMEM scratch; the single
    # dot has contraction dim K*K*Cmid instead of K*K matmuls of width Cmid.
    for ki in range(K):
        for kj in range(K):
            if stride == 1:
                patch = h1[ki:ki + Ho, kj:kj + Wo, :]
            else:
                patch = h1[ki:ki + hs:stride, kj:kj + ws:stride, :]
            col = (ki * K + kj) * Cmid
            pat_ref[:, col:col + Cmid] = patch.reshape(Ho * Wo, Cmid)
    h2 = jnp.dot(pat_ref[...], w2_ref[...],
                 preferred_element_type=jnp.float32)
    h2 = jnp.maximum(h2 + b2_ref[...], 0.0)          # (Ho*Wo, Cmid) f32

    # --- conv3 (+BN) fused with identity 1x1 conv (+BN) -------------------
    if resize_identity:
        if stride == 1:
            xs = x[:Ho, :Wo, :]
        else:
            xs = x[:hs:stride, :ws:stride, :]
        feat_ref[:, :Cmid] = h2.astype(jnp.bfloat16)
        feat_ref[:, Cmid:Cmid + Cin] = xs.reshape(Ho * Wo, Cin)
        out = jnp.dot(feat_ref[...], wf_ref[...],
                      preferred_element_type=jnp.float32) + bf_ref[...]
    else:
        out = jnp.dot(h2.astype(jnp.bfloat16), wf_ref[...],
                      preferred_element_type=jnp.float32) + bf_ref[...]
        out = out + x[:Ho, :Wo, :].reshape(Ho * Wo, Cout).astype(jnp.float32)

    out = jnp.maximum(out, 0.0)
    o_ref[0] = out.reshape(Ho, Wo, Cout).astype(o_ref.dtype)


# ---------------------------------------------------------------------------
# Wrapper (NHWC end-to-end; all weight plumbing happens here, outside the kernel).
# ---------------------------------------------------------------------------
def bagnet_unit_pallas(x_nhwc, params, *, kernel_size, stride):
    """x_nhwc: (N, H, W, Cin) float32. Returns (N, Ho, Wo, Cout) float32 (NHWC)."""
    w1, b1, w2, b2, w3, b3, wid, bid = params
    N, H, W, Cin = x_nhwc.shape
    K = kernel_size
    Cmid = w1.shape[1]
    Cout = w3.shape[1]
    Ho = (H - K) // stride + 1
    Wo = (W - K) // stride + 1
    resize_identity = (Cin != Cout) or (stride != 1)

    # Wrapper-side layout plumbing: bf16 MXU inputs, flattened w2, fused [w3; wid].
    x_bf = x_nhwc.astype(jnp.bfloat16)
    w1_bf = w1.astype(jnp.bfloat16)
    w2_flat = w2.reshape(K * K * Cmid, Cmid).astype(jnp.bfloat16)
    if resize_identity:
        wf = jnp.concatenate([w3, wid], axis=0).astype(jnp.bfloat16)  # (Cmid+Cin, Cout)
        bf = (b3 + bid).astype(jnp.float32)
    else:
        wf = w3.astype(jnp.bfloat16)
        bf = b3.astype(jnp.float32)

    kernel = functools.partial(_bagnet_unit_kernel, K=K, stride=stride,
                               Ho=Ho, Wo=Wo, resize_identity=resize_identity)

    out_nhwc = pl.pallas_call(
        kernel,
        out_shape=jax.ShapeDtypeStruct((N, Ho, Wo, Cout), jnp.float32),
        grid_spec=pltpu.PrefetchScalarGridSpec(
            num_scalar_prefetch=0,
            grid=(N,),
            in_specs=[
                pl.BlockSpec((1, H, W, Cin), lambda n: (n, 0, 0, 0)),
                pl.BlockSpec((Cin, Cmid), lambda n: (0, 0)),
                pl.BlockSpec((1, Cmid), lambda n: (0, 0)),
                pl.BlockSpec((K * K * Cmid, Cmid), lambda n: (0, 0)),
                pl.BlockSpec((1, Cmid), lambda n: (0, 0)),
                pl.BlockSpec(wf.shape, lambda n: (0, 0)),
                pl.BlockSpec((1, Cout), lambda n: (0, 0)),
            ],
            out_specs=pl.BlockSpec((1, Ho, Wo, Cout), lambda n: (n, 0, 0, 0)),
            scratch_shapes=[
                pltpu.VMEM((Ho * Wo, K * K * Cmid), jnp.bfloat16),  # im2col patches
                pltpu.VMEM((Ho * Wo, Cmid + Cin), jnp.bfloat16),    # [h2 | x_strided]
            ],
        ),
        compiler_params=pltpu.CompilerParams(
            dimension_semantics=("parallel",)),
    )(x_bf, w1_bf, b1.astype(jnp.float32), w2_flat, b2.astype(jnp.float32),
      wf, bf)

    return out_nhwc


def bagnet_unit_pallas_nchw(x_nchw, params, *, kernel_size, stride):
    """Drop-in NCHW adapter (adds two HBM transposes; prefer NHWC end-to-end)."""
    y = bagnet_unit_pallas(jnp.transpose(x_nchw, (0, 2, 3, 1)), params,
                           kernel_size=kernel_size, stride=stride)
    return jnp.transpose(y, (0, 3, 1, 2))


# ---------------------------------------------------------------------------
# Parameter construction (deterministic) + BatchNorm(eval) folding.
# ---------------------------------------------------------------------------
def _fold_bn(w, gamma, beta, mean, var, eps=1e-5):
    # w: (..., Cout) conv weight (no bias). Returns folded (w', b').
    scale = gamma / jnp.sqrt(var + eps)
    return w * scale, (beta - mean * scale).reshape(1, -1)


def make_params(key, in_channels, out_channels, kernel_size):
    mid = out_channels // 4
    ks = jax.random.split(key, 16)

    def bn(k, c):
        kg, kb, km, kv = jax.random.split(k, 4)
        gamma = 1.0 + 0.1 * jax.random.normal(kg, (c,), jnp.float32)
        beta = 0.1 * jax.random.normal(kb, (c,), jnp.float32)
        mean = 0.1 * jax.random.normal(km, (c,), jnp.float32)
        var = jnp.abs(jax.random.normal(kv, (c,), jnp.float32)) + 0.5
        return gamma, beta, mean, var

    w1 = 0.2 * jax.random.normal(ks[0], (in_channels, mid), jnp.float32)
    w2 = 0.2 * jax.random.normal(ks[1], (kernel_size, kernel_size, mid, mid),
                                 jnp.float32)
    w3 = 0.2 * jax.random.normal(ks[2], (mid, out_channels), jnp.float32)
    wid = 0.2 * jax.random.normal(ks[3], (in_channels, out_channels),
                                  jnp.float32)

    w1, b1 = _fold_bn(w1, *bn(ks[4], mid))
    w2, b2 = _fold_bn(w2, *bn(ks[5], mid))
    w3, b3 = _fold_bn(w3, *bn(ks[6], out_channels))
    wid, bid = _fold_bn(wid, *bn(ks[7], out_channels))
    return (w1, b1, w2, b2, w3, b3, wid, bid)


# ---------------------------------------------------------------------------
# Pure-JAX reference (lax conv, NHWC). Mirrors the bf16 rounding of the MXU
# inputs so only accumulation order / intermediate casts differ.
# ---------------------------------------------------------------------------
def ref_bagnet_unit(x_nhwc, params, *, kernel_size, stride):
    w1, b1, w2, b2, w3, b3, wid, bid = params
    r = lambda a: a.astype(jnp.bfloat16).astype(jnp.float32)
    x = r(x_nhwc)

    def conv(x, w_hwio, b, s):
        y = jax.lax.conv_general_dilated(
            x, w_hwio, (s, s), "VALID",
            dimension_numbers=("NHWC", "HWIO", "NHWC"))
        return y + b.reshape(1, 1, 1, -1)

    w1_hwio = r(w1)[None, None]          # (1,1,Cin,Cmid)
    w2_hwio = r(w2)                      # (K,K,Cmid,Cmid)
    w3_hwio = r(w3)[None, None]          # (1,1,Cmid,Cout)
    wid_hwio = r(wid)[None, None]        # (1,1,Cin,Cout)

    Cin, Cout = x.shape[-1], w3.shape[1]
    resize_identity = (Cin != Cout) or (stride != 1)

    identity = conv(x, wid_hwio, bid[0], stride) if resize_identity else x

    h = jax.nn.relu(conv(x, w1_hwio, b1[0], 1))
    h = jax.nn.relu(conv(h, w2_hwio, b2[0], stride))
    h = conv(h, w3_hwio, b3[0], 1)

    if h.shape[2] != identity.shape[2]:
        diff = identity.shape[2] - h.shape[2]
        identity = identity[:, :-diff, :-diff, :]
    return jax.nn.relu(h + identity)


if __name__ == "__main__":
    # BagNetUnit(in_channels=16, out_channels=32, kernel_size=3, stride=1), NHWC input.
    N, H, W, Cin = 2, 16, 16, 16
    Cout, K, stride = 32, 3, 1

    key = jax.random.PRNGKey(0)
    kx, kp = jax.random.split(key)
    x = jax.random.normal(kx, (N, H, W, Cin), jnp.float32)
    params = make_params(kp, Cin, Cout, K)

    out = bagnet_unit_pallas(x, params, kernel_size=K, stride=stride)
    out = jax.block_until_ready(out)

    ref = jax.block_until_ready(
        ref_bagnet_unit(x, params, kernel_size=K, stride=stride))

    assert out.shape == ref.shape, (out.shape, ref.shape)
    # bf16 MXU inputs + bf16 intermediate activations -> slightly looser tolerance.
    assert jnp.allclose(out, ref, rtol=5e-2, atol=5e-2), \
        float(jnp.max(jnp.abs(out - ref)))

    print("KERNEL_OK")
</pallas_src>

<mosaic_0001>
module attributes {stable_mosaic.version = 11 : i64} {
  func.func @_bagnet_unit_kernel(%arg0: i32, %arg1: memref<1x16x16x16xbf16, #tpu.memory_space<vmem>>, %arg2: memref<16x8xbf16, #tpu.memory_space<vmem>>, %arg3: memref<1x8xf32, #tpu.memory_space<vmem>>, %arg4: memref<72x8xbf16, #tpu.memory_space<vmem>>, %arg5: memref<1x8xf32, #tpu.memory_space<vmem>>, %arg6: memref<24x32xbf16, #tpu.memory_space<vmem>>, %arg7: memref<1x32xf32, #tpu.memory_space<vmem>>, %arg8: memref<1x14x14x32xf32, #tpu.memory_space<vmem>>, %arg9: memref<196x72xbf16, #tpu.memory_space<vmem>>, %arg10: memref<196x24xbf16, #tpu.memory_space<vmem>>) attributes {dimension_semantics = [#tpu.dimension_semantics<parallel>], iteration_bounds = array<i64: 2>, scalar_prefetch = 0 : i64, scratch_operands = 2 : i64, tpu.core_type = #tpu.core_type<tc>, window_params = [{transform_indices = @transform_0, window_bounds = array<i64: 1, 16, 16, 16>}, {pipeline_mode = #tpu.pipeline_mode<synchronous>, transform_indices = @transform_1, window_bounds = array<i64: 16, 8>}, {pipeline_mode = #tpu.pipeline_mode<synchronous>, transform_indices = @transform_2, window_bounds = array<i64: 1, 8>}, {pipeline_mode = #tpu.pipeline_mode<synchronous>, transform_indices = @transform_3, window_bounds = array<i64: 72, 8>}, {pipeline_mode = #tpu.pipeline_mode<synchronous>, transform_indices = @transform_4, window_bounds = array<i64: 1, 8>}, {pipeline_mode = #tpu.pipeline_mode<synchronous>, transform_indices = @transform_5, window_bounds = array<i64: 24, 32>}, {pipeline_mode = #tpu.pipeline_mode<synchronous>, transform_indices = @transform_6, window_bounds = array<i64: 1, 32>}, {transform_indices = @transform_7, window_bounds = array<i64: 1, 14, 14, 32>}]} {
    %c0 = arith.constant 0 : index
    %c0_0 = arith.constant 0 : index
    %c0_1 = arith.constant 0 : index
    %c0_2 = arith.constant 0 : index
    %0 = vector.load %arg1[%c0, %c0_0, %c0_1, %c0_2] : memref<1x16x16x16xbf16, #tpu.memory_space<vmem>>, vector<1x16x16x16xbf16>
    %1 = vector.shape_cast %0 : vector<1x16x16x16xbf16> to vector<16x16x16xbf16>
    %2 = vector.shape_cast %1 : vector<16x16x16xbf16> to vector<256x16xbf16>
    %c0_3 = arith.constant 0 : index
    %c0_4 = arith.constant 0 : index
    %3 = vector.load %arg2[%c0_3, %c0_4] : memref<16x8xbf16, #tpu.memory_space<vmem>>, vector<16x8xbf16>
    %cst = arith.constant dense<0.000000e+00> : vector<256x8xf32>
    %4 = tpu.matmul %2, %3, %cst {dimension_numbers = #tpu.dot_dimension_numbers<[1], [0], [0], [1], [0, 0, 1, 1], [], []>} : vector<256x16xbf16>, vector<16x8xbf16>, vector<256x8xf32> -> vector<256x8xf32>
    %c0_5 = arith.constant 0 : index
    %c0_6 = arith.constant 0 : index
    %5 = vector.load %arg3[%c0_5, %c0_6] : memref<1x8xf32, #tpu.memory_space<vmem>>, vector<1x8xf32>
    %6 = vector.broadcast %5 : vector<1x8xf32> to vector<256x8xf32>
    %7 = arith.addf %4, %6 : vector<256x8xf32>
    %cst_7 = arith.constant 0.000000e+00 : f32
    %8 = vector.broadcast %cst_7 : f32 to vector<256x8xf32>
    %9 = arith.maximumf %7, %8 : vector<256x8xf32>
    %10 = vector.shape_cast %9 : vector<256x8xf32> to vector<16x16x8xf32>
    %11 = arith.truncf %10 : vector<16x16x8xf32> to vector<16x16x8xbf16>
    %12 = vector.extract_strided_slice %11 {offsets = [0, 0, 0], sizes = [14, 14, 8], strides = [1, 1, 1]} : vector<16x16x8xbf16> to vector<14x14x8xbf16>
    %13 = vector.shape_cast %12 : vector<14x14x8xbf16> to vector<196x8xbf16>
    %c0_8 = arith.constant 0 : index
    %c0_9 = arith.constant 0 : index
    %14 = vector.load %arg9[%c0_8, %c0_9] : memref<196x72xbf16, #tpu.memory_space<vmem>>, vector<196x8xbf16>
    tpu.vector_store %arg9[%c0_8, %c0_9], %13 {strides = array<i32>} : memref<196x72xbf16, #tpu.memory_space<vmem>>, vector<196x8xbf16>,
    %15 = vector.extract_strided_slice %11 {offsets = [0, 1, 0], sizes = [14, 14, 8], strides = [1, 1, 1]} : vector<16x16x8xbf16> to vector<14x14x8xbf16>
    %16 = vector.shape_cast %15 : vector<14x14x8xbf16> to vector<196x8xbf16>
    %c0_10 = arith.constant 0 : index
    %c8 = arith.constant 8 : index
    %17 = vector.load %arg9[%c0_10, %c8] : memref<196x72xbf16, #tpu.memory_space<vmem>>, vector<196x8xbf16>
    tpu.vector_store %arg9[%c0_10, %c8], %16 {strides = array<i32>} : memref<196x72xbf16, #tpu.memory_space<vmem>>, vector<196x8xbf16>,
    %18 = vector.extract_strided_slice %11 {offsets = [0, 2, 0], sizes = [14, 14, 8], strides = [1, 1, 1]} : vector<16x16x8xbf16> to vector<14x14x8xbf16>
    %19 = vector.shape_cast %18 : vector<14x14x8xbf16> to vector<196x8xbf16>
    %c0_11 = arith.constant 0 : index
    %c16 = arith.constant 16 : index
    %20 = vector.load %arg9[%c0_11, %c16] : memref<196x72xbf16, #tpu.memory_space<vmem>>, vector<196x8xbf16>
    tpu.vector_store %arg9[%c0_11, %c16], %19 {strides = array<i32>} : memref<196x72xbf16, #tpu.memory_space<vmem>>, vector<196x8xbf16>,
    %21 = vector.extract_strided_slice %11 {offsets = [1, 0, 0], sizes = [14, 14, 8], strides = [1, 1, 1]} : vector<16x16x8xbf16> to vector<14x14x8xbf16>
    %22 = vector.shape_cast %21 : vector<14x14x8xbf16> to vector<196x8xbf16>
    %c0_12 = arith.constant 0 : index
    %c24 = arith.constant 24 : index
    %23 = vector.load %arg9[%c0_12, %c24] : memref<196x72xbf16, #tpu.memory_space<vmem>>, vector<196x8xbf16>
    tpu.vector_store %arg9[%c0_12, %c24], %22 {strides = array<i32>} : memref<196x72xbf16, #tpu.memory_space<vmem>>, vector<196x8xbf16>,
    %24 = vector.extract_strided_slice %11 {offsets = [1, 1, 0], sizes = [14, 14, 8], strides = [1, 1, 1]} : vector<16x16x8xbf16> to vector<14x14x8xbf16>
    %25 = vector.shape_cast %24 : vector<14x14x8xbf16> to vector<196x8xbf16>
    %c0_13 = arith.constant 0 : index
    %c32 = arith.constant 32 : index
    %26 = vector.load %arg9[%c0_13, %c32] : memref<196x72xbf16, #tpu.memory_space<vmem>>, vector<196x8xbf16>
    tpu.vector_store %arg9[%c0_13, %c32], %25 {strides = array<i32>} : memref<196x72xbf16, #tpu.memory_space<vmem>>, vector<196x8xbf16>,
    %27 = vector.extract_strided_slice %11 {offsets = [1, 2, 0], sizes = [14, 14, 8], strides = [1, 1, 1]} : vector<16x16x8xbf16> to vector<14x14x8xbf16>
    %28 = vector.shape_cast %27 : vector<14x14x8xbf16> to vector<196x8xbf16>
    %c0_14 = arith.constant 0 : index
    %c40 = arith.constant 40 : index
    %29 = vector.load %arg9[%c0_14, %c40] : memref<196x72xbf16, #tpu.memory_space<vmem>>, vector<196x8xbf16>
    tpu.vector_store %arg9[%c0_14, %c40], %28 {strides = array<i32>} : memref<196x72xbf16, #tpu.memory_space<vmem>>, vector<196x8xbf16>,
    %30 = vector.extract_strided_slice %11 {offsets = [2, 0, 0], sizes = [14, 14, 8], strides = [1, 1, 1]} : vector<16x16x8xbf16> to vector<14x14x8xbf16>
    %31 = vector.shape_cast %30 : vector<14x14x8xbf16> to vector<196x8xbf16>
    %c0_15 = arith.constant 0 : index
    %c48 = arith.constant 48 : index
    %32 = vector.load %arg9[%c0_15, %c48] : memref<196x72xbf16, #tpu.memory_space<vmem>>, vector<196x8xbf16>
    tpu.vector_store %arg9[%c0_15, %c48], %31 {strides = array<i32>} : memref<196x72xbf16, #tpu.memory_space<vmem>>, vector<196x8xbf16>,
    %33 = vector.extract_strided_slice %11 {offsets = [2, 1, 0], sizes = [14, 14, 8], strides = [1, 1, 1]} : vector<16x16x8xbf16> to vector<14x14x8xbf16>
    %34 = vector.shape_cast %33 : vector<14x14x8xbf16> to vector<196x8xbf16>
    %c0_16 = arith.constant 0 : index
    %c56 = arith.constant 56 : index
    %35 = vector.load %arg9[%c0_16, %c56] : memref<196x72xbf16, #tpu.memory_space<vmem>>, vector<196x8xbf16>
    tpu.vector_store %arg9[%c0_16, %c56], %34 {strides = array<i32>} : memref<196x72xbf16, #tpu.memory_space<vmem>>, vector<196x8xbf16>,
    %36 = vector.extract_strided_slice %11 {offsets = [2, 2, 0], sizes = [14, 14, 8], strides = [1, 1, 1]} : vector<16x16x8xbf16> to vector<14x14x8xbf16>
    %37 = vector.shape_cast %36 : vector<14x14x8xbf16> to vector<196x8xbf16>
    %c0_17 = arith.constant 0 : index
    %c64 = arith.constant 64 : index
    %38 = vector.load %arg9[%c0_17, %c64] : memref<196x72xbf16, #tpu.memory_space<vmem>>, vector<196x8xbf16>
    tpu.vector_store %arg9[%c0_17, %c64], %37 {strides = array<i32>} : memref<196x72xbf16, #tpu.memory_space<vmem>>, vector<196x8xbf16>,
    %c0_18 = arith.constant 0 : index
    %c0_19 = arith.constant 0 : index
    %39 = vector.load %arg9[%c0_18, %c0_19] : memref<196x72xbf16, #tpu.memory_space<vmem>>, vector<196x72xbf16>
    %c0_20 = arith.constant 0 : index
    %c0_21 = arith.constant 0 : index
    %40 = vector.load %arg4[%c0_20, %c0_21] : memref<72x8xbf16, #tpu.memory_space<vmem>>, vector<72x8xbf16>
    %cst_22 = arith.constant dense<0.000000e+00> : vector<196x8xf32>
    %41 = tpu.matmul %39, %40, %cst_22 {dimension_numbers = #tpu.dot_dimension_numbers<[1], [0], [0], [1], [0, 0, 1, 1], [], []>} : vector<196x72xbf16>, vector<72x8xbf16>, vector<196x8xf32> -> vector<196x8xf32>
    %c0_23 = arith.constant 0 : index
    %c0_24 = arith.constant 0 : index
    %42 = vector.load %arg5[%c0_23, %c0_24] : memref<1x8xf32, #tpu.memory_space<vmem>>, vector<1x8xf32>
    %43 = vector.broadcast %42 : vector<1x8xf32> to vector<196x8xf32>
    %44 = arith.addf %41, %43 : vector<196x8xf32>
    %cst_25 = arith.constant 0.000000e+00 : f32
    %45 = vector.broadcast %cst_25 : f32 to vector<196x8xf32>
    %46 = arith.maximumf %44, %45 : vector<196x8xf32>
    %47 = vector.extract_strided_slice %1 {offsets = [0, 0, 0], sizes = [14, 14, 16], strides = [1, 1, 1]} : vector<16x16x16xbf16> to vector<14x14x16xbf16>
    %48 = arith.truncf %46 : vector<196x8xf32> to vector<196x8xbf16>
    %c0_26 = arith.constant 0 : index
    %c0_27 = arith.constant 0 : index
    %49 = vector.load %arg10[%c0_26, %c0_27] : memref<196x24xbf16, #tpu.memory_space<vmem>>, vector<196x8xbf16>
    tpu.vector_store %arg10[%c0_26, %c0_27], %48 {strides = array<i32>} : memref<196x24xbf16, #tpu.memory_space<vmem>>, vector<196x8xbf16>,
    %50 = vector.shape_cast %47 : vector<14x14x16xbf16> to vector<196x16xbf16>
    %c0_28 = arith.constant 0 : index
    %c8_29 = arith.constant 8 : index
    %51 = vector.load %arg10[%c0_28, %c8_29] : memref<196x24xbf16, #tpu.memory_space<vmem>>, vector<196x16xbf16>
    tpu.vector_store %arg10[%c0_28, %c8_29], %50 {strides = array<i32>} : memref<196x24xbf16, #tpu.memory_space<vmem>>, vector<196x16xbf16>,
    %c0_30 = arith.constant 0 : index
    %c0_31 = arith.constant 0 : index
    %52 = vector.load %arg10[%c0_30, %c0_31] : memref<196x24xbf16, #tpu.memory_space<vmem>>, vector<196x24xbf16>
    %c0_32 = arith.constant 0 : index
    %c0_33 = arith.constant 0 : index
    %53 = vector.load %arg6[%c0_32, %c0_33] : memref<24x32xbf16, #tpu.memory_space<vmem>>, vector<24x32xbf16>
    %cst_34 = arith.constant dense<0.000000e+00> : vector<196x32xf32>
    %54 = tpu.matmul %52, %53, %cst_34 {dimension_numbers = #tpu.dot_dimension_numbers<[1], [0], [0], [1], [0, 0, 1, 1], [], []>} : vector<196x24xbf16>, vector<24x32xbf16>, vector<196x32xf32> -> vector<196x32xf32>
    %c0_35 = arith.constant 0 : index
    %c0_36 = arith.constant 0 : index
    %55 = vector.load %arg7[%c0_35, %c0_36] : memref<1x32xf32, #tpu.memory_space<vmem>>, vector<1x32xf32>
    %56 = vector.broadcast %55 : vector<1x32xf32> to vector<196x32xf32>
    %57 = arith.addf %54, %56 : vector<196x32xf32>
    %cst_37 = arith.constant 0.000000e+00 : f32
    %58 = vector.broadcast %cst_37 : f32 to vector<196x32xf32>
    %59 = arith.maximumf %57, %58 : vector<196x32xf32>
    %60 = vector.shape_cast %59 : vector<196x32xf32> to vector<14x14x32xf32>
    %c0_38 = arith.constant 0 : index
    %c0_39 = arith.constant 0 : index
    %c0_40 = arith.constant 0 : index
    %c0_41 = arith.constant 0 : index
    %61 = vector.load %arg8[%c0_38, %c0_39, %c0_40, %c0_41] : memref<1x14x14x32xf32, #tpu.memory_space<vmem>>, vector<1x14x14x32xf32>
    %62 = vector.shape_cast %61 : vector<1x14x14x32xf32> to vector<14x14x32xf32>
    %63 = vector.shape_cast %60 : vector<14x14x32xf32> to vector<1x14x14x32xf32>
    tpu.vector_store %arg8[%c0_38, %c0_39, %c0_40, %c0_41], %63 {strides = array<i32>} : memref<1x14x14x32xf32, #tpu.memory_space<vmem>>, vector<1x14x14x32xf32>,
    return
  }
  func.func @transform_0(%arg0: i32) -> (i32, i32, i32, i32) {
    %c0_i32 = arith.constant 0 : i32
    %c0_i32_0 = arith.constant 0 : i32
    %c0_i32_1 = arith.constant 0 : i32
    %c0_i32_2 = arith.constant 0 : i32
    return %arg0, %c0_i32, %c0_i32_0, %c0_i32_1 : i32, i32, i32, i32
  }
  func.func @transform_1(%arg0: i32) -> (i32, i32) {
    %c0_i32 = arith.constant 0 : i32
    %c0_i32_0 = arith.constant 0 : i32
    %c0_i32_1 = arith.constant 0 : i32
    return %c0_i32, %c0_i32_0 : i32, i32
  }
  func.func @transform_2(%arg0: i32) -> (i32, i32) {
    %c0_i32 = arith.constant 0 : i32
    %c0_i32_0 = arith.constant 0 : i32
    %c0_i32_1 = arith.constant 0 : i32
    return %c0_i32, %c0_i32_0 : i32, i32
  }
  func.func @transform_3(%arg0: i32) -> (i32, i32) {
    %c0_i32 = arith.constant 0 : i32
    %c0_i32_0 = arith.constant 0 : i32
    %c0_i32_1 = arith.constant 0 : i32
    return %c0_i32, %c0_i32_0 : i32, i32
  }
  func.func @transform_4(%arg0: i32) -> (i32, i32) {
    %c0_i32 = arith.constant 0 : i32
    %c0_i32_0 = arith.constant 0 : i32
    %c0_i32_1 = arith.constant 0 : i32
    return %c0_i32, %c0_i32_0 : i32, i32
  }
  func.func @transform_5(%arg0: i32) -> (i32, i32) {
    %c0_i32 = arith.constant 0 : i32
    %c0_i32_0 = arith.constant 0 : i32
    %c0_i32_1 = arith.constant 0 : i32
    return %c0_i32, %c0_i32_0 : i32, i32
  }
  func.func @transform_6(%arg0: i32) -> (i32, i32) {
    %c0_i32 = arith.constant 0 : i32
    %c0_i32_0 = arith.constant 0 : i32
    %c0_i32_1 = arith.constant 0 : i32
    return %c0_i32, %c0_i32_0 : i32, i32
  }
  func.func @transform_7(%arg0: i32) -> (i32, i32, i32, i32) {
    %c0_i32 = arith.constant 0 : i32
    %c0_i32_0 = arith.constant 0 : i32
    %c0_i32_1 = arith.constant 0 : i32
    %c0_i32_2 = arith.constant 0 : i32
    return %arg0, %c0_i32, %c0_i32_0, %c0_i32_1 : i32, i32, i32, i32
  }
}

</mosaic_0001>

<bundles_post_ra>
// kernel: tpu_custom_call.1
= control target key start
LH: loop header
LB: loop body
LE: loop exit
PB: predicated region body
PF: predicated region fallthrough
CT: control target
= control target key end

     0   :  { %12 = vsyncpa [#allocation5], 0  ;;  %s15733_s0 = inlined_call_operand.hbm [shape: bf16[2,16,16,16], index: 0, kind: input, shape index: {}]   ;;  %s15734_s1 = inlined_call_operand.vmem [shape: bf16[16,8], index: 1, kind: input, shape index: {}]   ;;  %s15735_s2 = inlined_call_operand.vmem [shape: f32[1,8], index: 2, kind: input, shape index: {}]   ;;  %s15736_s3 = inlined_call_operand.vmem [shape: bf16[72,8], index: 3, kind: input, shape index: {}]   ;;  %s15737_s4 = inlined_call_operand.vmem [shape: f32[1,8], index: 4, kind: input, shape index: {}]   ;;  %s15738_s5 = inlined_call_operand.vmem [shape: bf16[24,32], index: 5, kind: input, shape index: {}]   ;;  %s15739_s6 = inlined_call_operand.vmem [shape: f32[1,32], index: 6, kind: input, shape index: {}]   ;;  %s15740_s7 = inlined_call_operand.vmem [shape: f32[2,14,14,32], index: 7, kind: output, shape index: {}]  }
   0x1   :  { %14 = vsyncpa [#allocation5 + $0x1], 0  ;;  %s10841_s24 = smov 0   ;;  %s10843_s25 = smov 0  }
   0x2   :  { %s10845_s26 = smov 0   ;;  %s10847_s27 = smov 0  }
   0x3 LB: > { %s10860_s28 = sadd.s32 4294967295, %s10783_s27   ;;  %s10863_s29 = sadd.s32 1, %s10783_s27   ;;  %s10783_s27 = sphi %s10847_s27, %s16455_s27   ;;  %s10779_s26 = sphi %s10845_s26, %s16454_s26   ;;  %s10775_s25 = sphi %s10843_s25, %s16453_s25   ;;  %s10771_s24 = sphi %s10841_s24, %s16452_s24  }
   0x4   : > { %s24_s30 = ssub.s32 %s10783_s27, %s10863_s29  ;;  %s27_s8 = sadd.s32 1, %s10779_s26 }
   0x5   : > { %p25_p0 = scmp.eq.s32.totalorder %s24_s30, 0  ;;  %p34_p1 = scmp.ne.s32.totalorder %s10779_s26, %s10775_s25 }
   0x6   : > { %p35_p2 = scmp.eq.s32.totalorder %s10783_s27, 0  ;;  %p40_p3 = scmp.ne.s32.totalorder %s10775_s25, %s10771_s24 }
   0x7   : > { %s10873_s9 = scalar_select %p25_p0, %s10779_s26, %s27_s8  }
   0x8   : > { %p36_p4 = por %p35_p2, %p34_p1  ;;  %p41_p5 = scmp.eq.s32.totalorder %s10860_s28, 0 }
   0x9   : > { %p10564_p6 = scmp.lt.s32.totalorder %s10783_s27, 2  ;;  %s234_s11 = sand.u32 1, %s10779_s26  }
   0xa   : > { %p10877_p7 = por %p41_p5, %p40_p3  ;;  %s10059_s12 = sshll.u32 %s234_s11, 7 }
   0xb   : > { %s10327_s13 = sshll.u32 %s10783_s27, 11  ;;  %s238_s17 = scalar_lea.vmem [#allocation4], %s10059_s12 }
   0xc   : > { %s10886_s16 = scalar_lea.hbm %s15733_s0, %s10327_s13  ;;  %s245_s18 = sshll.u32 %s238_s17, 4  ;;  %s10888_s18 = int_to_ptr.vmem [resolvable:$true] %s245_s18 }
   0xd   : > { %p10890_p8 = pnand %p10564_p6, %p36_p4  ;;  %s10895_s20 = scalar_lea.sflag [#allocation5], %s234_s11 }
   0xe   : > { %s10719_s21 = scalar_lea.hbm %s10886_s16, 2048  ;;  %s10724_s24 = scalar_lea.hbm %s15733_s0, 4096 }
   0xf   : > { %p10720_p10 = scmp.ne.s32.totalorder %s10886_s16, %s10719_s21  ;;  %p10721_p11 = pneg %p10890_p8 }
  0x10   : > { %p10725_p0 = scmp.lt.u32.totalorder %s10886_s16, %s15733_s0  ;;  %p10726_p1 = scmp.lt.u32.totalorder %s10724_s24, %s10719_s21 }
  0x11   : > { %p10722_p12 = pnand %p10721_p11, %p10720_p10  ;;  %p10728_p3 = scmp.lt.u32.totalorder %s10719_s21, %s10886_s16 }
  0x12   : > { %p10727_p2 = por %p10726_p1, %p10725_p0 }
  0x13   : > { %p10723_p13 = pneg %p10722_p12 }
  0x14   : > { %p10729_p4 = por %p10728_p3, %p10727_p2 }
  0x16   : > { %p10730_p5 = pnand %p10729_p4, %p10723_p13 }
  0x18   : > { %10733 = shalt.err (!%p10730_p5)
}
  0x19   : > { %s10734_s11 = scalar_lea.vmem %s10888_s18, 2048  ;;  %s10785_s12 = smov [#allocation4]  }
  0x1a   : > { %p10735_p6 = scmp.ne.s32.totalorder %s10888_s18, %s10734_s11  ;;  %s10739_s13 = sshll.u32 %s10785_s12, 4  ;;  %s10740_s13 = int_to_ptr.vmem [resolvable:$false] %s10739_s13 }
  0x1b   : > { %s10741_s14 = scalar_lea.vmem %s10740_s13, 4096  ;;  %p10742_p9 = scmp.lt.s32.totalorder %s10888_s18, %s10740_s13 }
  0x1c   : > { %p10737_p10 = pnand %p10735_p6, %p10721_p11  ;;  %p10743_p0 = scmp.lt.s32.totalorder %s10741_s14, %s10734_s11 }
  0x1e   : > { %p10738_p12 = pneg %p10737_p10  ;;  %p10744_p1 = por %p10743_p0, %p10742_p9 }
  0x20   : > { %p10745_p2 = pnand %p10744_p1, %p10738_p12 }
  0x22   : > { %10748 = shalt.err (!%p10745_p2)
}
  0x23   : > { %s10786_s15 = smov 64   ;;  %s10787_s17 = smov 4  }
  0x24   : > { %10563 = dma.hbm_to_vmem [thread:$0]  (!%p10890_p8), %s10886_s16, 2048, %s10888_s18, %s10895_s20, %s10786_s15, %s10786_s15, %s10787_s17  }
  0x25   : > { %p253_p11 = scmp.lt.s32.totalorder %s10783_s27, 3  ;;  %p15943_p13 = scmp.ge.s32.totalorder %s10783_s27, 1 }
  0x27   : > { %p254_p3 = pnand %p15943_p13, %p253_p11 }
  0x29   : > { %257 = sbr.rel (%p254_p3) target bundleno = 1306 (0x51a), region = 48 }
  0x30   : > { %s259_s21 = sand.u32 1, %s10775_s25  }
  0x31   : > { %s10063_s22 = sshll.u32 %s259_s21, 7  ;;  %s260_s23 = scalar_lea.sflag [#allocation5], %s259_s21 }
  0x32   : > { %s10927_s24 = scalar_lea.vmem [#allocation4], %s10063_s22 }
  0x33   : > { %10766 = dma.done.wait (%p10877_p7), %s260_s23, 2048  }
  0x34   : > { %10768 = vsyncadd (%p10877_p7), %s260_s23, 4294965248  ;;  %v10612_v0 = vld [vmem:[%s15734_s1] sm:$0xff]   ;;  %vm427_vm0 = vcmask 130048   ;;  %v300_v1 = vld [vmem:[%s10927_s24] sm:$0xf]  ;;  %s10790_s16 = smov 48  }
  0x35   : > { %v301_v2 = vld [vmem:[%s10927_s24 + $0x4] sm:$0xf]  ;;  %v316_v3 = vld [vmem:[%s10927_s24 + $0x40] sm:$0xf]  ;;  %10403 = vmatprep.subr.bf16.mxu0 %v10612_v0  ;;  %10555 = vmatprep.subr.bf16.mxu1 %v10612_v0  ;;  %v302_v7 = vld [vmem:[%s10927_s24 + $0x8] sm:$0xf] }
  0x36   : > { %v10066_v4 = vcombine.low %v300_v1, %v301_v2  ;;  %v317_v5 = vld [vmem:[%s10927_s24 + $0x44] sm:$0xf]  ;;  %10404 = vmatpush3.bf16.msra.mxu0 %v10612_v0  ;;  %10556 = vmatpush3.bf16.msra.mxu1 %v10612_v0  ;;  %v303_v8 = vld [vmem:[%s10927_s24 + $0xc] sm:$0xf]  ;;  %v318_v10 = vld [vmem:[%s10927_s24 + $0x48] sm:$0xf] }
  0x37   : > { %v10074_v6 = vcombine.low %v316_v3, %v317_v5  ;;  %v10067_v9 = vcombine.low %v302_v7, %v303_v8  ;;  %v319_v11 = vld [vmem:[%s10927_s24 + $0x4c] sm:$0xf]  ;;  %v304_v12 = vld [vmem:[%s10927_s24 + $0x10] sm:$0xf]  ;;  %v305_v13 = vld [vmem:[%s10927_s24 + $0x14] sm:$0xf]  ;;  %v703_v8 = vlaneseq }
  0x38   : > { %10405 = vmatprep.mubr.msk.bf16.mxu0 %vm427_vm0, %v10066_v4  ;;  %v320_v14 = vld [vmem:[%s10927_s24 + $0x50] sm:$0xf]  ;;  %v10075_v15 = vcombine.low %v318_v10, %v319_v11  ;;  %v321_v16 = vld [vmem:[%s10927_s24 + $0x54] sm:$0xf]  ;;  %v10068_v17 = vcombine.low %v304_v12, %v305_v13  ;;  %v306_v19 = vld [vmem:[%s10927_s24 + $0x18] sm:$0xf] }
  0x39   : > { %10421 = vmatprep.mubr.msk.bf16.mxu1 %vm427_vm0, %v10074_v6  ;;  %10406 = vmatmul.mubr.msk.bf16.vlgmr.msra.gmra.mrb[0].mxu0 %vm427_vm0, %v10067_v9  ;;  %v10076_v18 = vcombine.low %v320_v14, %v321_v16  ;;  %v307_v20 = vld [vmem:[%s10927_s24 + $0x1c] sm:$0xf]  ;;  %v322_v21 = vld [vmem:[%s10927_s24 + $0x58] sm:$0xf]  ;;  %v308_v25 = vld [vmem:[%s10927_s24 + $0x20] sm:$0xf] }
  0x3a   : > { %10422 = vmatmul.mubr.msk.bf16.vlgmr.msra.gmra.mrb[0].mxu1 %vm427_vm0, %v10075_v15  ;;  %10409 = vmatprep.mubr.msk.bf16.mxu0 %vm427_vm0, %v10068_v17  ;;  %v323_v22 = vld [vmem:[%s10927_s24 + $0x5c] sm:$0xf]  ;;  %v10069_v23 = vcombine.low %v306_v19, %v307_v20  ;;  %v309_v26 = vld [vmem:[%s10927_s24 + $0x24] sm:$0xf]  ;;  %v310_v27 = vld [vmem:[%s10927_s24 + $0x28] sm:$0xf] }
  0x3b   : > { %10425 = vmatprep.mubr.msk.bf16.mxu1 %vm427_vm0, %v10076_v18  ;;  %v10077_v24 = vcombine.low %v322_v21, %v323_v22  ;;  %v311_v28 = vld [vmem:[%s10927_s24 + $0x2c] sm:$0xf]  ;;  %v10070_v29 = vcombine.low %v308_v25, %v309_v26  ;;  %v312_v31 = vld [vmem:[%s10927_s24 + $0x30] sm:$0xf]  ;;  %v313_v32 = vld [vmem:[%s10927_s24 + $0x34] sm:$0xf] }
  0x3c   : > { %v10071_v30 = vcombine.low %v310_v27, %v311_v28  ;;  %v314_v33 = vld [vmem:[%s10927_s24 + $0x38] sm:$0xf]  ;;  %v315_v34 = vld [vmem:[%s10927_s24 + $0x3c] sm:$0xf]  ;;  %v10072_v35 = vcombine.low %v312_v31, %v313_v32  ;;  %v324_v36 = vld [vmem:[%s10927_s24 + $0x60] sm:$0xf] }
  0x3d   : > { %v325_v37 = vld [vmem:[%s10927_s24 + $0x64] sm:$0xf]  ;;  %v10073_v38 = vcombine.low %v314_v33, %v315_v34  ;;  %v326_v40 = vld [vmem:[%s10927_s24 + $0x68] sm:$0xf]  ;;  %v327_v41 = vld [vmem:[%s10927_s24 + $0x6c] sm:$0xf] }
  0x3e   : > { %v10078_v39 = vcombine.low %v324_v36, %v325_v37  ;;  %v10627_v42 = vld [vmem:[%s10927_s24 + $0x70] sm:$0xff]   ;;  %v10079_v43 = vcombine.low %v326_v40, %v327_v41  ;;  %v10628_v44 = vld [vmem:[%s10927_s24 + $0x78] sm:$0xff]   ;;  %v10788_v6 = vmov 1966171168   ;;  %v10998_v20 = vshrl.u32 %v703_v8, 7  ;;  %s10791_s18 = smov 24  }
  0x3f   : > { %v10985_v46 = vld [vmem:[%s15735_s2] ss:$0 sm:$0xff]  ;;  %v701_v7 = vunpack.c.l.s4 %v10788_v6  ;;  %v10789_v26 = vmov 1935823168   ;;  %vm2035_vm1 = vsmask.f32 256 }
  0x40   : > { %15944 = vst [vmem:[#allocation7_spill] sm:$0xff] %v10998_v20  ;;  %v1374_v27 = vunpack.c.l.s4 %v10789_v26  ;;  %vm2036_vm2 = vsmask.f32 1284  ;;  %vm2038_vm3 = vsmask.f32 2312  ;;  %s10792_s19 = smov 64  }
  0x41   : > { %10410 = vmatmul.mubr.msk.bf16.gmra.mrb[4].mxu0 %vm427_vm0, %v10069_v23  ;;  %v702_v19 = vunpack.c.0.s8 %v701_v7  ;;  %vm2040_vm4 = vsmask.f32 3340  ;;  %vm2042_vm5 = vsmask.f32 4368  ;;  %vm11321_vm6 = vmor %vm2035_vm1, %vm2036_vm2  ;;  %vm2044_vm7 = vsmask.f32 5396 }
  0x42   : > { %10426 = vmatmul.mubr.msk.bf16.gmra.mrb[4].mxu1 %vm427_vm0, %v10077_v24  ;;  %10413 = vmatprep.mubr.msk.bf16.mxu0 %vm427_vm0, %v10070_v29  ;;  %s10793_s20 = smov 40   ;;  %vm11357_vm8 = vmor %vm11321_vm6, %vm2038_vm3  ;;  %vm2046_vm9 = vsmask.f32 6424  ;;  %s10794_s11 = smov 16   ;;  %vm2048_vm11 = vsmask.f32 7452 }
  0x43   : > { %10429 = vmatprep.mubr.msk.bf16.mxu1 %vm427_vm0, %v10078_v39  ;;  %v11005_v25 = vsub.s32 %v702_v19, %v10998_v20  ;;  %vm11387_vm10 = vmor %vm11357_vm8, %vm2040_vm4  ;;  %s10795_s12 = smov 32   ;;  %s10796_s13 = smov 56   ;;  %vm3521_vm1 = vcmask 126016   ;;  %vm4078_vm2 = vcmask 191616   ;;  %vm4651_vm3 = vcmask 257216  }
  0x44   : > { %vm11417_vm12 = vmor %vm11387_vm10, %vm2042_vm5  ;;  %s10797_s14 = smov 8   ;;  %vm5233_vm4 = vcmask 322816   ;;  %vm5534_vm5 = vcmask 388416   ;;  %vm5987_vm6 = vcmask 454016   ;;  %vm10799_vm8 = vmmov 0   ;;  %p294_p7 = scmp.lt.s32.totalorder %s10860_s28, 1 }
  0x45   : > { %15945 = vst [vmem:[#allocation8_spill] sm:$0xff] %v11005_v25  ;;  %vm11446_vm13 = vmor %vm11417_vm12, %vm2044_vm7  ;;  %vm7068_vm7 = vcmask 1043456   ;;  %vm6870_vm10 = vcmask 585216   ;;  %vm2019_vm12 = vcmask 58368  }
  0x46   : > { %vm11486_vm14 = vmor %vm11446_vm13, %vm2046_vm9  ;;  %vm6569_vm9 = vcmask 519616   ;;  %vm3546_vm13 = vcmask 123968   ;;  %s16457_s28 = smov (!%p294_p7, %s10860_s28), 1 }
  0x47   : > { %vm11520_vm15 = vmor %vm11486_vm14, %vm2048_vm11  ;;  %vm7028_vm11 = vcmask 588800   ;;  %vm4103_vm14 = vcmask 189568  }
  0x49   : > { %10414 = vmatmul.mubr.msk.bf16.gmra.mrb[8].mxu0 %vm427_vm0, %v10071_v30 }
  0x4a   : > { %10417 = vmatprep.mubr.msk.bf16.mxu0 %vm427_vm0, %v10072_v35  ;;  %10430 = vmatmul.mubr.msk.bf16.gmra.mrb[8].mxu1 %vm427_vm0, %v10079_v43 }
  0x4b   : > { %10433 = vmatprep.mubr.msk.bf16.mxu1 %vm427_vm0, %v10627_v42 }
  0x51   : > { %10418 = vmatmul.mubr.msk.bf16.gmra.mrb[12].mxu0 %vm427_vm0, %v10073_v38 }
  0x52   : > { %10434 = vmatmul.mubr.msk.bf16.gmra.mrb[12].mxu1 %vm427_vm0, %v10628_v44  ;;  %vm1994_vm0 = vcmask 60416  }
 0x10c   : > { %v10407_v45 = vpop.f32.mrb[0].mxu0 }
 0x10d   : > { %v519_v47 = vadd.f32 %v10407_v45, %v10985_v46  ;;  %v510_v48 = vpop.f32.mrb[1].mxu0  ;;  %v10423_v54 = vpop.f32.mrb[0].mxu1 }
 0x10e   : > { %v511_v49 = vadd.f32 %v10985_v46, %v510_v48  ;;  %v10408_v50 = vpop.f32.mrb[2].mxu0  ;;  %v574_v57 = vpop.f32.mrb[1].mxu1  ;;  %v583_v59 = vadd.f32 %v10423_v54, %v10985_v46 }
 0x10f   : > { %v639_v51 = vmax.f32 %v519_v47, 0.0  ;;  %v522_v52 = vadd.f32 %v10408_v50, %v10985_v46  ;;  %v513_v53 = vpop.f32.mrb[3].mxu0  ;;  %v10424_v60 = vpop.f32.mrb[2].mxu1  ;;  %v575_v3 = vadd.f32 %v10985_v46, %v574_v57 }
 0x110   : > { %v637_v55 = vmax.f32 %v511_v49, 0.0  ;;  %v514_v56 = vadd.f32 %v10985_v46, %v513_v53  ;;  %v586_v63 = vadd.f32 %v10424_v60, %v10985_v46  ;;  %v577_v0 = vpop.f32.mrb[3].mxu1  ;;  %v655_v5 = vmax.f32 %v583_v59, 0.0 }
 0x111   : > { %v640_v58 = vmax.f32 %v522_v52, 0.0  ;;  %v578_v2 = vadd.f32 %v10985_v46, %v577_v0  ;;  %v653_v14 = vmax.f32 %v575_v3, 0.0  ;;  %v1375_v52 = vunpack.c.0.s8 %v1374_v27 }
 0x112   : > { %v638_v61 = vmax.f32 %v514_v56, 0.0  ;;  %v10995_v4 = vmax.f32 %v586_v63, 0.0 }
 0x113   : > { %v670_v62 = vpack.c.bf16 %v640_v58, %v639_v51  ;;  %v654_v9 = vmax.f32 %v578_v2, 0.0  ;;  %v10100_v29 = vpack.c.bf16 %v640_v58, %v640_v58 }
 0x114   : > { %v669_v1 = vpack.c.bf16 %v638_v61, %v637_v55  ;;  %v10411_v10 = vpop.f32.mrb[4].mxu0  ;;  %v678_v11 = vpack.c.bf16 %v10995_v4, %v655_v5  ;;  %v10099_v30 = vpack.c.bf16 %v638_v61, %v638_v61  ;;  %v10108_v61 = vpack.c.bf16 %v10995_v4, %v10995_v4 }
 0x115   : > { %v10427_v12 = vpop.f32.mrb[4].mxu1  ;;  %v526_v13 = vpop.f32.mrb[5].mxu0  ;;  %v11000_v21 = vpack.c.bf16 %v654_v9, %v653_v14  ;;  %v535_v23 = vadd.f32 %v10411_v10, %v10985_v46  ;;  %v10107_v31 = vpack.c.bf16 %v654_v9, %v654_v9  ;;  %v754_v44 = vrot.slane %v670_v62, %v11005_v25 }
 0x116   : > { %v590_v15 = vpop.f32.mrb[5].mxu1  ;;  %v10412_v16 = vpop.f32.mrb[6].mxu0  ;;  %v599_v24 = vadd.f32 %v10427_v12, %v10985_v46  ;;  %v527_v32 = vadd.f32 %v10985_v46, %v526_v13  ;;  %v761_v48 = vrot.slane %v10100_v29, %v11005_v25  ;;  %v1138_v53 = vrot.slane %v678_v11, %v11005_v25 }
 0x117   : > { %v10428_v17 = vpop.f32.mrb[6].mxu1  ;;  %v529_v18 = vpop.f32.mrb[7].mxu0  ;;  %v643_v34 = vmax.f32 %v535_v23, 0.0  ;;  %v591_v36 = vadd.f32 %v10985_v46, %v590_v15  ;;  %v538_v37 = vadd.f32 %v10412_v16, %v10985_v46  ;;  %v706_v54 = vrot.slane %v669_v1, %v11005_v25 }
 0x118   : > { %v593_v22 = vpop.f32.mrb[7].mxu1  ;;  %v659_v35 = vmax.f32 %v599_v24, 0.0  ;;  %v641_v39 = vmax.f32 %v527_v32, 0.0  ;;  %v602_v40 = vadd.f32 %v10428_v17, %v10985_v46  ;;  %v530_v41 = vadd.f32 %v10985_v46, %v529_v18 }
 0x119   : > { %v594_v42 = vadd.f32 %v10985_v46, %v593_v22  ;;  %v657_v45 = vmax.f32 %v591_v36, 0.0  ;;  %v11014_v47 = vmax.f32 %v538_v37, 0.0  ;;  %v713_v56 = vrot.slane %v10099_v30, %v11005_v25 }
 0x11a   : > { %v11017_v49 = vmax.f32 %v602_v40, 0.0  ;;  %v11019_v50 = vmax.f32 %v530_v41, 0.0  ;;  %v11028_v57 = vrot.slane %v10107_v31, %v11005_v25  ;;  %v762_v60 = vcombine.high %v754_v44, %v754_v44 }
 0x11b   : > { %v11021_v51 = vmax.f32 %v594_v42, 0.0  ;;  %v672_v55 = vpack.c.bf16 %v11014_v47, %v643_v34  ;;  %v763_v0 = vcombine.high %v761_v48, %v761_v48  ;;  %v11042_v1 = vrot.slane %v754_v44, %v11005_v25 }
 0x11c   : > { %v10415_v28 = vpop.f32.mrb[8].mxu0  ;;  %v11031_v58 = vpack.c.bf16 %v11017_v49, %v659_v35  ;;  %v11034_v59 = vpack.c.bf16 %v11019_v50, %v641_v39  ;;  %v11048_v5 = vsub.s32 %v1375_v52, %v10998_v20  ;;  %v11051_v6 = vrot.slane %v761_v48, %v11005_v25 }
 0x11d   : > { %v542_v33 = vpop.f32.mrb[9].mxu0  ;;  %v11039_v62 = vpack.c.bf16 %v11021_v51, %v657_v45  ;;  %15946 = vst [vmem:[#allocation9_spill] sm:$0xff] %v11042_v1  ;;  %v551_v2 = vadd.f32 %v10415_v28, %v10985_v46  ;;  %v1146_v7 = vcombine.high %v1138_v53, %v1138_v53  ;;  %v714_v8 = vcombine.high %v706_v54, %v706_v54  ;;  %v11060_v12 = vpop.f32.mrb[8].mxu1 }
 0x11e   : > { %v10416_v38 = vpop.f32.mrb[10].mxu0  ;;  %v715_v9 = vcombine.high %v713_v56, %v713_v56  ;;  %v11057_v10 = vrot.slane %v11028_v57, %v11005_v25  ;;  %v11063_v13 = vrot.slane %v762_v60, %v11005_v25  ;;  %v1145_v14 = vrot.slane %v10108_v61, %v11005_v25  ;;  %v11070_v17 = vpop.f32.mrb[9].mxu1 }
 0x11f   : > { %v545_v43 = vpop.f32.mrb[11].mxu0  ;;  %v554_v11 = vadd.f32 %v10416_v38, %v10985_v46  ;;  %v11067_v15 = vrot.slane %v1138_v53, %v11005_v25  ;;  %v543_v16 = vadd.f32 %v10985_v46, %v542_v33  ;;  %v11073_v18 = vrot.slane %v763_v0, %v11005_v25  ;;  %v11082_v24 = vpop.f32.mrb[10].mxu1 }
 0x120   : > { %v11077_v19 = vcombine.high %v11042_v1, %v11042_v1  ;;  %v11080_v22 = vrot.slane %v706_v54, %v11005_v25  ;;  %v647_v23 = vmax.f32 %v551_v2, 0.0  ;;  %v11086_v27 = vrot.slane %v1146_v7, %v11005_v25  ;;  %v11093_v30 = vpop.f32.mrb[11].mxu1 }
 0x121   : > { %15948 = vst [vmem:[#allocation11_spill] sm:$0xff] %v11067_v15  ;;  %v11089_v28 = vrot.slane %v713_v56, %v11005_v25  ;;  %v1090_v29 = vrot.slane %v11000_v21, %v11005_v25  ;;  %v11096_v31 = vrot.slane %v714_v8, %v11005_v25  ;;  %v11098_v32 = vmax.f32 %v554_v11, 0.0 }
 0x122   : > { %v546_v33 = vadd.f32 %v10985_v46, %v545_v43  ;;  %v11103_v34 = vcombine.high %v11057_v10, %v11057_v10  ;;  %v1147_v35 = vcombine.high %v1145_v14, %v1145_v14  ;;  %v11106_v36 = vrot.slane %v715_v9, %v11005_v25 }
 0x123   : > { %15949 = vst [vmem:[#allocation12_spill] sm:$0xff] %v11089_v28  ;;  %v645_v37 = vmax.f32 %v543_v16, 0.0  ;;  %v11110_v21 = vcombine.high %v11067_v15, %v11067_v15  ;;  %v11113_v38 = vrot.slane %v1145_v14, %v11005_v25  ;;  %v11117_v39 = vcombine.high %v11080_v22, %v11080_v22 }
 0x124   : > { %v10419_v63 = vpop.f32.mrb[12].mxu0  ;;  %15950 = vst [vmem:[#allocation13_spill] sm:$0xff] %v11106_v36  ;;  %v10102_v40 = vpack.c.bf16 %v11014_v47, %v11014_v47  ;;  %v11122_v41 = vpack.c.bf16 %v11098_v32, %v647_v23  ;;  %v1098_v42 = vcombine.high %v1090_v29, %v1090_v29  ;;  %v11124_v43 = vmax.f32 %v546_v33, 0.0 }
 0x125   : > { %v11045_v3 = vpop.f32.mrb[13].mxu0  ;;  %v3821_v44 = vcombine.low %v11103_v34, %v11086_v27  ;;  %v4378_v45 = vcombine.low %v11067_v15, %v11110_v21  ;;  %v1099_v52 = vcombine.high %v11028_v57, %v11028_v57  ;;  %v10110_v47 = vpack.c.bf16 %v11017_v49, %v11017_v49 }
 0x126   : > { %15947 = vst [vmem:[#allocation10_spill] sm:$0xff] %v11045_v3  ;;  %v11053_v4 = vpop.f32.mrb[14].mxu0  ;;  %v10101_v53 = vpack.c.bf16 %v11019_v50, %v11019_v50  ;;  %v850_v54 = vrot.slane %v672_v55, %v11005_v25  ;;  %v11139_v56 = vpack.c.bf16 %v11124_v43, %v645_v37  ;;  %v11148_v0 = vrot.slane %v1147_v35, %v11005_v25 }
 0x127   : > { %v11142_v60 = vrot.slane %v3821_v44, %v11048_v5  ;;  %v11145_v61 = vrot.slane %v4378_v45, %v11048_v5  ;;  %v11153_v57 = vrot.slane %v1090_v29, %v11005_v25  ;;  %v857_v50 = vrot.slane %v10102_v40, %v11005_v25 }
 0x128   : > { %15951 = vst [vmem:[#allocation14_spill] sm:$0xff] %v11139_v56  ;;  %v11157_v55 = vrot.slane %v1098_v42, %v11005_v25  ;;  %v567_v7 = vadd.f32 %v10419_v63, %v10985_v46  ;;  %v11164_v8 = vcombine.high %v11113_v38, %v11113_v38  ;;  %v11167_v9 = vrot.slane %v1099_v52, %v11005_v25 }
 0x129   : > { %15952 = vst [vmem:[#allocation15_spill] sm:$0xff] %v11153_v57  ;;  %v5738_v2 = vcombine.low %v11142_v60, %v11145_v61  ;;  %v1234_v11 = vrot.slane %v11031_v58, %v11005_v25  ;;  %v11175_v16 = vcombine.high %v11086_v27, %v11086_v27  ;;  %v858_v23 = vcombine.high %v850_v54, %v850_v54 }
 0x12a   : > { %15953 = vst [vmem:[#allocation16_spill] sm:$0xff] %v11157_v55  ;;  %15954 = vst [vmem:[#allocation17_spill] sm:$0xff] %v11167_v9  ;;  %v1241_v63 = vrot.slane %v10110_v47, %v11005_v25  ;;  %v11180_v29 = vrot.slane %v11034_v59, %v11005_v25  ;;  %v11183_v33 = vrot.slane %v10101_v53, %v11005_v25  ;;  %v651_v44 = vmax.f32 %v567_v7, 0.0 }
 0x12b   : > { %v859_v35 = vcombine.high %v857_v50, %v857_v50  ;;  %v5745_v58 = vrot.slane %v5738_v2, %v11048_v5  ;;  %v3844_v37 = vcombine.low %v11175_v16, %v11148_v0  ;;  %v4394_v40 = vcombine.low %v11113_v38, %v11164_v8 }
 0x12c   : > { %v11191_v42 = vrot.slane %v850_v54, %v11005_v25  ;;  %v570_v59 = vadd.f32 %v11053_v4, %v10985_v46  ;;  %v11197_v45 = vcombine.high %v11063_v13, %v11063_v13  ;;  %v11200_v52 = vrot.slane %v857_v50, %v11005_v25 }
 0x12d   : > { %5936 = vrot.lane.b32.xlu0 %v5745_v58, %s10790_s16  ;;  %v11204_v47 = vrot.slane %v3844_v37, %v11048_v5  ;;  %v11207_v53 = vrot.slane %v4394_v40, %v11048_v5  ;;  %v4154_v54 = vcombine.low %v11042_v1, %v11077_v19  ;;  %v1242_v4 = vcombine.high %v1234_v11, %v1234_v11 }
 0x12e   : > { %15955 = vst [vmem:[#allocation18_spill] sm:$0xff] %v11191_v42  ;;  %15956 = vst [vmem:[#allocation19_spill] sm:$0xff] %v11200_v52  ;;  %v11211_v2 = vmax.f32 %v570_v59, 0.0  ;;  %v1419_v50 = vcombine.low %v11063_v13, %v11197_v45  ;;  %v11217_v7 = vcombine.high %v11148_v0, %v11148_v0  ;;  %v1243_v58 = vcombine.high %v1241_v63, %v1241_v63 }
 0x12f   : > { %15957 = vst [vmem:[#allocation20_spill] sm:$0xff] %v11207_v53  ;;  %v5746_v37 = vcombine.low %v11204_v47, %v11207_v53  ;;  %v1420_v40 = vcombine.low %v11077_v19, %v11051_v6  ;;  %v11225_v48 = vcombine.high %v11096_v31, %v11096_v31  ;;  %v11228_v59 = vrot.slane %v1234_v11, %v11005_v25 }
 0x130   : > { %v11231_v26 = vpack.c.bf16 %v11211_v2, %v651_v44  ;;  %v1427_v14 = vrot.slane %v1419_v50, %v11048_v5  ;;  %v4161_v49 = vrot.slane %v4154_v54, %v11048_v5  ;;  %v5356_v3 = vcombine.low %v11148_v0, %v11217_v7 }
 0x131   : > { %15958 = vst [vmem:[#allocation21_spill] sm:$0xff] %v11228_v59  ;;  %v5753_v20 = vrot.slane %v5746_v37, %v11048_v5  ;;  %v11239_v52 = vrot.slane %v1420_v40, %v11048_v5  ;;  %v1372_v11 = vcombine.low %v11096_v31, %v11225_v48  ;;  %v11244_v59 = vrot.slane %v858_v23, %v11005_v25 }
 0x132   : > { %15959 = vst [vmem:[#allocation22_spill] sm:$0xff] %v11231_v26  ;;  %v11247_v44 = vrot.slane %v859_v35, %v11005_v25  ;;  %v11250_v54 = vrot.slane %v1241_v63, %v11005_v25  ;;  %v4162_v50 = vcombine.low %v4161_v49, %v1427_v14  ;;  %v11254_v37 = vrot.slane %v5356_v3, %v11048_v5 }
 0x133   : > { %15960 = vst [vmem:[#allocation23_spill] sm:$0xff] %v11244_v59  ;;  %5938 = vrot.lane.b32.xlu1 %v5753_v20, %s10790_s16  ;;  %v1435_v40 = vcombine.low %v1427_v14, %v11239_v52  ;;  %v11258_v26 = vrot.slane %v1372_v11, %v11048_v5  ;;  %v3548_v23 = vcombine.low %v11117_v39, %v11089_v28 }
 0x134   : > { %15961 = vst [vmem:[#allocation24_spill] sm:$0xff] %v11247_v44  ;;  %15962 = vst [vmem:[#allocation25_spill] sm:$0xff] %v11250_v54  ;;  %v11263_v35 = vrot.slane %v1242_v4, %v11005_v25  ;;  %v11266_v63 = vrot.slane %v1243_v58, %v11005_v25  ;;  %v810_v20 = vcombine.high %v11180_v29, %v11180_v29 }
 0x135   : > { %15963 = vst [vmem:[#allocation26_spill] sm:$0xff] %v11254_v37  ;;  %15964 = vst [vmem:[#allocation27_spill] sm:$0xff] %v11258_v26  ;;  %v811_v3 = vcombine.high %v11183_v33, %v11183_v33  ;;  %v4169_v49 = vrot.slane %v4162_v50, %v11048_v5  ;;  %v6684_v14 = vcombine.low %v11207_v53, %v11254_v37 }
 0x136   : > { %15965 = vst [vmem:[#allocation28_spill] sm:$0xff] %v11263_v35  ;;  %15966 = vst [vmem:[#allocation29_spill] sm:$0xff] %v11266_v63  ;;  %v15967_v11 = vcombine.low %v11080_v22, %v11117_v39  ;;  %v3555_v58 = vrot.slane %v3548_v23, %v11048_v5  ;;  %v11284_v63 = vcombine.high %v11250_v54, %v11250_v54 }
 0x137   : > { %v11288_v35 = vrot.slane %v11180_v29, %v11005_v25  ;;  %v11292_v50 = vrot.slane %v11183_v33, %v11005_v25  ;;  %v11296_v37 = vrot.slane %v11039_v62, %v11005_v25  ;;  %4576 = vrot.lane.b32.xlu0 %v4169_v49, %s10791_s18  ;;  %v6691_v23 = vrot.slane %v6684_v14, %v11048_v5  ;;  %v11305_v33 = vpop.f32.mrb[15].mxu0 }
 0x138   : > { %v11279_v4 = vrot.slane %v15967_v11, %v11048_v5  ;;  %15969 = vst [vmem:[#allocation31_spill] sm:$0xff] %v11284_v63  ;;  %v3556_v11 = vcombine.low %v11258_v26, %v3555_v58  ;;  %v3588_v63 = vcombine.low %v11197_v45, %v11073_v18  ;;  %15971 = vst [vmem:[#allocation33_spill] sm:$0xff] %v11305_v33 }
 0x139   : > { %15970 = vst [vmem:[#allocation32_spill] sm:$0xff] %v11292_v50  ;;  %v11309_v62 = vcombine.high %v11089_v28, %v11089_v28  ;;  %v11313_v54 = vcombine.high %v11106_v36, %v11106_v36  ;;  %v1755_v49 = vcombine.low %v11086_v27, %v11175_v16  ;;  %v10237_v14 = vcombine.high %v11167_v9, %v11067_v15 }
 0x13a   : > { %15968 = vst [vmem:[#allocation30_spill] sm:$0xff] %v11279_v4  ;;  %6821 = vrot.lane.b32.xlu1 %v6691_v23, %s10792_s19  ;;  %v11327_v29 = vrot.slane %v1435_v40, %v11048_v5  ;;  %v3595_v26 = vrot.slane %v3588_v63, %v11048_v5  ;;  %v11332_v4 = vcombine.high %v11153_v57, %v11153_v57 }
 0x13b   : > { %15972 = vst [vmem:[#allocation34_spill] sm:$0xff] %v11309_v62  ;;  %v11336_v33 = vcombine.high %v11157_v55, %v11157_v55  ;;  %v3563_v44 = vrot.slane %v3556_v11, %v11048_v5  ;;  %v3564_v59 = vcombine.low %v11106_v36, %v11313_v54  ;;  %v3565_v40 = vcombine.low %v11309_v62, %v11063_v13  ;;  %v11437_v62 = vpop.f32.mrb[12].mxu1 }
 0x13c   : > { %15975 = vst [vmem:[#allocation35_spill] sm:$0xff] %v11327_v29  ;;  %15976 = vst [vmem:[#allocation36_spill] sm:$0xff] %v11332_v4  ;;  %v11344_v23 = vrot.slane %v1755_v49, %v11048_v5  ;;  %5459 = vrot.lane.b32.xlu0 %v11327_v29, %s10793_s20  ;;  %v3596_v63 = vcombine.low %v11239_v52, %v3595_v26  ;;  %v6675_v42 = vrot.slane %v10237_v14, %v11048_v5 }
 0x13d   : > { %v3804_v11 = vcombine.low %v11332_v4, %v11057_v10  ;;  %v4362_v50 = vcombine.low %v11336_v33, %v11167_v9  ;;  %v11362_v57 = vrot.slane %v810_v20, %v11005_v25  ;;  %v11365_v26 = vrot.slane %v811_v3, %v11005_v25 }
 0x13e   : > { %v3572_v52 = vrot.slane %v3564_v59, %v11048_v5  ;;  %v3579_v14 = vrot.slane %v3565_v40, %v11048_v5  ;;  %v15980_v29 = vpack.c.bf16 %v11021_v51, %v11021_v51  ;;  %4003 = vrot.lane.b32.xlu1 %v3563_v44, %s10794_s11  ;;  %v3603_v56 = vrot.slane %v3596_v63, %v11048_v5 }
 0x13f   : > { %15979 = vst [vmem:[#allocation37_spill] sm:$0xff] %v11365_v26  ;;  %v6676_v20 = vcombine.low %v6675_v42, %v11344_v23  ;;  %v4369_v3 = vrot.slane %v4362_v50, %v11048_v5  ;;  %v11378_v59 = vrot.slane %v3804_v11, %v11048_v5  ;;  %v1731_v40 = vcombine.low %v11057_v10, %v11103_v34 }
 0x140   : > { %v1193_v58 = vrot.slane %v15980_v29, %v11005_v25  ;;  %v3580_v26 = vcombine.low %v3572_v52, %v3579_v14  ;;  %v1756_v51 = vcombine.low %v11110_v21, %v11113_v38  ;;  %v1194_v42 = vcombine.high %v11296_v37, %v11296_v37  ;;  %4007 = vrot.lane.b32.xlu0 %v3603_v56, %s10794_s11 }
 0x141   : > { %v10106_v50 = vpack.c.bf16 %v11211_v2, %v11211_v2  ;;  %v11398_v29 = vcombine.high %v11167_v9, %v11167_v9  ;;  %v615_v63 = vadd.f32 %v11060_v12, %v10985_v46  ;;  %v5730_v49 = vcombine.low %v11378_v59, %v4369_v3 }
 0x142   : > { %v3587_v11 = vrot.slane %v3580_v26, %v11048_v5  ;;  %v11405_v52 = vrot.slane %v1756_v51, %v11048_v5  ;;  %v607_v2 = vadd.f32 %v10985_v46, %v11070_v17  ;;  %v1195_v14 = vcombine.high %v1193_v58, %v1193_v58 }
 0x143   : > { %v10104_v56 = vpack.c.bf16 %v11098_v32, %v11098_v32  ;;  %v6683_v53 = vrot.slane %v6676_v20, %v11048_v5  ;;  %v4386_v12 = vcombine.low %v11145_v61, %v11344_v23  ;;  %v11423_v17 = vrot.slane %v1731_v40, %v11048_v5 }
 0x144   : > { %4005 = vrot.lane.b32.xlu1 %v3587_v11, %s10794_s11  ;;  %v1771_v32 = vcombine.low %v11344_v23, %v11405_v52  ;;  %v3852_v20 = vcombine.low %v11405_v52, %v11204_v47  ;;  %v3820_v61 = vcombine.low %v11167_v9, %v11398_v29  ;;  %v1049_v51 = vrot.slane %v10106_v50, %v11005_v25 }
 0x145   : > { %15985 = vst [vmem:[#allocation38_spill] sm:$0xff] %v11423_v17  ;;  %6819 = vrot.lane.b32.xlu0 %v6683_v53, %s10792_s19  ;;  %v663_v44 = vmax.f32 %v615_v63, 0.0  ;;  %v618_v11 = vadd.f32 %v11082_v24, %v10985_v46  ;;  %v610_v40 = vadd.f32 %v10985_v46, %v11093_v30  ;;  %v5737_v23 = vrot.slane %v5730_v49, %v11048_v5 }
 0x146   : > { %v4370_v47 = vcombine.low %v4369_v3, %v11423_v17  ;;  %v661_v52 = vmax.f32 %v607_v2, 0.0  ;;  %v1708_v36 = vcombine.low %v11157_v55, %v11336_v33  ;;  %v11452_v46 = vrot.slane %v11296_v37, %v11005_v25 }
 0x147   : > { %v4393_v24 = vrot.slane %v4386_v12, %v11048_v5  ;;  %v11455_v30 = vmax.f32 %v618_v11, 0.0  ;;  %v11457_v3 = vmax.f32 %v610_v40, 0.0  ;;  %v11460_v50 = vrot.slane %v1193_v58, %v11005_v25 }
 0x148   : > { %v11464_v63 = vrot.slane %v11122_v41, %v11005_v25  ;;  %v11467_v49 = vrot.slane %v10104_v56, %v11005_v25  ;;  %5934 = vrot.lane.b32.xlu1 %v5737_v23, %s10790_s16  ;;  %v3828_v37 = vrot.slane %v3820_v61, %v11048_v5  ;;  %v11472_v2 = vrot.slane %v1194_v42, %v11005_v25  ;;  %v11490_v42 = vpop.f32.mrb[13].mxu1 }
 0x149   : > { %v11475_v12 = vrot.slane %v1195_v14, %v11005_v25  ;;  %4604 = vrot.lane.b32.xlu0 %v4393_v24, %s10791_s18  ;;  %v11481_v41 = vpack.c.bf16 %v11455_v30, %v663_v44  ;;  %15990 = vst [vmem:[#allocation39_spill] sm:$0xff] %v11490_v42  ;;  %v1051_v26 = vcombine.high %v1049_v51, %v1049_v51  ;;  %v11499_v44 = vpop.f32.mrb[14].mxu1  ;;  %v2116_v53 = vshrl.u32 %v11063_v13, 16 }
 0x14a   : > { %v4377_v14 = vrot.slane %v4370_v47, %v11048_v5  ;;  %v11494_v61 = vrot.slane %v1708_v36, %v11048_v5  ;;  %v11497_v11 = vpack.c.bf16 %v11457_v3, %v661_v52  ;;  %15992 = vst [vmem:[#allocation41_spill] sm:$0xff] %v11499_v44  ;;  %v11502_v40 = vrot.slane %v1049_v51, %v11005_v25  ;;  %v11509_v58 = vpop.f32.mrb[15].mxu1 }
 0x14b   : > { %v11505_v23 = vrot.slane %v1771_v32, %v11048_v5  ;;  %v2121_v24 = vshll.u32 %v11077_v19, 16  ;;  %15995 = vst [vmem:[#allocation44_spill] sm:$0xff] %v11509_v58  ;;  %v5348_v51 = vcombine.low %v11423_v17, %v3828_v37  ;;  %v2113_v52 = vshll.u32 %v11063_v13, 16 }
 0x14c   : > { %15991 = vst [vmem:[#allocation40_spill] sm:$0xff] %v11494_v61  ;;  %15993 = vst [vmem:[#allocation42_spill] sm:$0xff] %v11502_v40  ;;  %6817 = vrot.lane.b32.xlu1 %v4377_v14, %s10792_s19  ;;  %v3836_v36 = vcombine.low %v3828_v37, %v11142_v60  ;;  %v2124_v47 = vshrl.u32 %v11077_v19, 16  ;;  %v2129_v58 = vshll.u32 %v11197_v45, 16  ;;  %v2132_v17 = vshrl.u32 %v11197_v45, 16 }
 0x14d   : > { %15994 = vst [vmem:[#allocation43_spill] sm:$0xff] %v11505_v23  ;;  %5487 = vrot.lane.b32.xlu0 %v11505_v23, %s10793_s20  ;;  %v11533_v56 = vrot.slane %v11467_v49, %v11005_v25  ;;  %v11536_v44 = vrot.slane %v1051_v26, %v11005_v25  ;;  %v2617_v13 = vshll.u32 %v11217_v7, 16  ;;  %v3812_v23 = vcombine.low %v11494_v61, %v11378_v59 }
 0x14e   : > { %v11543_v60 = vcombine.high %v11502_v40, %v11502_v40  ;;  %v3859_v19 = vrot.slane %v3852_v20, %v11048_v5  ;;  %v2123_v45 = vsel %vm11520_vm15, %v2116_v53, %v2121_v24  ;;  %v2137_v37 = vshll.u32 %v11051_v6, 16 }
 0x14f   : > { %15998 = vst [vmem:[#allocation45_spill] sm:$0xff] %v11533_v56  ;;  %15999 = vst [vmem:[#allocation46_spill] sm:$0xff] %v11536_v44  ;;  %v5355_v26 = vrot.slane %v5348_v51, %v11048_v5  ;;  %v16001_v59 = vshrl.u32 %v11042_v1, 16  ;;  %v3843_v20 = vrot.slane %v3836_v36, %v11048_v5  ;;  %v2131_v53 = vsel %vm11520_vm15, %v2124_v47, %v2129_v58 }
 0x150   : > { %16000 = vst [vmem:[#allocation47_spill] sm:$0xff] %v11543_v60  ;;  %4602 = vrot.lane.b32.xlu1 %v4377_v14, %s10791_s18  ;;  %v2139_v14 = vsel %vm11520_vm15, %v2132_v17, %v2137_v37  ;;  %v2588_v24 = vshrl.u32 %v11175_v16, 16  ;;  %v3819_v51 = vrot.slane %v3812_v23, %v11048_v5  ;;  %v2604_v36 = vshrl.u32 %v11148_v0, 16 }
 0x151   : > { %v11557_v40 = vsel %vm11520_vm15, %v16001_v59, %v2113_v52  ;;  %4035 = vrot.lane.b32.xlu0 %v3859_v19, %s10794_s11  ;;  %v2896_v42 = vcombine.low %v2123_v45, %v2139_v14  ;;  %v2593_v52 = vshll.u32 %v11113_v38, 16  ;;  %v2596_v59 = vshrl.u32 %v11113_v38, 16 }
 0x152   : > { %v4736_v7 = vcombine.low %v11557_v40, %v2131_v53  ;;  %v2601_v19 = vshll.u32 %v11148_v0, 16  ;;  %v2609_v58 = vshll.u32 %v11164_v8, 16  ;;  %v2612_v45 = vshrl.u32 %v11164_v8, 16 }
 0x153   : > { %v2904_v17 = vrot.slane %v2896_v42, %v11048_v5  ;;  %v11578_v23 = vsel %vm11520_vm15, %v2588_v24, %v2593_v52  ;;  %v2140_v42 = vshrl.u32 %v11051_v6, 16 }
 0x154   : > { %5485 = vrot.lane.b32.xlu1 %v5355_v26, %s10793_s20  ;;  %v4743_v47 = vrot.slane %v4736_v7, %v11048_v5  ;;  %v11584_v38 = vsel %vm11520_vm15, %v2596_v59, %v2601_v19  ;;  %v11588_v37 = vsel %vm11520_vm15, %v2604_v36, %v2609_v58  ;;  %v2145_v7 = vshll.u32 %v11073_v18, 16 }
 0x155   : > { %4031 = vrot.lane.b32.xlu0 %v3819_v51, %s10794_s11  ;;  %v11594_v14 = vsel %vm11520_vm15, %v2612_v45, %v2617_v13  ;;  %v6280_v24 = vcombine.low %v11578_v23, %v11588_v37  ;;  %v2523_v51 = vshrl.u32 %v11332_v4, 16  ;;  %v2528_v19 = vshll.u32 %v11336_v33, 16 }
 0x156   : > { %v4744_v26 = vcombine.low %v4743_v47, %v2904_v17  ;;  %v4976_v52 = vcombine.low %v11584_v38, %v11594_v14  ;;  %v11603_v59 = vsel %vm11520_vm15, %v2140_v42, %v2145_v7  ;;  %v2531_v36 = vshrl.u32 %v11336_v33, 16 }
 0x157   : > { %v6287_v58 = vrot.slane %v6280_v24, %v11048_v5  ;;  %v2897_v47 = vcombine.low %v2131_v53, %v11603_v59  ;;  %v2536_v45 = vshll.u32 %v11057_v10, 16  ;;  %v11617_v42 = vsel %vm11520_vm15, %v2523_v51, %v2528_v19 }
 0x158   : > { %4033 = vrot.lane.b32.xlu1 %v3843_v20, %s10794_s11  ;;  %v4751_v13 = vrot.slane %v4744_v26, %v11048_v5  ;;  %v11613_v61 = vrot.slane %v4976_v52, %v11048_v5  ;;  %v2539_v7 = vshrl.u32 %v11057_v10, 16  ;;  %v2544_v33 = vshll.u32 %v11167_v9, 16 }
 0x159   : > { %v2911_v20 = vrot.slane %v2897_v47, %v11048_v5  ;;  %v11625_v53 = vsel %vm11520_vm15, %v2531_v36, %v2536_v45  ;;  %v2547_v26 = vshrl.u32 %v11167_v9, 16  ;;  %v2552_v24 = vshll.u32 %v11103_v34, 16 }
 0x15a   : > { %5158 = vrot.lane.b32.xlu0 %v4751_v13, %s10795_s12  ;;  %v6288_v51 = vcombine.low %v6287_v58, %v11613_v61  ;;  %v2546_v10 = vsel %vm11520_vm15, %v2539_v7, %v2544_v33  ;;  %v2564_v52 = vshrl.u32 %v11067_v15, 16  ;;  %v2569_v19 = vshll.u32 %v11086_v27, 16 }
 0x15b   : > { %v2912_v13 = vcombine.low %v2904_v17, %v2911_v20  ;;  %v2554_v47 = vsel %vm11520_vm15, %v2547_v26, %v2552_v24  ;;  %v6248_v36 = vcombine.low %v11617_v42, %v2546_v10  ;;  %v2572_v45 = vshrl.u32 %v11086_v27, 16 }
 0x15c   : > { %v6295_v1 = vrot.slane %v6288_v51, %v11048_v5  ;;  %v4944_v9 = vcombine.low %v11625_v53, %v2554_v47  ;;  %v2571_v58 = vsel %vm11520_vm15, %v2564_v52, %v2569_v19  ;;  %v2577_v7 = vshll.u32 %v11110_v21, 16 }
 0x15d   : > { %v2919_v33 = vrot.slane %v2912_v13, %v11048_v5  ;;  %v6255_v17 = vrot.slane %v6248_v36, %v11048_v5  ;;  %v2580_v20 = vshrl.u32 %v11110_v21, 16  ;;  %v2585_v26 = vshll.u32 %v11175_v16, 16 }
 0x15e   : > { %6520 = vrot.lane.b32.xlu1 %v6295_v1, %s10796_s13  ;;  %v4951_v27 = vrot.slane %v4944_v9, %v11048_v5  ;;  %v11651_v24 = vsel %vm11520_vm15, %v2572_v45, %v2577_v7  ;;  %v2555_v51 = vshrl.u32 %v11103_v34, 16  ;;  %v3209_v52 = vcombine.low %v2554_v47, %v2571_v58 }
 0x15f   : > { %3450 = vrot.lane.b32.xlu0 %v2919_v33, %s10797_s14  ;;  %v2587_v21 = vsel %vm11520_vm15, %v2580_v20, %v2585_v26  ;;  %v3232_v16 = vcombine.low %v11651_v24, %v11578_v23  ;;  %v2056_v1 = vshll.u32 %v11096_v31, 16  ;;  %v2059_v9 = vshrl.u32 %v11096_v31, 16 }
 0x160   : > { %v6256_v19 = vcombine.low %v6255_v17, %v4951_v27  ;;  %v4960_v13 = vcombine.low %v2571_v58, %v2587_v21  ;;  %v16002_v36 = vshll.u32 %v11398_v29, 16  ;;  %v3233_v47 = vcombine.low %v2587_v21, %v11584_v38 }
 0x161   : > { %v3240_v45 = vrot.slane %v3232_v16, %v11048_v5  ;;  %v3223_v23 = vrot.slane %v3209_v52, %v11048_v5  ;;  %v16003_v33 = vshrl.u32 %v11080_v22, 16  ;;  %v2064_v38 = vshll.u32 %v11117_v39, 16 }
 0x162   : > { %v11665_v34 = vsel %vm11520_vm15, %v2555_v51, %v16002_v36  ;;  %v6263_v58 = vrot.slane %v6256_v19, %v11048_v5  ;;  %v11677_v29 = vrot.slane %v4960_v13, %v11048_v5  ;;  %v3247_v17 = vrot.slane %v3233_v47, %v11048_v5 }
 0x163   : > { %v3208_v7 = vcombine.low %v2546_v10, %v11665_v34  ;;  %v2058_v31 = vsel %vm11520_vm15, %v16003_v33, %v2056_v1  ;;  %v2067_v10 = vshrl.u32 %v11117_v39, 16  ;;  %v2072_v26 = vshll.u32 %v11225_v48, 16 }
 0x164   : > { %v2075_v22 = vshrl.u32 %v11225_v48, 16  ;;  %6516 = vrot.lane.b32.xlu1 %v6263_v58, %s10796_s13  ;;  %v4968_v51 = vcombine.low %v11677_v29, %v3240_v45  ;;  %v3248_v52 = vcombine.low %v3240_v45, %v3247_v17  ;;  %v2066_v21 = vsel %vm11520_vm15, %v2059_v9, %v2064_v38 }
 0x165   : > { %v3216_v20 = vrot.slane %v3208_v7, %v11048_v5  ;;  %v2080_v16 = vshll.u32 %v11089_v28, 16  ;;  %v2074_v13 = vsel %vm11520_vm15, %v2067_v10, %v2072_v26  ;;  %v11694_v39 = vcombine.high %v11051_v6, %v11051_v6  ;;  %v16005_v10 = vld [vmem:[#allocation13_spill] sm:$0xff] }
 0x166   : > { %v4975_v48 = vrot.slane %v4968_v51, %v11048_v5  ;;  %v3255_v36 = vrot.slane %v3248_v52, %v11048_v5  ;;  %v2848_v45 = vcombine.low %v2058_v31, %v2074_v13  ;;  %v2083_v31 = vshrl.u32 %v11089_v28, 16 }
 0x167   : > { %v4952_v1 = vcombine.low %v4951_v27, %v3216_v20  ;;  %v3224_v19 = vcombine.low %v3216_v20, %v3223_v23  ;;  %v2082_v47 = vsel %vm11520_vm15, %v2075_v22, %v2080_v16  ;;  %v1443_v23 = vcombine.low %v11073_v18, %v11288_v35 }
 0x168   : > { %v2849_v7 = vcombine.low %v2066_v21, %v2082_v47  ;;  %5186 = vrot.lane.b32.xlu0 %v4975_v48, %s10795_s12  ;;  %v2856_v33 = vrot.slane %v2848_v45, %v11048_v5  ;;  %v1444_v58 = vcombine.low %v11694_v39, %v11362_v57  ;;  %v4170_v17 = vcombine.low %v11051_v6, %v11694_v39  ;;  %v16007_v21 = vld [vmem:[#allocation34_spill] sm:$0xff] }
 0x169   : > { %v4959_v9 = vrot.slane %v4952_v1, %v11048_v5  ;;  %v3231_v27 = vrot.slane %v3224_v19, %v11048_v5  ;;  %v11714_v20 = vrot.slane %v1443_v23, %v11048_v5  ;;  %v2088_v26 = vshll.u32 %v16005_v10, 16 }
 0x16a   : > { %v2863_v38 = vrot.slane %v2849_v7, %v11048_v5  ;;  %v2091_v22 = vshrl.u32 %v16005_v10, 16  ;;  %v11719_v51 = vrot.slane %v1444_v58, %v11048_v5  ;;  %v4177_v52 = vrot.slane %v4170_v17, %v11048_v5 }
 0x16b   : > { %5184 = vrot.lane.b32.xlu1 %v4959_v9, %s10795_s12  ;;  %16004 = vst [vmem:[#allocation48_spill] sm:$0xff] %v11714_v20  ;;  %v2096_v6 = vshll.u32 %v16007_v21, 16  ;;  %v2099_v16 = vshrl.u32 %v16007_v21, 16  ;;  %v2090_v19 = vsel %vm11520_vm15, %v2083_v31, %v2088_v26  ;;  %v1779_v13 = vcombine.low %v11148_v0, %v11452_v46 }
 0x16c   : > { %16006 = vst [vmem:[#allocation49_spill] sm:$0xff] %v11719_v51  ;;  %v2864_v1 = vcombine.low %v2856_v33, %v2863_v38  ;;  %v1780_v48 = vcombine.low %v11164_v8, %v11472_v2  ;;  %3478 = vrot.lane.b32.xlu0 %v3255_v36, %s10797_s14  ;;  %v4178_v45 = vcombine.low %v4177_v52, %v11714_v20  ;;  %v16008_v7 = vshll.u32 %v11313_v54, 16 }
 0x16d   : > { %v2098_v9 = vsel %vm11520_vm15, %v2091_v22, %v2096_v6  ;;  %v11744_v58 = vrot.slane %v1779_v13, %v11048_v5  ;;  %v6264_v54 = vcombine.low %v11665_v34, %v11651_v24  ;;  %v11754_v38 = vcombine.high %v11073_v18, %v11073_v18  ;;  %v16013_v6 = vld [vmem:[#allocation14_spill] sm:$0xff] }
 0x16e   : > { %v2106_v23 = vsel %vm11520_vm15, %v2099_v16, %v16008_v7  ;;  %v2871_v33 = vrot.slane %v2864_v1, %v11048_v5  ;;  %v2873_v36 = vcombine.low %v2098_v9, %v11557_v40  ;;  %v4185_v17 = vrot.slane %v4178_v45, %v11048_v5  ;;  %v16011_v40 = vld [vmem:[#allocation20_spill] sm:$0xff] }
 0x16f   : > { %3476 = vrot.lane.b32.xlu1 %v3231_v27, %s10797_s14  ;;  %v2872_v8 = vcombine.low %v2090_v19, %v2106_v23  ;;  %16009 = vst [vmem:[#allocation50_spill] sm:$0xff] %v11744_v58  ;;  %v11748_v31 = vrot.slane %v1780_v48, %v11048_v5  ;;  %v4402_v22 = vcombine.low %v16011_v40, %v11744_v58  ;;  %v2490_v48 = vshrl.u32 %v11536_v44, 16 }
 0x170   : > { %v2887_v26 = vrot.slane %v2873_v36, %v11048_v5  ;;  %v11762_v52 = vcombine.high %v11536_v44, %v11536_v44  ;;  %v11766_v16 = vrot.slane %v16013_v6, %v11005_v25  ;;  %3446 = vrot.lane.b32.xlu0 %v2871_v33, %s10797_s14  ;;  %v6271_v34 = vrot.slane %v6264_v54, %v11048_v5 }
 0x171   : > { %16010 = vst [vmem:[#allocation51_spill] sm:$0xff] %v11748_v31  ;;  %v2880_v27 = vrot.slane %v2872_v8, %v11048_v5  ;;  %v5260_v1 = vcombine.low %v11073_v18, %v11754_v38  ;;  %v4409_v13 = vrot.slane %v4402_v22, %v11048_v5  ;;  %v2495_v45 = vshll.u32 %v11543_v60, 16 }
 0x172   : > { %16012 = vst [vmem:[#allocation20_spill] sm:$0xff] %v11762_v52  ;;  %v6272_v9 = vcombine.low %v6271_v34, %v11677_v29  ;;  %v2498_v23 = vshrl.u32 %v11543_v60, 16  ;;  %v2503_v33 = vshll.u32 %v11762_v52, 16  ;;  %v2515_v22 = vshrl.u32 %v11157_v55, 16 }
 0x173   : > { %4578 = vrot.lane.b32.xlu1 %v4185_v17, %s10791_s18  ;;  %v2888_v19 = vcombine.low %v2880_v27, %v2887_v26  ;;  %v5267_v7 = vrot.slane %v5260_v1, %v11048_v5  ;;  %v11785_v36 = vsel %vm11520_vm15, %v2490_v48, %v2495_v45  ;;  %v16015_v17 = vld [vmem:[#allocation15_spill] sm:$0xff]  ;;  %v2512_v27 = vshll.u32 %v11157_v55, 16  ;;  %v16018_v1 = vld [vmem:[#allocation32_spill] sm:$0xff]  ;;  %v16019_v48 = vld [vmem:[#allocation18_spill] sm:$0xff] }
 0x174   : > { %16014 = vst [vmem:[#allocation14_spill] sm:$0xff] %v11785_v36  ;;  %v2507_v54 = vshrl.u32 %v16015_v17, 16  ;;  %v6279_v26 = vrot.slane %v6272_v9, %v11048_v5  ;;  %v11793_v40 = vsel %vm11520_vm15, %v2498_v23, %v2503_v33  ;;  %v2520_v34 = vshll.u32 %v11332_v4, 16  ;;  %v16020_v45 = vld [vmem:[#allocation37_spill] sm:$0xff]  ;;  %v16026_v36 = vld [vmem:[#allocation24_spill] sm:$0xff] }
 0x175   : > { %v2895_v8 = vrot.slane %v2888_v19, %v11048_v5  ;;  %v5268_v29 = vcombine.low %v5267_v7, %v11719_v51  ;;  %16016 = vst [vmem:[#allocation52_spill] sm:$0xff] %v11793_v40  ;;  %v11805_v19 = vcombine.high %v16018_v1, %v16018_v1  ;;  %v4202_v9 = vcombine.low %v16020_v45, %v16019_v48  ;;  %v16038_v4 = vld [vmem:[#allocation21_spill] sm:$0xff] }
 0x176   : > { %v11800_v6 = vsel %vm11520_vm15, %v2507_v54, %v2512_v27  ;;  %v11816_v33 = vcombine.high %v16019_v48, %v16019_v48  ;;  %v10212_v52 = vcombine.high %v16020_v45, %v16019_v48  ;;  %v11924_v17 = vcombine.high %v11460_v50, %v11460_v50 }
 0x177   : > { %3448 = vrot.lane.b32.xlu0 %v2895_v8, %s10797_s14  ;;  %4606 = vrot.lane.b32.xlu1 %v4409_v13, %s10791_s18  ;;  %16017 = vst [vmem:[#allocation53_spill] sm:$0xff] %v11800_v6  ;;  %v5275_v7 = vrot.slane %v5268_v29, %v11048_v5  ;;  %v3184_v23 = vcombine.low %v11800_v6, %v11617_v42  ;;  %v16023_v29 = vld [vmem:[#allocation23_spill] sm:$0xff] }
 0x178   : > { %16021 = vst [vmem:[#allocation32_spill] sm:$0xff] %v11816_v33  ;;  %v11820_v8 = vsel %vm11520_vm15, %v2515_v22, %v2520_v34  ;;  %v3620_v54 = vcombine.low %v16018_v1, %v11805_v19  ;;  %v4209_v27 = vrot.slane %v4202_v9, %v11048_v5  ;;  %v11827_v24 = vcombine.high %v16023_v29, %v16023_v29  ;;  %v16025_v22 = vld [vmem:[#allocation19_spill] sm:$0xff] }
 0x179   : > { %16022 = vst [vmem:[#allocation37_spill] sm:$0xff] %v11820_v8  ;;  %v3185_v42 = vcombine.low %v11820_v8, %v11625_v53  ;;  %v11832_v13 = vrot.slane %v3184_v23, %v11048_v5  ;;  %v4218_v34 = vcombine.low %v11816_v33, %v16025_v22  ;;  %v10211_v53 = vcombine.high %v11073_v18, %v11288_v35 }
 0x17a   : > { %v11841_v9 = vrot.slane %v3620_v54, %v11048_v5  ;;  %v3637_v6 = vcombine.low %v16023_v29, %v11827_v24  ;;  %v1515_v8 = vcombine.low %v11827_v24, %v16026_v36  ;;  %v11869_v20 = vcombine.high %v16025_v22, %v16025_v22  ;;  %16036 = vst [vmem:[#allocation58_spill] sm:$0xff] %v11924_v17 }
 0x17b   : > { %16024 = vst [vmem:[#allocation23_spill] sm:$0xff] %v11832_v13  ;;  %6518 = vrot.lane.b32.xlu0 %v6279_v26, %s10796_s13  ;;  %5461 = vrot.lane.b32.xlu1 %v5275_v7, %s10793_s20  ;;  %v3199_v23 = vrot.slane %v3185_v42, %v11048_v5  ;;  %v4225_v47 = vrot.slane %v4218_v34, %v11048_v5 }
 0x17c   : > { %v1491_v26 = vcombine.low %v11805_v19, %v16023_v29  ;;  %v5626_v7 = vcombine.low %v11841_v9, %v4209_v27  ;;  %v11855_v54 = vrot.slane %v3637_v6, %v11048_v5  ;;  %v3611_v40 = vrot.slane %v10211_v53, %v11048_v5 }
 0x17d   : > { %v3200_v42 = vcombine.low %v11832_v13, %v3199_v23  ;;  %v11862_v34 = vrot.slane %v1515_v8, %v11048_v5  ;;  %v16028_v6 = vpack.c.bf16 %v11124_v43, %v11124_v43  ;;  %v11880_v8 = vrot.slane %v11464_v63, %v11005_v25 }
 0x17e   : > { %v11865_v58 = vrot.slane %v1491_v26, %v11048_v5  ;;  %v5633_v44 = vrot.slane %v5626_v7, %v11048_v5  ;;  %v5634_v60 = vcombine.low %v11855_v54, %v4225_v47  ;;  %v3612_v23 = vcombine.low %v11719_v51, %v3611_v40 }
 0x17f   : > { %v905_v53 = vrot.slane %v16028_v6, %v11005_v25  ;;  %16029 = vst [vmem:[#allocation24_spill] sm:$0xff] %v11880_v8  ;;  %v3207_v26 = vrot.slane %v3200_v42, %v11048_v5  ;;  %v4226_v13 = vcombine.low %v4225_v47, %v11862_v34  ;;  %v1516_v55 = vcombine.low %v16025_v22, %v11869_v20 }
 0x180   : > { %16027 = vst [vmem:[#allocation19_spill] sm:$0xff] %v11865_v58  ;;  %v16030_v43 = vcombine.high %v11464_v63, %v11464_v63  ;;  %v16032_v40 = vcombine.high %v11467_v49, %v11467_v49  ;;  %v11900_v42 = vcombine.high %v11533_v56, %v11533_v56  ;;  %5914 = vrot.lane.b32.xlu1 %v5633_v44, %s10790_s16 }
 0x181   : > { %v11904_v47 = vrot.slane %v10212_v52, %v11048_v5  ;;  %v906_v63 = vcombine.high %v11766_v16, %v11766_v16  ;;  %3474 = vrot.lane.b32.xlu0 %v3207_v26, %s10797_s14  ;;  %v11911_v49 = vrot.slane %v1516_v55, %v11048_v5  ;;  %v907_v51 = vcombine.high %v905_v53, %v905_v53 }
 0x182   : > { %v11890_v7 = vrot.slane %v16030_v43, %v11005_v25  ;;  %v11896_v6 = vrot.slane %v16032_v40, %v11005_v25  ;;  %16034 = vst [vmem:[#allocation56_spill] sm:$0xff] %v11900_v42  ;;  %v4210_v43 = vcombine.low %v4209_v27, %v11865_v58  ;;  %v11915_v40 = vcombine.high %v16026_v36, %v16026_v36 }
 0x183   : > { %v11919_v44 = vrot.slane %v11766_v16, %v11005_v25  ;;  %v3619_v52 = vrot.slane %v3612_v23, %v11048_v5  ;;  %v11927_v27 = vrot.slane %v905_v53, %v11005_v25  ;;  %v5641_v55 = vrot.slane %v5634_v60, %v11048_v5  ;;  %v11939_v16 = vld [vmem:[%s15735_s2] ss:$0 sm:$0xff]  ;;  %v16041_v53 = vld [vmem:[#allocation28_spill] sm:$0xff] }
 0x184   : > { %16031 = vst [vmem:[#allocation54_spill] sm:$0xff] %v11890_v7  ;;  %16033 = vst [vmem:[#allocation55_spill] sm:$0xff] %v11896_v6  ;;  %v1531_v26 = vcombine.low %v11862_v34, %v11911_v49  ;;  %v11934_v10 = vcombine.high %v16038_v4, %v16038_v4  ;;  %v16040_v23 = vld [vmem:[#allocation10_spill] sm:$0xff]  ;;  %v5276_v60 = vcombine.low %v11865_v58, %v11904_v47  ;;  %v16043_v6 = vld [vmem:[#allocation25_spill] sm:$0xff] }
 0x185   : > { %16035 = vst [vmem:[#allocation57_spill] sm:$0xff] %v11919_v44  ;;  %16037 = vst [vmem:[#allocation59_spill] sm:$0xff] %v11927_v27  ;;  %v11943_v28 = vadd.f32 %v11939_v16, %v16040_v23  ;;  %4009 = vrot.lane.b32.xlu1 %v3619_v52, %s10794_s11  ;;  %v11950_v34 = vcombine.high %v16041_v53, %v16041_v53  ;;  %v10215_v21 = vcombine.high %v11148_v0, %v11452_v46 }
 0x186   : > { %16039 = vst [vmem:[#allocation60_spill] sm:$0xff] %v11934_v10  ;;  %5916 = vrot.lane.b32.xlu0 %v5641_v55, %s10790_s16  ;;  %v4217_v15 = vrot.slane %v4210_v43, %v11048_v5  ;;  %v3660_v23 = vcombine.low %v16026_v36, %v11915_v40  ;;  %v3876_v52 = vcombine.low %v11460_v50, %v11924_v17 }
 0x187   : > { %16042 = vst [vmem:[#allocation10_spill] sm:$0xff] %v11950_v34  ;;  %v4426_v8 = vcombine.low %v11475_v12, %v16038_v4  ;;  %v3893_v27 = vcombine.low %v16041_v53, %v11950_v34  ;;  %v4442_v56 = vcombine.low %v11934_v10, %v16043_v6  ;;  %v3867_v0 = vrot.slane %v10215_v21, %v11048_v5  ;;  %v16046_v21 = vld [vmem:[#allocation26_spill] sm:$0xff] }
 0x188   : > { %v11969_v43 = vcombine.high %v11362_v57, %v11362_v57  ;;  %v11972_v55 = vrot.slane %v906_v63, %v11005_v25  ;;  %v11975_v42 = vrot.slane %v907_v51, %v11005_v25  ;;  %v4233_v7 = vrot.slane %v4226_v13, %v11048_v5 }
 0x189   : > { %v11980_v34 = vcombine.high %v11288_v35, %v11288_v35  ;;  %4582 = vrot.lane.b32.xlu1 %v4217_v15, %s10791_s18  ;;  %v5364_v6 = vcombine.low %v16046_v21, %v11748_v31  ;;  %v3868_v44 = vcombine.low %v11748_v31, %v3867_v0  ;;  %v1827_v51 = vcombine.low %v11924_v17, %v16041_v53 }
 0x18a   : > { %16044 = vst [vmem:[#allocation61_spill] sm:$0xff] %v11972_v55  ;;  %16045 = vst [vmem:[#allocation62_spill] sm:$0xff] %v11975_v42  ;;  %v4186_v63 = vcombine.low %v11362_v57, %v11969_v43  ;;  %6799 = vrot.lane.b32.xlu0 %v4233_v7, %s10792_s19  ;;  %v5283_v13 = vrot.slane %v5276_v60, %v11048_v5  ;;  %v3667_v42 = vrot.slane %v3660_v23, %v11048_v5 }
 0x18b   : > { %v4433_v10 = vrot.slane %v4426_v8, %v11048_v5  ;;  %v1467_v15 = vcombine.low %v11980_v34, %v16018_v1  ;;  %v11997_v21 = vrot.slane %v3876_v52, %v11048_v5  ;;  %v12000_v0 = vrot.slane %v3893_v27, %v11048_v5  ;;  %v16050_v27 = vld [vmem:[#allocation22_spill] sm:$0xff] }
 0x18c   : > { %v12003_v31 = vrot.slane %v4442_v56, %v11048_v5  ;;  %v12006_v53 = vrot.slane %v4186_v63, %v11048_v5  ;;  %v10112_v8 = vpack.c.bf16 %v11455_v30, %v11455_v30  ;;  %v12018_v17 = vrot.slane %v16050_v27, %v11005_v25 }
 0x18d   : > { %16047 = vst [vmem:[#allocation26_spill] sm:$0xff] %v11997_v21  ;;  %16048 = vst [vmem:[#allocation63_spill] sm:$0xff] %v12000_v0  ;;  %v12012_v23 = vrot.slane %v1467_v15, %v11048_v5  ;;  %5465 = vrot.lane.b32.xlu1 %v5283_v13, %s10793_s20  ;;  %v5610_v56 = vcombine.low %v11288_v35, %v11980_v34  ;;  %v12024_v63 = vrot.slane %v1827_v51, %v11048_v5 }
 0x18e   : > { %16049 = vst [vmem:[#allocation64_spill] sm:$0xff] %v12003_v31  ;;  %v1468_v30 = vcombine.low %v11969_v43, %v16020_v45  ;;  %v12030_v15 = vrot.slane %v11481_v41, %v11005_v25  ;;  %v10111_v52 = vpack.c.bf16 %v11457_v3, %v11457_v3  ;;  %4584 = vrot.lane.b32.xlu0 %v4233_v7, %s10791_s18 }
 0x18f   : > { %16051 = vst [vmem:[#allocation22_spill] sm:$0xff] %v12024_v63  ;;  %v5371_v13 = vrot.slane %v5364_v6, %v11048_v5  ;;  %v3668_v51 = vcombine.low %v11911_v49, %v3667_v42  ;;  %v5770_v60 = vcombine.low %v11997_v21, %v4433_v10  ;;  %v5778_v55 = vcombine.low %v12000_v0, %v12003_v31 }
 0x190   : > { %16052 = vst [vmem:[#allocation65_spill] sm:$0xff] %v12030_v15  ;;  %v12043_v41 = vrot.slane %v1468_v30, %v11048_v5  ;;  %v12046_v15 = vrot.slane %v10112_v8, %v11005_v25  ;;  %v12050_v3 = vrot.slane %v11497_v11, %v11005_v25  ;;  %v12053_v7 = vrot.slane %v1531_v26, %v11048_v5 }
 0x191   : > { %v10216_v6 = vcombine.high %v11475_v12, %v16038_v4  ;;  %5489 = vrot.lane.b32.xlu1 %v5371_v13, %s10793_s20  ;;  %v5617_v42 = vrot.slane %v5610_v56, %v11048_v5  ;;  %v4434_v49 = vcombine.low %v4433_v10, %v12024_v63  ;;  %v12065_v11 = vrot.slane %v10111_v52, %v11005_v25 }
 0x192   : > { %16053 = vst [vmem:[#allocation66_spill] sm:$0xff] %v12053_v7  ;;  %v2161_v26 = vshll.u32 %v11754_v38, 16  ;;  %5467 = vrot.lane.b32.xlu0 %v12053_v7, %s10793_s20  ;;  %v12072_v13 = vcombine.high %v16020_v45, %v16020_v45  ;;  %v2148_v10 = vshrl.u32 %v11073_v18, 16  ;;  %v3675_v56 = vrot.slane %v3668_v51, %v11048_v5 }
 0x193   : > { %v5777_v8 = vrot.slane %v5770_v60, %v11048_v5  ;;  %v5785_v30 = vrot.slane %v5778_v55, %v11048_v5  ;;  %v3875_v52 = vrot.slane %v3868_v44, %v11048_v5  ;;  %v12080_v27 = vrot.slane %v10216_v6, %v11048_v5 }
 0x194   : > { %v6596_v38 = vcombine.low %v16020_v45, %v12072_v13  ;;  %v2153_v0 = vshll.u32 %v11694_v39, 16  ;;  %v2156_v21 = vshrl.u32 %v11694_v39, 16  ;;  %v5618_v18 = vcombine.low %v5617_v42, %v12006_v53 }
 0x195   : > { %16054 = vst [vmem:[#allocation67_spill] sm:$0xff] %v12080_v27  ;;  %5942 = vrot.lane.b32.xlu1 %v5777_v8, %s10790_s16  ;;  %v4441_v60 = vrot.slane %v4434_v49, %v11048_v5  ;;  %v2165_v55 = vshrl.u32 %v11288_v35, 16  ;;  %v2170_v44 = vshll.u32 %v11362_v57, 16  ;;  %v12094_v51 = vcombine.high %v11475_v12, %v11475_v12 }
 0x196   : > { %4015 = vrot.lane.b32.xlu0 %v3675_v56, %s10794_s11  ;;  %v12098_v6 = vcombine.high %v11452_v46, %v11452_v46  ;;  %v12102_v39 = vcombine.high %v11472_v2, %v11472_v2  ;;  %v2163_v42 = vsel %vm11520_vm15, %v2156_v21, %v2161_v26  ;;  %v2155_v35 = vsel %vm11520_vm15, %v2148_v10, %v2153_v0 }
 0x197   : > { %v12110_v49 = vsel %vm11520_vm15, %v2165_v55, %v2170_v44  ;;  %v4752_v8 = vcombine.low %v11603_v59, %v2163_v42  ;;  %v2173_v56 = vshrl.u32 %v11362_v57, 16  ;;  %v5372_v31 = vcombine.low %v12024_v63, %v12080_v27  ;;  %v16055_v55 = vld [vmem:[#allocation33_spill] sm:$0xff] }
 0x198   : > { %v6603_v7 = vrot.slane %v6596_v38, %v11048_v5  ;;  %v2920_v4 = vcombine.low %v2155_v35, %v12110_v49  ;;  %v2178_v21 = vshll.u32 %v11980_v34, 16  ;;  %v6692_v0 = vcombine.low %v11475_v12, %v12094_v51 }
 0x199   : > { %4037 = vrot.lane.b32.xlu1 %v3875_v52, %s10794_s11  ;;  %v5754_v26 = vcombine.low %v11452_v46, %v12098_v6  ;;  %v2621_v59 = vshrl.u32 %v11452_v46, 16  ;;  %v2626_v57 = vshll.u32 %v11472_v2, 16  ;;  %v12131_v38 = vrot.slane %v4752_v8, %v11048_v5 }
 0x19a   : > { %5944 = vrot.lane.b32.xlu0 %v5785_v30, %s10790_s16  ;;  %v12128_v10 = vrot.slane %v2920_v4, %v11048_v5  ;;  %v12135_v52 = vsel %vm11520_vm15, %v2173_v56, %v2178_v21  ;;  %v562_v44 = vadd.f32 %v11939_v16, %v16055_v55  ;;  %v2629_v30 = vshrl.u32 %v11472_v2, 16 }
 0x19b   : > { %v2921_v35 = vcombine.low %v2163_v42, %v12135_v52  ;;  %v12142_v46 = vsel %vm11520_vm15, %v2621_v59, %v2626_v57  ;;  %v5625_v8 = vrot.slane %v5618_v18, %v11048_v5  ;;  %v4410_v56 = vcombine.low %v11472_v2, %v12102_v39 }
 0x19c   : > { %v12152_v55 = vmax.f32 %v562_v44, 0.0  ;;  %v6699_v42 = vrot.slane %v6692_v0, %v11048_v5  ;;  %v3256_v57 = vcombine.low %v11588_v37, %v12142_v46  ;;  %v2634_v18 = vshll.u32 %v12098_v6, 16 }
 0x19d   : > { %4610 = vrot.lane.b32.xlu1 %v4441_v60, %s10791_s18  ;;  %v12157_v59 = vrot.slane %v2921_v35, %v11048_v5  ;;  %v16056_v2 = vcombine.low %v12006_v53, %v12012_v23  ;;  %v5379_v4 = vrot.slane %v5372_v31, %v11048_v5  ;;  %v6604_v60 = vcombine.low %v6603_v7, %v11865_v58 }
 0x19e   : > { %5912 = vrot.lane.b32.xlu0 %v5625_v8, %s10790_s16  ;;  %v16057_v0 = vmax.f32 %v11943_v28, 0.0  ;;  %v12175_v37 = vrot.slane %v5754_v26, %v11048_v5  ;;  %v1803_v8 = vcombine.low %v12098_v6, %v11460_v50  ;;  %v12183_v53 = vsel %vm11520_vm15, %v2629_v30, %v2634_v18 }
 0x19f   : > { %v4201_v44 = vrot.slane %v16056_v2, %v11048_v5  ;;  %v12186_v31 = vrot.slane %v4410_v56, %v11048_v5  ;;  %v3257_v28 = vcombine.low %v11594_v14, %v12183_v53  ;;  %v2230_v7 = vshrl.u32 %v16023_v29, 16 }
 0x1a0   : > { %v12172_v35 = vpack.c.bf16 %v12152_v55, %v16057_v0  ;;  %v2235_v26 = vshll.u32 %v11816_v33, 16  ;;  %v6700_v0 = vcombine.low %v6699_v42, %v12024_v63  ;;  %v12196_v21 = vrot.slane %v3256_v57, %v11048_v5 }
 0x1a1   : > { %5493 = vrot.lane.b32.xlu1 %v5379_v4, %s10793_s20  ;;  %v2238_v30 = vshrl.u32 %v11816_v33, 16  ;;  %v16058_v14 = vcombine.low %v11904_v47, %v11855_v54  ;;  %v16059_v18 = vcombine.low %v12012_v23, %v12043_v41  ;;  %v2218_v4 = vshll.u32 %v12072_v13, 16 }
 0x1a2   : > { %6795 = vrot.lane.b32.xlu0 %v4201_v44, %s10792_s19  ;;  %v16060_v42 = vcombine.low %v12043_v41, %v11841_v9  ;;  %v12216_v63 = vrot.slane %v1803_v8, %v11048_v5  ;;  %v12219_v27 = vrot.slane %v3257_v28, %v11048_v5  ;;  %v2243_v54 = vshll.u32 %v11827_v24, 16 }
 0x1a3   : > { %v3659_v56 = vrot.slane %v16058_v14, %v11048_v5  ;;  %v12208_v2 = vrot.slane %v16059_v18, %v11048_v5  ;;  %v2246_v47 = vshrl.u32 %v11827_v24, 16  ;;  %v6611_v23 = vrot.slane %v6604_v60, %v11048_v5 }
 0x1a4   : > { %v3635_v57 = vrot.slane %v16060_v42, %v11048_v5  ;;  %v5762_v13 = vcombine.low %v12175_v37, %v12186_v31  ;;  %v2237_v14 = vsel %vm11520_vm15, %v2230_v7, %v2235_v26  ;;  %v2251_v9 = vshll.u32 %v16025_v22, 16  ;;  %v12237_v37 = vpop.permute.xlu0 %5936 }
 0x1a5   : > { %4013 = vrot.lane.b32.xlu1 %v3659_v56, %s10794_s11  ;;  %v6707_v41 = vrot.slane %v6700_v0, %v11048_v5  ;;  %v2245_v24 = vsel %vm11520_vm15, %v2238_v30, %v2243_v54  ;;  %v2254_v60 = vshrl.u32 %v16025_v22, 16  ;;  %16061 = vst [vmem:[#allocation33_spill] sm:$0xff] %v12237_v37  ;;  %v2259_v7 = vshll.u32 %v16026_v36, 16  ;;  %1999 = vst.msk [vmem:[#allocation2 + $0x10] sm:$0xf] %vm1994_vm0, %v12208_v2 }
 0x1a6   : > { %4580 = vrot.lane.b32.xlu0 %v4201_v44, %s10791_s18  ;;  %v2253_v28 = vsel %vm11520_vm15, %v2246_v47, %v2251_v9  ;;  %v2197_v26 = vshrl.u32 %v16018_v1, 16  ;;  %v2202_v0 = vshll.u32 %v16020_v45, 16  ;;  %v4418_v56 = vcombine.low %v12186_v31, %v12216_v63  ;;  %v12248_v44 = vpop.permute.xlu1 %5938 }
 0x1a7   : > { %v6104_v18 = vcombine.low %v2237_v14, %v2253_v28  ;;  %v2205_v30 = vshrl.u32 %v16020_v45, 16  ;;  %v2210_v22 = vshll.u32 %v11805_v19, 16  ;;  %16062 = vst [vmem:[#allocation68_spill] sm:$0xff] %v12248_v44  ;;  %v2261_v42 = vsel %vm11520_vm15, %v2254_v60, %v2259_v7 }
 0x1a8   : > { %v12254_v54 = vsel %vm11520_vm15, %v2197_v26, %v2202_v0  ;;  %v2213_v47 = vshrl.u32 %v11805_v19, 16  ;;  %v2222_v9 = vshrl.u32 %v16019_v48, 16  ;;  %v4800_v31 = vcombine.low %v2245_v24, %v2261_v42 }
 0x1a9   : > { %6797 = vrot.lane.b32.xlu1 %v6611_v23, %s10792_s19  ;;  %v12260_v45 = vrot.slane %v6104_v18, %v11048_v5  ;;  %v12264_v8 = vsel %vm11520_vm15, %v2205_v30, %v2210_v22  ;;  %v2227_v60 = vshll.u32 %v16023_v29, 16  ;;  %v2262_v7 = vshrl.u32 %v16026_v36, 16 }
 0x1aa   : > { %5463 = vrot.lane.b32.xlu0 %v12208_v2, %s10793_s20  ;;  %v2220_v19 = vsel %vm11520_vm15, %v2213_v47, %v2218_v4  ;;  %v2267_v23 = vshll.u32 %v11869_v20, 16  ;;  %v631_v26 = vadd.f32 %v11939_v16, %v11437_v62  ;;  %v12276_v0 = vrot.slane %v4800_v31, %v11048_v5  ;;  %v12285_v47 = vpop.permute.xlu0 %4576 }
 0x1ab   : > { %v2229_v18 = vsel %vm11520_vm15, %v2222_v9, %v2227_v60  ;;  %v6088_v29 = vcombine.low %v12254_v54, %v2220_v19  ;;  %v2968_v30 = vcombine.low %v2220_v19, %v2237_v14  ;;  %v16063_v4 = vcombine.low %v12131_v38, %v12128_v10 }
 0x1ac   : > { %v4784_v37 = vcombine.low %v12264_v8, %v2229_v18  ;;  %v12290_v62 = vsel %vm11520_vm15, %v2262_v7, %v2267_v23  ;;  %v2270_v31 = vshrl.u32 %v11869_v20, 16  ;;  %v12304_v19 = vpop.permute.xlu1 %6821  ;;  %v667_v14 = vmax.f32 %v631_v26, 0.0 }
 0x1ad   : > { %v4767_v22 = vrot.slane %v16063_v4, %v11048_v5  ;;  %6825 = vrot.lane.b32.xlu1 %v6707_v41, %s10792_s19  ;;  %v12297_v9 = vrot.slane %v6088_v29, %v11048_v5  ;;  %v2992_v38 = vcombine.low %v2253_v28, %v12290_v62  ;;  %v12301_v60 = vrot.slane %v2968_v30, %v11048_v5  ;;  %v16066_v29 = vld [vmem:[#allocation39_spill] sm:$0xff] }
 0x1ae   : > { %4011 = vrot.lane.b32.xlu0 %v3635_v57, %s10794_s11  ;;  %16064 = vst [vmem:[#allocation69_spill] sm:$0xff] %v12304_v19  ;;  %v12307_v7 = vrot.slane %v4784_v37, %v11048_v5  ;;  %v16065_v41 = vshll.u32 %v11915_v40, 16  ;;  %v623_v4 = vadd.f32 %v11939_v16, %v16066_v29  ;;  %v2969_v28 = vcombine.low %v2229_v18, %v2245_v24  ;;  %v16067_v19 = vld [vmem:[#allocation41_spill] sm:$0xff]  ;;  %v12324_v40 = vpop.permute.xlu0 %5459  ;;  %v16069_v18 = vld [vmem:[#allocation44_spill] sm:$0xff] }
 0x1af   : > { %v12318_v30 = vrot.slane %v2992_v38, %v11048_v5  ;;  %v634_v37 = vadd.f32 %v11939_v16, %v16067_v19  ;;  %v5769_v44 = vrot.slane %v5762_v13, %v11048_v5  ;;  %16068 = vst [vmem:[#allocation39_spill] sm:$0xff] %v12324_v40  ;;  %v626_v38 = vadd.f32 %v11939_v16, %v16069_v18 }
 0x1b0   : > { %v12313_v23 = vsel %vm11520_vm15, %v2270_v31, %v16065_v41  ;;  %v12331_v24 = vrot.slane %v2969_v28, %v11048_v5  ;;  %v4425_v19 = vrot.slane %v4418_v56, %v11048_v5  ;;  %v12345_v29 = vpop.permute.xlu1 %4003  ;;  %v665_v28 = vmax.f32 %v623_v4, 0.0  ;;  %v16079_v31 = vld [vmem:[#allocation61_spill] sm:$0xff] }
 0x1b1   : > { %v2993_v57 = vcombine.low %v2261_v42, %v12313_v23  ;;  %5160 = vrot.lane.b32.xlu1 %v4767_v22, %s10795_s12  ;;  %v12339_v13 = vmax.f32 %v634_v37, 0.0  ;;  %v2181_v42 = vshrl.u32 %v11980_v34, 16  ;;  %v4984_v16 = vcombine.low %v11613_v61, %v12196_v21 }
 0x1b2   : > { %5940 = vrot.lane.b32.xlu0 %v5769_v44, %s10790_s16  ;;  %v16072_v4 = vcombine.low %v12102_v39, %v11475_v12  ;;  %v12367_v34 = vpop.permute.xlu0 %4007  ;;  %v12369_v22 = vmax.f32 %v626_v38, 0.0  ;;  %v2189_v61 = vshrl.u32 %v11969_v43, 16  ;;  %v1339_v38 = vcombine.high %v12046_v15, %v12046_v15 }
 0x1b3   : > { %v12337_v26 = vrot.slane %v2993_v57, %v11048_v5  ;;  %v16070_v57 = vcombine.low %v12128_v10, %v12157_v59  ;;  %v12359_v56 = vpack.c.bf16 %v12339_v13, %v667_v14  ;;  %v2186_v10 = vshll.u32 %v11969_v43, 16 }
 0x1b4   : > { %v12365_v18 = vrot.slane %v16072_v4, %v11048_v5  ;;  %16074 = vst [vmem:[#allocation70_spill] sm:$0xff] %v12369_v22  ;;  %v1050_v59 = vcombine.high %v12018_v17, %v12018_v17  ;;  %v12377_v14 = vrot.slane %v12018_v17, %v11005_v25  ;;  %v2194_v4 = vshll.u32 %v16018_v1, 16 }
 0x1b5   : > { %v2943_v37 = vrot.slane %v16070_v57, %v11048_v5  ;;  %16071 = vst [vmem:[#allocation41_spill] sm:$0xff] %v12359_v56  ;;  %v16076_v57 = vld [vmem:[#allocation65_spill] sm:$0xff]  ;;  %v12391_v41 = vpack.c.bf16 %v12369_v22, %v665_v28  ;;  %v12395_v17 = vsel %vm11520_vm15, %v2181_v42, %v2186_v10  ;;  %v12403_v1 = vrot.slane %v12046_v15, %v11005_v25 }
 0x1b6   : > { %16073 = vst [vmem:[#allocation44_spill] sm:$0xff] %v12365_v18  ;;  %16075 = vst [vmem:[#allocation71_spill] sm:$0xff] %v12377_v14  ;;  %v1338_v44 = vcombine.high %v16076_v57, %v16076_v57  ;;  %v12387_v43 = vrot.slane %v16076_v57, %v11005_v25  ;;  %6823 = vrot.lane.b32.xlu0 %v4425_v19, %s10792_s19  ;;  %v1290_v57 = vcombine.high %v12050_v3, %v12050_v3  ;;  %v12408_v48 = vpop.permute.xlu1 %4005 }
 0x1b7   : > { %3452 = vrot.lane.b32.xlu1 %v2943_v37, %s10797_s14  ;;  %16078 = vst [vmem:[#allocation72_spill] sm:$0xff] %v12391_v41  ;;  %v12399_v37 = vcombine.high %v16079_v31, %v16079_v31  ;;  %16080 = vst [vmem:[#allocation61_spill] sm:$0xff] %v12403_v1  ;;  %v4991_v58 = vrot.slane %v4984_v16, %v11048_v5  ;;  %v1291_v28 = vcombine.high %v12065_v11, %v12065_v11  ;;  %v12414_v10 = vpop.permute.xlu0 %6819 }
 0x1b8   : > { %16077 = vst [vmem:[#allocation65_spill] sm:$0xff] %v12387_v43  ;;  %v1819_v42 = vcombine.low %v12216_v63, %v12365_v18  ;;  %16081 = vst [vmem:[#allocation73_spill] sm:$0xff] %v12414_v10  ;;  %v12418_v33 = vsel %vm11520_vm15, %v2189_v61, %v2194_v4  ;;  %v6072_v15 = vcombine.low %v12110_v49, %v12395_v17  ;;  %v2653_v10 = vshrl.u32 %v11460_v50, 16  ;;  %v16098_v18 = vld [vmem:[#allocation21_spill] sm:$0xff] }
 0x1b9   : > { %v12423_v41 = vrot.slane %v1050_v59, %v11005_v25  ;;  %v12427_v16 = vcombine.high %v12377_v14, %v12377_v14  ;;  %v12431_v22 = vrot.slane %v12050_v3, %v11005_v25  ;;  %v10105_v63 = vpack.c.bf16 %v12152_v55, %v12152_v55 }
 0x1ba   : > { %v12437_v61 = vrot.slane %v1338_v44, %v11005_v25  ;;  %v12440_v49 = vrot.slane %v1339_v38, %v11005_v25  ;;  %v12444_v59 = vcombine.high %v12387_v43, %v12387_v43  ;;  %v12448_v4 = vrot.slane %v12065_v11, %v11005_v25  ;;  %4608 = vrot.lane.b32.xlu0 %v4425_v19, %s10791_s18  ;;  %v12462_v38 = vpop.permute.xlu1 %5934  ;;  %v16099_v43 = vld [vmem:[#allocation28_spill] sm:$0xff] }
 0x1bb   : > { %16082 = vst [vmem:[#allocation74_spill] sm:$0xff] %v12423_v41  ;;  %16083 = vst [vmem:[#allocation75_spill] sm:$0xff] %v12427_v16  ;;  %5188 = vrot.lane.b32.xlu1 %v4991_v58, %s10795_s12  ;;  %v12453_v58 = vcombine.high %v12403_v1, %v12403_v1  ;;  %v12456_v3 = vrot.slane %v1290_v57, %v11005_v25  ;;  %v16091_v55 = vcombine.low %v12196_v21, %v12219_v27  ;;  %v16135_v41 = vld [vmem:[#allocation38_spill] sm:$0xff] }
 0x1bc   : > { %16084 = vst [vmem:[#allocation76_spill] sm:$0xff] %v12431_v22  ;;  %16085 = vst [vmem:[#allocation77_spill] sm:$0xff] %v12437_v61  ;;  %v12466_v11 = vrot.slane %v1291_v28, %v11005_v25  ;;  %v12469_v19 = vrot.slane %v1819_v42, %v11048_v5  ;;  %v4768_v57 = vcombine.low %v12135_v52, %v12418_v33  ;;  %v2674_v27 = vshll.u32 %v12094_v51, 16 }
 0x1bd   : > { %16086 = vst [vmem:[#allocation78_spill] sm:$0xff] %v12440_v49  ;;  %16087 = vst [vmem:[#allocation79_spill] sm:$0xff] %v12444_v59  ;;  %v3279_v44 = vrot.slane %v16091_v55, %v11048_v5  ;;  %v12471_v49 = vpop.permute.xlu0 %4604  ;;  %v994_v21 = vrot.slane %v12172_v35, %v11005_v25  ;;  %v12482_v55 = vrot.slane %v10105_v63, %v11005_v25  ;;  %v2658_v28 = vshll.u32 %v11475_v12, 16  ;;  %v16096_v35 = vld [vmem:[#allocation58_spill] sm:$0xff] }
 0x1be   : > { %16088 = vst [vmem:[#allocation80_spill] sm:$0xff] %v12448_v4  ;;  %16089 = vst [vmem:[#allocation81_spill] sm:$0xff] %v12453_v58  ;;  %v12476_v58 = vrot.slane %v6072_v15, %v11048_v5  ;;  %5491 = vrot.lane.b32.xlu0 %v12469_v19, %s10793_s20  ;;  %v16095_v52 = vcombine.low %v12297_v9, %v12307_v7  ;;  %v4775_v51 = vrot.slane %v4768_v57, %v11048_v5  ;;  %v12495_v63 = vpop.permute.xlu1 %6817 }
 0x1bf   : > { %16090 = vst [vmem:[#allocation82_spill] sm:$0xff] %v12456_v3  ;;  %16092 = vst [vmem:[#allocation83_spill] sm:$0xff] %v12462_v38  ;;  %3480 = vrot.lane.b32.xlu1 %v3279_v44, %s10797_s14  ;;  %v2661_v15 = vshrl.u32 %v11475_v12, 16  ;;  %v2666_v38 = vshll.u32 %v16096_v35, 16  ;;  %v12499_v44 = vsel %vm11520_vm15, %v2653_v10, %v2658_v28  ;;  %v2669_v1 = vshrl.u32 %v16096_v35, 16 }
 0x1c0   : > { %16093 = vst [vmem:[#allocation84_spill] sm:$0xff] %v12466_v11  ;;  %16094 = vst [vmem:[#allocation85_spill] sm:$0xff] %v12482_v55  ;;  %v6103_v42 = vrot.slane %v16095_v52, %v11048_v5  ;;  %v2678_v11 = vshrl.u32 %v16098_v18, 16  ;;  %v2683_v59 = vshll.u32 %v16099_v43, 16  ;;  %v12506_v9 = vcombine.high %v12431_v22, %v12431_v22 }
 0x1c1   : > { %16097 = vst [vmem:[#allocation58_spill] sm:$0xff] %v12495_v63  ;;  %v16101_v12 = vcombine.low %v12260_v45, %v12276_v0  ;;  %v12512_v52 = vpop.permute.xlu0 %5487  ;;  %v6080_v10 = vcombine.low %v12476_v58, %v4775_v51  ;;  %v12517_v28 = vsel %vm11520_vm15, %v2661_v15, %v2666_v38  ;;  %v2676_v35 = vsel %vm11520_vm15, %v2669_v1, %v2674_v27 }
 0x1c2   : > { %16100 = vst [vmem:[#allocation28_spill] sm:$0xff] %v12506_v9  ;;  %16102 = vst [vmem:[#allocation86_spill] sm:$0xff] %v12512_v52  ;;  %v12524_v63 = vsel %vm11520_vm15, %v2678_v11, %v2683_v59  ;;  %v2944_v45 = vcombine.low %v12395_v17, %v12254_v54  ;;  %v1002_v18 = vcombine.high %v994_v21, %v994_v21  ;;  %v16107_v11 = vld [vmem:[#allocation60_spill] sm:$0xff] }
 0x1c3   : > { %v6119_v57 = vrot.slane %v16101_v12, %v11048_v5  ;;  %16103 = vst [vmem:[#allocation87_spill] sm:$0xff] %v12517_v28  ;;  %6496 = vrot.lane.b32.xlu1 %v6103_v42, %s10796_s13  ;;  %16104 = vst [vmem:[#allocation88_spill] sm:$0xff] %v12524_v63  ;;  %v2686_v12 = vshrl.u32 %v16099_v43, 16  ;;  %v5008_v38 = vcombine.low %v12517_v28, %v12524_v63  ;;  %v12542_v43 = vpop.permute.xlu1 %4602  ;;  %v2691_v42 = vshll.u32 %v16107_v11, 16 }
 0x1c4   : > { %v6312_v1 = vcombine.low %v12499_v44, %v2676_v35  ;;  %v12536_v27 = vrot.slane %v994_v21, %v11005_v25  ;;  %v16105_v54 = vcombine.low %v12307_v7, %v12301_v60  ;;  %16106 = vst [vmem:[#allocation89_spill] sm:$0xff] %v12542_v43  ;;  %v12545_v59 = vrot.slane %v2944_v45, %v11048_v5 }
 0x1c5   : > { %6498 = vrot.lane.b32.xlu0 %v6119_v57, %s10796_s13  ;;  %v16108_v15 = vcombine.low %v12276_v0, %v12318_v30  ;;  %v5015_v21 = vrot.slane %v5008_v38, %v11048_v5  ;;  %v12554_v9 = vpop.permute.xlu0 %4035  ;;  %v2945_v7 = vcombine.low %v12418_v33, %v12264_v8  ;;  %v4234_v0 = vcombine.low %v11869_v20, %v16079_v31 }
 0x1c6   : > { %v4799_v17 = vrot.slane %v16105_v54, %v11048_v5  ;;  %v6319_v58 = vrot.slane %v6312_v1, %v11048_v5  ;;  %v4776_v45 = vcombine.low %v4775_v51, %v12545_v59  ;;  %v12562_v54 = vsel %vm11520_vm15, %v2686_v12, %v2691_v42  ;;  %2013 = vst.msk [vmem:[#allocation2 + $0x48] sm:$0xf] %vm1994_vm0, %v12469_v19 }
 0x1c7   : > { %v4815_v57 = vrot.slane %v16108_v15, %v11048_v5  ;;  %16109 = vst [vmem:[#allocation90_spill] sm:$0xff] %v12562_v54  ;;  %v16110_v15 = vld [vmem:[#allocation57_spill] sm:$0xff]  ;;  %v12570_v1 = vrot.slane %v12482_v55, %v11005_v25  ;;  %v3304_v8 = vcombine.low %v2676_v35, %v12562_v54  ;;  %v2959_v51 = vrot.slane %v2945_v7, %v11048_v5  ;;  %v12586_v63 = vpop.permute.xlu1 %5485 }
 0x1c8   : > { %5164 = vrot.lane.b32.xlu1 %v4799_v17, %s10795_s12  ;;  %v5642_v38 = vcombine.low %v16026_v36, %v16110_v15  ;;  %v6320_v33 = vcombine.low %v6319_v58, %v5015_v21  ;;  %v12576_v12 = vrot.slane %v1002_v18, %v11005_v25  ;;  %v16112_v20 = vcombine.low %v12318_v30, %v12337_v26  ;;  %v16132_v54 = vld [vmem:[#allocation17_spill] sm:$0xff] }
 0x1c9   : > { %16111 = vst [vmem:[#allocation57_spill] sm:$0xff] %v12570_v1  ;;  %5166 = vrot.lane.b32.xlu0 %v4815_v57, %s10795_s12  ;;  %v16113_v42 = vcombine.low %v12301_v60, %v12331_v24  ;;  %16114 = vst [vmem:[#allocation91_spill] sm:$0xff] %v12586_v63  ;;  %v12589_v58 = vrot.slane %v4234_v0, %v11048_v5  ;;  %v12592_v35 = vrot.slane %v3304_v8, %v11048_v5  ;;  %v12594_v18 = vpop.permute.xlu0 %4031  ;;  %v16129_v63 = vld [vmem:[#allocation24_spill] sm:$0xff]  ;;  %v16145_v1 = vld [vmem:[#allocation9_spill] sm:$0xff] }
 0x1ca   : > { %v3015_v17 = vrot.slane %v16112_v20, %v11048_v5  ;;  %v2960_v57 = vcombine.low %v12545_v59, %v2959_v51  ;;  %v5649_v30 = vrot.slane %v5642_v38, %v11048_v5  ;;  %v2637_v26 = vshrl.u32 %v12098_v6, 16 }
 0x1cb   : > { %v2991_v43 = vrot.slane %v16113_v42, %v11048_v5  ;;  %16115 = vst [vmem:[#allocation92_spill] sm:$0xff] %v12592_v35  ;;  %v12601_v60 = vcombine.high %v12536_v27, %v12536_v27  ;;  %v2642_v24 = vshll.u32 %v12102_v39, 16  ;;  %v2645_v7 = vshrl.u32 %v12102_v39, 16  ;;  %v16117_v39 = vld [vmem:[#allocation35_spill] sm:$0xff] }
 0x1cc   : > { %v2650_v0 = vshll.u32 %v11460_v50, 16  ;;  %v6087_v59 = vrot.slane %v6080_v10, %v11048_v5  ;;  %v4783_v38 = vrot.slane %v4776_v45, %v11048_v5  ;;  %v10225_v6 = vcombine.high %v16026_v36, %v16110_v15  ;;  %1997 = vst.msk [vmem:[#allocation2 + $0x8] sm:$0xf] %vm1994_vm0, %v16117_v39  ;;  %v16118_v10 = vld [vmem:[#allocation66_spill] sm:$0xff]  ;;  %v16119_v36 = vld [vmem:[#allocation43_spill] sm:$0xff] }
 0x1cd   : > { %3456 = vrot.lane.b32.xlu1 %v2991_v43, %s10797_s14  ;;  %3458 = vrot.lane.b32.xlu0 %v3015_v17, %s10797_s14  ;;  %v6327_v8 = vrot.slane %v6320_v33, %v11048_v5  ;;  %v5016_v43 = vcombine.low %v5015_v21, %v12592_v35  ;;  %v2644_v51 = vsel %vm11520_vm15, %v2637_v26, %v2642_v24  ;;  %v12630_v21 = vpop.permute.xlu1 %4033  ;;  %v12639_v17 = vpop.permute.xlu0 %5158  ;;  %v16120_v24 = vld [vmem:[#allocation54_spill] sm:$0xff] }
 0x1ce   : > { %v12618_v50 = vsel %vm11520_vm15, %v2645_v7, %v2650_v0  ;;  %2001 = vst.msk [vmem:[#allocation2 + $0x18] sm:$0xf] %vm1994_vm0, %v16118_v10  ;;  %2011 = vst.msk [vmem:[#allocation2 + $0x40] sm:$0xf] %vm1994_vm0, %v16119_v36  ;;  %v5650_v45 = vcombine.low %v5649_v30, %v12589_v58  ;;  %v6296_v2 = vcombine.low %v12142_v46, %v2644_v51  ;;  %v16121_v0 = vld [vmem:[#allocation56_spill] sm:$0xff]  ;;  %v16124_v10 = vld [vmem:[#allocation55_spill] sm:$0xff] }
 0x1cf   : > { %16116 = vst [vmem:[#allocation93_spill] sm:$0xff] %v12618_v50  ;;  %v4992_v20 = vcombine.low %v12183_v53, %v12618_v50  ;;  %v12642_v42 = vrot.slane %v10225_v6, %v11048_v5  ;;  %v3280_v19 = vcombine.low %v2644_v51, %v12499_v44  ;;  %v12647_v30 = vcombine.high %v16110_v15, %v16110_v15  ;;  %v16122_v6 = vld [vmem:[#allocation45_spill] sm:$0xff]  ;;  %v16131_v50 = vld [vmem:[#allocation11_spill] sm:$0xff] }
 0x1d0   : > { %v1540_v26 = vcombine.low %v16079_v31, %v12399_v37  ;;  %v6303_v53 = vrot.slane %v6296_v2, %v11048_v5  ;;  %v12656_v7 = vcombine.high %v16120_v24, %v16120_v24  ;;  %v4282_v44 = vcombine.low %v16122_v6, %v16121_v0  ;;  %v16126_v2 = vld [vmem:[#allocation59_spill] sm:$0xff] }
 0x1d1   : > { %6524 = vrot.lane.b32.xlu1 %v6327_v8, %s10796_s13  ;;  %6494 = vrot.lane.b32.xlu0 %v6087_v59, %s10796_s13  ;;  %v4999_v46 = vrot.slane %v4992_v20, %v11048_v5  ;;  %v5023_v8 = vrot.slane %v5016_v43, %v11048_v5  ;;  %v12662_v51 = vrot.slane %v3280_v19, %v11048_v5  ;;  %v12690_v28 = vpop.permute.xlu1 %6520  ;;  %v3451_v14 = vpop.permute.xlu0 %3450 }
 0x1d2   : > { %v1539_v59 = vcombine.low %v16110_v15, %v12647_v30  ;;  %v3716_v36 = vcombine.low %v12656_v7, %v16124_v10  ;;  %v12669_v20 = vrot.slane %v4282_v44, %v11048_v5  ;;  %v12673_v33 = vcombine.high %v16126_v2, %v16126_v2  ;;  %16130 = vst [vmem:[#allocation56_spill] sm:$0xff] %v12690_v28 }
 0x1d3   : > { %16123 = vst [vmem:[#allocation35_spill] sm:$0xff] %v12662_v51  ;;  %v6304_v39 = vcombine.low %v6303_v53, %v4999_v46  ;;  %v6612_v43 = vcombine.low %v12589_v58, %v12642_v42  ;;  %v12682_v53 = vrot.slane %v1540_v26, %v11048_v5  ;;  %v12686_v35 = vcombine.high %v16129_v63, %v16129_v63 }
 0x1d4   : > { %16125 = vst [vmem:[#allocation66_spill] sm:$0xff] %v12669_v20  ;;  %v12679_v19 = vrot.slane %v1539_v59, %v11048_v5  ;;  %v2967_v44 = vrot.slane %v2960_v57, %v11048_v5  ;;  %v3693_v59 = vcombine.low %v12673_v33, %v16120_v24  ;;  %v1732_v26 = vcombine.low %v16132_v54, %v16131_v50 }
 0x1d5   : > { %5192 = vrot.lane.b32.xlu1 %v5023_v8, %s10795_s12  ;;  %16128 = vst [vmem:[#allocation54_spill] sm:$0xff] %v12682_v53  ;;  %5162 = vrot.lane.b32.xlu0 %v4783_v38, %s10795_s12  ;;  %v12693_v8 = vrot.slane %v3716_v36, %v11048_v5  ;;  %v5657_v11 = vrot.slane %v5650_v45, %v11048_v5  ;;  %3524 = vst.msk [vmem:[#allocation2 + $0x8] sm:$0xf] %vm3521_vm1, %v3451_v14  ;;  %v16133_v14 = vld [vmem:[#allocation31_spill] sm:$0xff] }
 0x1d6   : > { %16127 = vst [vmem:[#allocation43_spill] sm:$0xff] %v12679_v19  ;;  %v5000_v16 = vcombine.low %v4999_v46, %v12662_v51  ;;  %v4266_v57 = vcombine.low %v16129_v63, %v12686_v35  ;;  %v4242_v36 = vcombine.low %v12589_v58, %v12679_v19  ;;  %v1746_v54 = vrot.slane %v1732_v26, %v11048_v5  ;;  %v16134_v58 = vld [vmem:[#allocation29_spill] sm:$0xff] }
 0x1d7   : > { %v5674_v28 = vcombine.low %v12693_v8, %v12669_v20  ;;  %v12713_v50 = vcombine.high %v16124_v10, %v16124_v10  ;;  %v6311_v45 = vrot.slane %v6304_v39, %v11048_v5  ;;  %v6619_v46 = vrot.slane %v6612_v43, %v11048_v5  ;;  %4081 = vst.msk [vmem:[#allocation2 + $0x8] sm:$0xf] %vm4078_vm2, %v12367_v34 }
 0x1d8   : > { %v4458_v38 = vcombine.low %v16133_v14, %v12456_v3  ;;  %v5786_v19 = vcombine.low %v16134_v58, %v12431_v22  ;;  %v12724_v26 = vrot.slane %v3693_v59, %v11048_v5  ;;  %v12727_v51 = vrot.slane %v4266_v57, %v11048_v5 }
 0x1d9   : > { %5918 = vrot.lane.b32.xlu1 %v5657_v11, %s10790_s16  ;;  %3454 = vrot.lane.b32.xlu0 %v2967_v44, %s10797_s14  ;;  %v1747_v11 = vcombine.low %v16135_v41, %v1746_v54  ;;  %v5308_v39 = vcombine.low %v16124_v10, %v12713_v50  ;;  %v5007_v43 = vrot.slane %v5000_v16, %v11048_v5  ;;  %v12737_v44 = vpop.permute.xlu1 %6516  ;;  %v16139_v41 = vld [vmem:[#allocation30_spill] sm:$0xff]  ;;  %v16140_v54 = vld [vmem:[#allocation27_spill] sm:$0xff] }
 0x1da   : > { %v12734_v14 = vrot.slane %v4458_v38, %v11048_v5  ;;  %v5793_v22 = vrot.slane %v5786_v19, %v11048_v5  ;;  %16137 = vst [vmem:[#allocation55_spill] sm:$0xff] %v12737_v44  ;;  %v4249_v59 = vrot.slane %v4242_v36, %v11048_v5  ;;  %v16141_v56 = vcombine.low %v16139_v41, %v16140_v54  ;;  %v16144_v41 = vld [vmem:[#allocation12_spill] sm:$0xff] }
 0x1db   : > { %v1754_v57 = vrot.slane %v1747_v11, %v11048_v5  ;;  %v12742_v58 = vrot.slane %v5308_v39, %v11048_v5  ;;  %v5681_v19 = vrot.slane %v5674_v28, %v11048_v5  ;;  %v3676_v36 = vcombine.low %v12647_v30, %v16126_v2  ;;  %v16142_v11 = vld [vmem:[#allocation62_spill] sm:$0xff] }
 0x1dc   : > { %16136 = vst [vmem:[#allocation45_spill] sm:$0xff] %v12734_v14  ;;  %v1394_v16 = vrot.slane %v16141_v56, %v11048_v5  ;;  %v4250_v39 = vcombine.low %v12399_v37, %v16142_v11  ;;  %v5666_v56 = vcombine.low %v12724_v26, %v12727_v51  ;;  %v1587_v34 = vcombine.low %v16120_v24, %v12656_v7 }
 0x1dd   : > { %16138 = vst [vmem:[#allocation59_spill] sm:$0xff] %v12742_v58  ;;  %6801 = vrot.lane.b32.xlu1 %v6619_v46, %s10792_s19  ;;  %6522 = vrot.lane.b32.xlu0 %v6311_v45, %s10796_s13  ;;  %2010 = vst.msk [vmem:[#allocation2 + $0x3c] sm:$0xf] %vm1994_vm0, %v1754_v57  ;;  %v10236_v28 = vcombine.high %v16142_v11, %v16129_v63  ;;  %v16143_v46 = vld [vmem:[#allocation34_spill] sm:$0xff]  ;;  %v5794_v38 = vcombine.low %v5793_v22, %v12734_v14  ;;  %v16146_v57 = vld [vmem:[#allocation13_spill] sm:$0xff]  ;;  %v12783_v22 = vpop.permute.xlu1 %5184 }
 0x1de   : > { %1995 = vst.msk [vmem:[#allocation2] sm:$0xf] %vm1994_vm0, %v1394_v16  ;;  %v1395_v54 = vcombine.low %v16144_v41, %v16143_v46  ;;  %v12770_v45 = vrot.slane %v3676_v36, %v11048_v5  ;;  %v4257_v44 = vrot.slane %v4250_v39, %v11048_v5  ;;  %v1396_v52 = vcombine.low %v16146_v57, %v16145_v1  ;;  %v12775_v16 = vpop.permute.xlu0 %5186 }
 0x1df   : > { %v6636_v40 = vcombine.low %v12669_v20, %v12742_v58  ;;  %v1595_v55 = vrot.slane %v1587_v34, %v11048_v5  ;;  %v6627_v25 = vrot.slane %v10236_v28, %v11048_v5  ;;  %16147 = vst [vmem:[#allocation11_spill] sm:$0xff] %v12783_v22  ;;  %v1563_v1 = vcombine.low %v16126_v2, %v12673_v33  ;;  %v16148_v28 = vld [vmem:[#allocation36_spill] sm:$0xff] }
 0x1e0   : > { %v1403_v46 = vrot.slane %v1395_v54, %v11048_v5  ;;  %v5658_v36 = vcombine.low %v12770_v45, %v4257_v44  ;;  %v1410_v39 = vrot.slane %v1396_v52, %v11048_v5  ;;  %v1588_v41 = vcombine.low %v12686_v35, %v16122_v6  ;;  %v16149_v54 = vld [vmem:[#allocation15_spill] sm:$0xff] }
 0x1e1   : > { %4586 = vrot.lane.b32.xlu1 %v4249_v59, %s10791_s18  ;;  %5190 = vrot.lane.b32.xlu0 %v5007_v43, %s10795_s12  ;;  %v6628_v34 = vcombine.low %v6627_v25, %v1595_v55  ;;  %v1707_v57 = vcombine.low %v16149_v54, %v16148_v28  ;;  %v12796_v59 = vcombine.high %v16142_v11, %v16142_v11 }
 0x1e2   : > { %v5673_v22 = vrot.slane %v5666_v56, %v11048_v5  ;;  %v1411_v52 = vcombine.low %v1403_v46, %v1410_v39  ;;  %v12800_v14 = vrot.slane %v1563_v1, %v11048_v5  ;;  %v1602_v58 = vrot.slane %v1588_v41, %v11048_v5  ;;  %v3479_v20 = vpop.permute.xlu0 %3478  ;;  %v3477_v56 = vpop.permute.xlu1 %3476 }
 0x1e3   : > { %v6643_v43 = vrot.slane %v6636_v40, %v11048_v5  ;;  %v5801_v25 = vrot.slane %v5794_v38, %v11048_v5  ;;  %v4274_v3 = vcombine.low %v12727_v51, %v1595_v55  ;;  %v12807_v28 = vrot.slane %v1707_v57, %v11048_v5  ;;  %3538 = vst.msk [vmem:[#allocation2 + $0x40] sm:$0xf] %vm3521_vm1, %v3479_v20  ;;  %v16151_v38 = vld [vmem:[#allocation40_spill] sm:$0xff] }
 0x1e4   : > { %16150 = vst [vmem:[#allocation17_spill] sm:$0xff] %v12800_v14  ;;  %v1418_v46 = vrot.slane %v1411_v52, %v11048_v5  ;;  %v4258_v39 = vcombine.low %v4257_v44, %v12800_v14  ;;  %v1603_v1 = vcombine.low %v1595_v55, %v1602_v58  ;;  %v3692_v40 = vcombine.low %v16142_v11, %v12796_v59 }
 0x1e5   : > { %5922 = vrot.lane.b32.xlu1 %v5673_v22, %s10790_s16  ;;  %5924 = vrot.lane.b32.xlu0 %v5681_v19, %s10790_s16  ;;  %3537 = vst.msk [vmem:[#allocation2 + $0x3c] sm:$0xf] %vm3521_vm1, %v3477_v56  ;;  %v5665_v51 = vrot.slane %v5658_v36, %v11048_v5  ;;  %v6635_v20 = vrot.slane %v6628_v34, %v11048_v5  ;;  %v2349_v36 = vshll.u32 %v12686_v35, 16 }
 0x1e6   : > { %4095 = vst.msk [vmem:[#allocation2 + $0x40] sm:$0xf] %vm4078_vm2, %v12554_v9  ;;  %v1723_v22 = vcombine.low %v12807_v28, %v16151_v38  ;;  %v3724_v44 = vcombine.low %v1602_v58, %v12693_v8  ;;  %4094 = vst.msk [vmem:[#allocation2 + $0x3c] sm:$0xf] %vm4078_vm2, %v12630_v21  ;;  %v12828_v55 = vrot.slane %v1603_v1, %v11048_v5  ;;  %v2344_v9 = vshrl.u32 %v16120_v24, 16  ;;  %v3447_v41 = vpop.permute.xlu0 %3446  ;;  %v4579_v57 = vpop.permute.xlu1 %4578 }
 0x1e7   : > { %1996 = vst.msk [vmem:[#allocation2 + $0x4] sm:$0xf] %vm1994_vm0, %v1418_v46  ;;  %v12831_v19 = vrot.slane %v3692_v40, %v11048_v5  ;;  %v4281_v34 = vrot.slane %v4274_v3, %v11048_v5  ;;  %v2332_v58 = vshll.u32 %v12796_v59, 16  ;;  %v2352_v21 = vshrl.u32 %v12686_v35, 16 }
 0x1e8   : > { %v1730_v8 = vrot.slane %v1723_v22, %v11048_v5  ;;  %3522 = vst.msk [vmem:[#allocation2] sm:$0xf] %vm3521_vm1, %v3447_v41  ;;  %v12842_v52 = vrot.slane %v4258_v39, %v11048_v5  ;;  %v12847_v56 = vrot.slane %v3724_v44, %v11048_v5  ;;  %v5292_v3 = vcombine.low %v12642_v42, %v12682_v53 }
 0x1e9   : > { %5946 = vrot.lane.b32.xlu1 %v5801_v25, %s10790_s16  ;;  %2004 = vst.msk [vmem:[#allocation2 + $0x24] sm:$0xf] %vm1994_vm0, %v12828_v55  ;;  %v2357_v46 = vshll.u32 %v12656_v7, 16  ;;  %6807 = vrot.lane.b32.xlu0 %v6643_v43, %s10792_s19  ;;  %v2360_v35 = vshrl.u32 %v12656_v7, 16  ;;  %v2365_v25 = vshll.u32 %v16122_v6, 16  ;;  %v2368_v39 = vshrl.u32 %v16122_v6, 16 }
 0x1ea   : > { %4079 = vst.msk [vmem:[#allocation2] sm:$0xf] %vm4078_vm2, %v12345_v29  ;;  %v2373_v1 = vshll.u32 %v16124_v10, 16  ;;  %v5300_v40 = vcombine.low %v12800_v14, %v12831_v19  ;;  %v12866_v43 = vsel %vm11520_vm15, %v2344_v9, %v2349_v36  ;;  %v2376_v7 = vshrl.u32 %v16124_v10, 16  ;;  %v3449_v9 = vpop.permute.xlu0 %3448  ;;  %v4607_v36 = vpop.permute.xlu1 %4606 }
 0x1eb   : > { %2009 = vst.msk [vmem:[#allocation2 + $0x38] sm:$0xf] %vm1994_vm0, %v1730_v8  ;;  %v12870_v29 = vsel %vm11520_vm15, %v2352_v21, %v2357_v46  ;;  %v12875_v6 = vsel %vm11520_vm15, %v2360_v35, %v2365_v25  ;;  %v2381_v22 = vshll.u32 %v16121_v0, 16  ;;  %v2384_v44 = vshrl.u32 %v16121_v0, 16 }
 0x1ec   : > { %4652 = vst.msk [vmem:[#allocation2] sm:$0xf] %vm4651_vm3, %v12285_v47  ;;  %v12879_v47 = vsel %vm11520_vm15, %v2368_v39, %v2373_v1  ;;  %v2393_v41 = vshrl.u32 %v12536_v27, 16  ;;  %v2398_v8 = vshll.u32 %v12576_v12, 16  ;;  %v2401_v21 = vshrl.u32 %v12576_v12, 16 }
 0x1ed   : > { %6805 = vrot.lane.b32.xlu1 %v6635_v20, %s10792_s19  ;;  %v2406_v46 = vshll.u32 %v12601_v60, 16  ;;  %5920 = vrot.lane.b32.xlu0 %v5665_v51, %s10790_s16  ;;  %3523 = vst.msk [vmem:[#allocation2 + $0x4] sm:$0xf] %vm3521_vm1, %v3449_v9  ;;  %v12893_v35 = vsel %vm11520_vm15, %v2376_v7, %v2381_v22  ;;  %v16152_v20 = vshll.u32 %v12713_v50, 16  ;;  %v3064_v39 = vcombine.low %v12866_v43, %v12875_v6 }
 0x1ee   : > { %4667 = vst.msk [vmem:[#allocation2 + $0x3c] sm:$0xf] %vm4651_vm3, %v4607_v36  ;;  %v12909_v1 = vsel %vm11520_vm15, %v2393_v41, %v2398_v8  ;;  %v6168_v22 = vcombine.low %v12875_v6, %v12893_v35  ;;  %v2295_v36 = vshrl.u32 %v12647_v30, 16  ;;  %v12928_v41 = vpop.permute.xlu1 %5461  ;;  %v2300_v6 = vshll.u32 %v12399_v37, 16 }
 0x1ef   : > { %v12899_v25 = vsel %vm11520_vm15, %v2384_v44, %v16152_v20  ;;  %4080 = vst.msk [vmem:[#allocation2 + $0x4] sm:$0xf] %vm4078_vm2, %v12408_v48  ;;  %v12913_v50 = vsel %vm11520_vm15, %v2401_v21, %v2406_v46  ;;  %v2303_v21 = vshrl.u32 %v12399_v37, 16  ;;  %v12940_v46 = vpop.permute.xlu0 %6518  ;;  %v2308_v20 = vshll.u32 %v16126_v2, 16 }
 0x1f0   : > { %v4864_v7 = vcombine.low %v12879_v47, %v12899_v25  ;;  %4653 = vst.msk [vmem:[#allocation2 + $0x4] sm:$0xf] %vm4651_vm3, %v4579_v57  ;;  %v12934_v57 = vrot.slane %v6168_v22, %v11048_v5  ;;  %16154 = vst [vmem:[#allocation30_spill] sm:$0xff] %v12940_v46  ;;  %v2316_v48 = vshll.u32 %v16142_v11, 16  ;;  %v12951_v37 = vsel %vm11520_vm15, %v2295_v36, %v2300_v6 }
 0x1f1   : > { %4590 = vrot.lane.b32.xlu1 %v4281_v34, %s10791_s18  ;;  %6803 = vrot.lane.b32.xlu0 %v12842_v52, %s10792_s19  ;;  %v3708_v34 = vcombine.low %v12831_v19, %v12724_v26  ;;  %v2319_v44 = vshrl.u32 %v16142_v11, 16  ;;  %v2324_v9 = vshll.u32 %v12673_v33, 16  ;;  %v12957_v26 = vsel %vm11520_vm15, %v2303_v21, %v2308_v20  ;;  %5234 = vst.msk [vmem:[#allocation2] sm:$0xf] %vm5233_vm4, %v12639_v17  ;;  %v16169_v17 = vld [vmem:[#allocation66_spill] sm:$0xff] }
 0x1f2   : > { %v12931_v8 = vrot.slane %v4864_v7, %v11048_v5  ;;  %v2311_v7 = vshrl.u32 %v16126_v2, 16  ;;  %v2327_v19 = vshrl.u32 %v12673_v33, 16  ;;  %v2336_v51 = vshrl.u32 %v16129_v63, 16  ;;  %v16187_v63 = vld [vmem:[#allocation59_spill] sm:$0xff] }
 0x1f3   : > { %v5307_v36 = vrot.slane %v5300_v40, %v11048_v5  ;;  %v2326_v6 = vsel %vm11520_vm15, %v2319_v44, %v2324_v9  ;;  %v2341_v22 = vshll.u32 %v16120_v24, 16  ;;  %v2279_v40 = vshrl.u32 %v16110_v15, 16  ;;  %v12981_v44 = vpop.permute.xlu1 %5914 }
 0x1f4   : > { %16153 = vst [vmem:[#allocation38_spill] sm:$0xff] %v12931_v8  ;;  %v2318_v2 = vsel %vm11520_vm15, %v2311_v7, %v2316_v48  ;;  %v12976_v33 = vsel %vm11520_vm15, %v2327_v19, %v2332_v58  ;;  %v2284_v48 = vshll.u32 %v16079_v31, 16  ;;  %v2287_v59 = vshrl.u32 %v16079_v31, 16  ;;  %v3475_v58 = vpop.permute.xlu0 %3474 }
 0x1f5   : > { %5473 = vrot.lane.b32.xlu1 %v12828_v55, %s10793_s20  ;;  %v6136_v21 = vcombine.low %v12951_v37, %v2318_v2  ;;  %4588 = vrot.lane.b32.xlu0 %v12842_v52, %s10791_s18  ;;  %v4832_v55 = vcombine.low %v12957_v26, %v2326_v6  ;;  %v2343_v24 = vsel %vm11520_vm15, %v2336_v51, %v2341_v22  ;;  %v2292_v19 = vshll.u32 %v12647_v30, 16 }
 0x1f6   : > { %v3040_v9 = vcombine.low %v2318_v2, %v12976_v33  ;;  %v3041_v20 = vcombine.low %v2326_v6, %v2343_v24  ;;  %v2286_v15 = vsel %vm11520_vm15, %v2279_v40, %v2284_v48  ;;  %3536 = vst.msk [vmem:[#allocation2 + $0x38] sm:$0xf] %vm3521_vm1, %v3475_v58  ;;  %v5299_v31 = vrot.slane %v5292_v3, %v11048_v5  ;;  %v16177_v6 = vld [vmem:[#allocation16_spill] sm:$0xff] }
 0x1f7   : > { %v12987_v52 = vrot.slane %v6136_v21, %v11048_v5  ;;  %v12991_v7 = vrot.slane %v4832_v55, %v11048_v5  ;;  %v6120_v51 = vcombine.low %v12290_v62, %v2286_v15  ;;  %v13008_v2 = vrot.slane %v3064_v39, %v11048_v5  ;;  %4093 = vst.msk [vmem:[#allocation2 + $0x38] sm:$0xf] %vm4078_vm2, %v12594_v18  ;;  %v13023_v3 = vpop.permute.xlu1 %4009 }
 0x1f8   : > { %v13005_v22 = vrot.slane %v3040_v9, %v11048_v5  ;;  %v2294_v42 = vsel %vm11520_vm15, %v2287_v59, %v2292_v19  ;;  %v13019_v62 = vrot.slane %v3041_v20, %v11048_v5  ;;  %4666 = vst.msk [vmem:[#allocation2 + $0x38] sm:$0xf] %vm4651_vm3, %v12471_v49  ;;  %v13030_v21 = vpop.permute.xlu0 %5916  ;;  %v3715_v55 = vrot.slane %v3708_v34, %v11048_v5 }
 0x1f9   : > { %4021 = vrot.lane.b32.xlu1 %v12847_v56, %s10794_s11  ;;  %5471 = vrot.lane.b32.xlu0 %v5307_v36, %s10793_s20  ;;  %v6144_v30 = vcombine.low %v12987_v52, %v12991_v7  ;;  %v4848_v56 = vcombine.low %v2343_v24, %v12870_v29  ;;  %v3017_v18 = vcombine.low %v2294_v42, %v12957_v26 }
 0x1fa   : > { %v4816_v39 = vcombine.low %v12313_v23, %v2294_v42  ;;  %v6127_v36 = vrot.slane %v6120_v51, %v11048_v5  ;;  %16155 = vst [vmem:[#allocation27_spill] sm:$0xff] %v13030_v21  ;;  %v16156_v26 = vcombine.low %v12870_v29, %v12879_v47  ;;  %v10228_v48 = vpack.c.bf16 %v12339_v13, %v12339_v13  ;;  %v16164_v42 = vld [vmem:[#allocation82_spill] sm:$0xff] }
 0x1fb   : > { %v13034_v40 = vrot.slane %v4848_v56, %v11048_v5  ;;  %v1611_v34 = vcombine.low %v16124_v10, %v12536_v27  ;;  %v1612_v9 = vcombine.low %v16121_v0, %v12576_v12  ;;  %v16157_v29 = vcombine.low %v12682_v53, %v12770_v45  ;;  %v13064_v58 = vpop.permute.xlu1 %4582  ;;  %5248 = vst.msk [vmem:[#allocation2 + $0x38] sm:$0xf] %vm5233_vm4, %v12775_v16  ;;  %v16171_v16 = vld [vmem:[#allocation86_spill] sm:$0xff] }
 0x1fc   : > { %v13042_v23 = vrot.slane %v16156_v26, %v11048_v5  ;;  %v13048_v24 = vrot.slane %v4816_v39, %v11048_v5  ;;  %v3016_v13 = vcombine.low %v2286_v15, %v12951_v37  ;;  %v13075_v45 = vcombine.high %v12437_v61, %v12437_v61  ;;  %v13081_v15 = vpop.permute.xlu0 %6799  ;;  %v16166_v39 = vld [vmem:[#allocation8_spill] sm:$0xff]  ;;  %5549 = vst.msk [vmem:[#allocation2 + $0x38] sm:$0xf] %vm5534_vm5, %v16171_v16 }
 0x1fd   : > { %5469 = vrot.lane.b32.xlu1 %v5299_v31, %s10793_s20  ;;  %4019 = vrot.lane.b32.xlu0 %v3715_v55, %s10794_s11  ;;  %v3691_v47 = vrot.slane %v16157_v29, %v11048_v5  ;;  %v4856_v52 = vcombine.low %v13034_v40, %v13008_v2  ;;  %v13068_v0 = vrot.slane %v1611_v34, %v11048_v5  ;;  %v16172_v29 = vld [vmem:[#allocation57_spill] sm:$0xff] }
 0x1fe   : > { %v6128_v20 = vcombine.low %v6127_v36, %v13048_v24  ;;  %v13071_v19 = vrot.slane %v1612_v9, %v11048_v5  ;;  %16160 = vst [vmem:[#allocation9_spill] sm:$0xff] %v13075_v45  ;;  %v13079_v37 = vcombine.high %v12448_v4, %v12448_v4  ;;  %16162 = vst [vmem:[#allocation36_spill] sm:$0xff] %v13081_v15  ;;  %v16167_v36 = vld [vmem:[#allocation85_spill] sm:$0xff]  ;;  %v16170_v9 = vld [vmem:[#allocation39_spill] sm:$0xff] }
 0x1ff   : > { %16158 = vst [vmem:[#allocation34_spill] sm:$0xff] %v13068_v0  ;;  %v16163_v31 = vcombine.low %v12934_v57, %v12931_v8  ;;  %v13093_v56 = vcombine.high %v16164_v42, %v16164_v42  ;;  %v16168_v55 = vcombine.high %v16167_v36, %v16167_v36  ;;  %5535 = vst.msk [vmem:[#allocation2] sm:$0xf] %vm5534_vm5, %v16170_v9  ;;  %v16173_v36 = vld [vmem:[#allocation41_spill] sm:$0xff]  ;;  %v13124_v9 = vpop.permute.xlu1 %5465 }
 0x200   : > { %16159 = vst [vmem:[#allocation12_spill] sm:$0xff] %v13071_v19  ;;  %16161 = vst [vmem:[#allocation13_spill] sm:$0xff] %v13079_v37  ;;  %v6152_v57 = vcombine.low %v12976_v33, %v12866_v43  ;;  %v6135_v16 = vrot.slane %v6128_v20, %v11048_v5  ;;  %v13128_v34 = vrot.slane %v3016_v13, %v11048_v5  ;;  %v16178_v43 = vld [vmem:[#allocation47_spill] sm:$0xff]  ;;  %v16179_v20 = vld [vmem:[#allocation42_spill] sm:$0xff] }
 0x201   : > { %v6183_v51 = vrot.slane %v16163_v31, %v11048_v5  ;;  %16165 = vst [vmem:[#allocation15_spill] sm:$0xff] %v13093_v56  ;;  %v13099_v26 = vrot.slane %v16168_v55, %v16166_v39  ;;  %4017 = vrot.lane.b32.xlu1 %v3691_v47, %s10794_s11  ;;  %v13112_v31 = vcombine.high %v16172_v29, %v16172_v29  ;;  %16174 = vst [vmem:[#allocation40_spill] sm:$0xff] %v13124_v9  ;;  %v16180_v13 = vld [vmem:[#allocation75_spill] sm:$0xff]  ;;  %v16192_v37 = vld [vmem:[#allocation49_spill] sm:$0xff] }
 0x202   : > { %v13116_v55 = vrot.slane %v16173_v36, %v16166_v39  ;;  %v13119_v47 = vrot.slane %v10228_v48, %v16166_v39  ;;  %v13131_v49 = vrot.slane %v3017_v18, %v11048_v5  ;;  %v16175_v36 = vld [vmem:[#allocation74_spill] sm:$0xff]  ;;  %v13137_v48 = vpop.permute.xlu0 %4584  ;;  %v4346_v33 = vcombine.low %v16178_v43, %v16177_v6 }
 0x203   : > { %6506 = vrot.lane.b32.xlu0 %v6183_v51, %s10796_s13  ;;  %v13135_v59 = vcombine.high %v16175_v36, %v16175_v36  ;;  %16176 = vst [vmem:[#allocation85_spill] sm:$0xff] %v13137_v48  ;;  %v6151_v51 = vrot.slane %v6144_v30, %v11048_v5  ;;  %v13143_v46 = vrot.slane %v6152_v57, %v11048_v5  ;;  %v16181_v18 = vld [vmem:[#allocation46_spill] sm:$0xff]  ;;  %v13168_v21 = vpop.permute.xlu1 %5489 }
 0x204   : > { %v4330_v53 = vcombine.low %v16180_v13, %v16179_v20  ;;  %v5714_v4 = vcombine.low %v16181_v18, %v16149_v54  ;;  %v16182_v48 = vld [vmem:[#allocation70_spill] sm:$0xff]  ;;  %v4863_v11 = vrot.slane %v4856_v52, %v11048_v5  ;;  %v10226_v57 = vcombine.high %v16181_v18, %v16149_v54 }
 0x205   : > { %6500 = vrot.lane.b32.xlu1 %v6135_v16, %s10796_s13  ;;  %v3765_v30 = vcombine.low %v16175_v36, %v13135_v59  ;;  %v1683_v6 = vcombine.low %v13135_v59, %v16181_v18  ;;  %v10217_v15 = vpack.c.bf16 %v16182_v48, %v16182_v48  ;;  %v6160_v16 = vcombine.low %v13143_v46, %v13034_v40 }
 0x206   : > { %v13164_v56 = vrot.slane %v4330_v53, %v11048_v5  ;;  %v13180_v46 = vpop.permute.xlu0 %5467  ;;  %v16186_v53 = vcombine.low %v12991_v7, %v13005_v22  ;;  %v4824_v52 = vcombine.low %v13048_v24, %v13128_v34  ;;  %v4353_v54 = vrot.slane %v4346_v33, %v11048_v5  ;;  %v16189_v24 = vld [vmem:[#allocation72_spill] sm:$0xff] }
 0x207   : > { %6502 = vrot.lane.b32.xlu0 %v6151_v51, %s10796_s13  ;;  %v13174_v48 = vrot.slane %v3765_v30, %v11048_v5  ;;  %v13178_v51 = vrot.slane %v13116_v55, %v16166_v39  ;;  %16185 = vst [vmem:[#allocation86_spill] sm:$0xff] %v13180_v46  ;;  %v13189_v14 = vrot.slane %v1683_v6, %v11048_v5  ;;  %v13211_v33 = vpop.permute.xlu1 %5942 }
 0x208   : > { %v4847_v40 = vrot.slane %v16186_v53, %v11048_v5  ;;  %v5721_v30 = vrot.slane %v5714_v4, %v11048_v5  ;;  %v13200_v7 = vrot.slane %v13119_v47, %v16166_v39  ;;  %v13204_v6 = vrot.slane %v16189_v24, %v16166_v39  ;;  %v16191_v24 = vld [vmem:[#allocation48_spill] sm:$0xff] }
 0x209   : > { %16183 = vst [vmem:[#allocation66_spill] sm:$0xff] %v13174_v48  ;;  %16184 = vst [vmem:[#allocation39_spill] sm:$0xff] %v13178_v51  ;;  %5172 = vrot.lane.b32.xlu1 %v4863_v11, %s10795_s12  ;;  %v1684_v4 = vcombine.low %v16179_v20, %v16178_v43  ;;  %v16190_v53 = vcombine.low %v13008_v2, %v13042_v23  ;;  %v5339_v46 = vrot.slane %v10226_v57, %v11048_v5 }
 0x20a   : > { %16188 = vst [vmem:[#allocation57_spill] sm:$0xff] %v13200_v7  ;;  %v16193_v61 = vcombine.low %v16191_v24, %v16192_v37  ;;  %v10213_v11 = vcombine.high %v16124_v10, %v12536_v27  ;;  %v13225_v9 = vrot.slane %v10217_v15, %v16166_v39  ;;  %v13227_v43 = vpop.permute.xlu0 %4015  ;;  %v16195_v2 = vcombine.low %v13005_v22, %v13019_v62 }
 0x20b   : > { %5170 = vrot.lane.b32.xlu0 %v4847_v40, %s10795_s12  ;;  %v3087_v45 = vrot.slane %v16190_v53, %v11048_v5  ;;  %16194 = vst [vmem:[#allocation41_spill] sm:$0xff] %v13227_v43  ;;  %v4831_v57 = vrot.slane %v4824_v52, %v11048_v5  ;;  %v13235_v53 = vrot.slane %v1684_v4, %v11048_v5  ;;  %v16209_v43 = vld [vmem:[#allocation18_spill] sm:$0xff] }
 0x20c   : > { %v1466_v40 = vrot.slane %v16193_v61, %v11048_v5  ;;  %v3063_v23 = vrot.slane %v16195_v2, %v11048_v5  ;;  %v5722_v61 = vcombine.low %v5721_v30, %v4353_v54  ;;  %v13240_v10 = vrot.slane %v10213_v11, %v11048_v5  ;;  %v16197_v30 = vld [vmem:[#allocation50_spill] sm:$0xff]  ;;  %v16198_v11 = vld [vmem:[#allocation51_spill] sm:$0xff] }
 0x20d   : > { %3464 = vrot.lane.b32.xlu1 %v3087_v45, %s10797_s14  ;;  %v13246_v22 = vcombine.high %v12576_v12, %v12576_v12  ;;  %v16196_v62 = vcombine.low %v16169_v17, %v13068_v0  ;;  %v4354_v15 = vcombine.low %v4353_v54, %v12807_v28  ;;  %v1699_v52 = vcombine.low %v13189_v14, %v13235_v53  ;;  %v16202_v0 = vld [vmem:[#allocation71_spill] sm:$0xff] }
 0x20e   : > { %1998 = vst.msk [vmem:[#allocation2 + $0xc] sm:$0xf] %vm1994_vm0, %v1466_v40  ;;  %v16199_v4 = vcombine.low %v16197_v30, %v16198_v11  ;;  %v13260_v40 = vpop.permute.xlu1 %4037  ;;  %v6660_v2 = vcombine.low %v4353_v54, %v5339_v46  ;;  %v13267_v28 = vpop.permute.xlu0 %5944  ;;  %v4314_v30 = vcombine.low %v13099_v26, %v16202_v0  ;;  %v16204_v54 = vcombine.low %v13128_v34, %v13131_v49 }
 0x20f   : > { %3462 = vrot.lane.b32.xlu0 %v3063_v23, %s10797_s14  ;;  %v4297_v45 = vrot.slane %v16196_v62, %v11048_v5  ;;  %16200 = vst [vmem:[#allocation74_spill] sm:$0xff] %v13260_v40  ;;  %v5340_v23 = vcombine.low %v5339_v46, %v16151_v38  ;;  %v4298_v17 = vcombine.low %v12576_v12, %v13246_v22  ;;  %16201 = vst [vmem:[#allocation16_spill] sm:$0xff] %v13267_v28 }
 0x210   : > { %v1802_v24 = vrot.slane %v16199_v4, %v11048_v5  ;;  %v3748_v62 = vcombine.low %v16172_v29, %v13112_v31  ;;  %v13274_v11 = vrot.slane %v1699_v52, %v11048_v5  ;;  %v10214_v38 = vcombine.high %v13099_v26, %v16202_v0  ;;  %v10629_v4 = vld [vmem:[%s15736_s3] sm:$0xff]  }
 0x211   : > { %v13281_v46 = vcombine.high %v13178_v51, %v13178_v51  ;;  %5168 = vrot.lane.b32.xlu1 %v4831_v57, %s10795_s12  ;;  %v5729_v12 = vrot.slane %v5722_v61, %v11048_v5  ;;  %v3039_v52 = vrot.slane %v16204_v54, %v11048_v5  ;;  %v13297_v57 = vrot.slane %v4298_v17, %v11048_v5  ;;  %v16301_v51 = vld [vmem:[#allocation9_spill] sm:$0xff] }
 0x212   : > { %2012 = vst.msk [vmem:[#allocation2 + $0x44] sm:$0xf] %vm1994_vm0, %v1802_v24  ;;  %v6167_v24 = vrot.slane %v6160_v16, %v11048_v5  ;;  %2008 = vst.msk [vmem:[#allocation2 + $0x34] sm:$0xf] %vm1994_vm0, %v13274_v11  ;;  %v13300_v61 = vrot.slane %v10214_v38, %v11048_v5  ;;  %v1635_v49 = vcombine.low %v12601_v60, %v16172_v29  ;;  %v13304_v34 = vpop.permute.xlu1 %4610  ;;  %v5913_v37 = vpop.permute.xlu0 %5912  ;;  %v2474_v40 = vshrl.u32 %v13135_v59, 16 }
 0x213   : > { %16203 = vst [vmem:[#allocation47_spill] sm:$0xff] %v13281_v46  ;;  %4592 = vrot.lane.b32.xlu0 %v4297_v45, %s10791_s18  ;;  %16205 = vst [vmem:[#allocation42_spill] sm:$0xff] %v13304_v34  ;;  %v6667_v54 = vrot.slane %v6660_v2, %v11048_v5  ;;  %v13308_v45 = vrot.slane %v4354_v15, %v11048_v5  ;;  %v13311_v16 = vrot.slane %v5340_v23, %v11048_v5  ;;  %v15877_v2 = vmov 0.0   ;;  %v10631_v34 = vld [vmem:[%s15736_s3 + $0x10] sm:$0xff]  }
 0x214   : > { %v13314_v17 = vrot.slane %v3748_v62, %v11048_v5  ;;  %v13317_v38 = vrot.slane %v4314_v30, %v11048_v5  ;;  %v13320_v28 = vrot.slane %v1635_v49, %v11048_v5  ;;  %10437 = vmatprep.subr.bf16.mxu1 %v15877_v2  ;;  %5988 = vst.msk [vmem:[#allocation2] sm:$0xf] %vm5987_vm6, %v5913_v37  ;;  %v10630_v30 = vld [vmem:[%s15736_s3 + $0x8] sm:$0xff]   ;;  %v16208_v49 = vld [vmem:[#allocation32_spill] sm:$0xff] }
 0x215   : > { %6504 = vrot.lane.b32.xlu1 %v6167_v24, %s10796_s13  ;;  %v16207_v15 = vcombine.low %v13174_v48, %v13164_v56  ;;  %10438 = vmatpush3.bf16.msra.mxu1 %v10629_v4  ;;  %v1636_v62 = vcombine.low %v13246_v22, %v13099_v26  ;;  %v1492_v2 = vcombine.low %v16209_v43, %v16208_v49  ;;  %v16212_v48 = vmov 0.0  }
 0x216   : > { %16206 = vst [vmem:[#allocation46_spill] sm:$0xff] %v13314_v17  ;;  %v16210_v37 = vcombine.low %v13164_v56, %v13189_v14  ;;  %v16211_v4 = vcombine.low %v16187_v63, %v13071_v19  ;;  %10439 = vmatprep.subr.bf16.mxu1 %v16212_v48  ;;  %v13354_v43 = vpop.permute.xlu1 %5493  ;;  %v16215_v63 = vcombine.low %v12893_v35, %v12909_v1 }
 0x217   : > { %v5713_v23 = vrot.slane %v16207_v15, %v11048_v5  ;;  %5932 = vrot.lane.b32.xlu0 %v5729_v12, %s10790_s16  ;;  %16213 = vst [vmem:[#allocation70_spill] sm:$0xff] %v13354_v43  ;;  %v16214_v12 = vld [vmem:[#allocation20_spill] sm:$0xff]  ;;  %v13359_v14 = vrot.slane %v1636_v62, %v11048_v5  ;;  %v1506_v56 = vrot.slane %v1492_v2, %v11048_v5  ;;  %v2458_v2 = vshrl.u32 %v16175_v36, 16 }
 0x218   : > { %v13343_v24 = vrot.slane %v16210_v37, %v11048_v5  ;;  %v13349_v15 = vrot.slane %v16211_v4, %v11048_v5  ;;  %v3788_v49 = vcombine.low %v16181_v18, %v16214_v12  ;;  %v13366_v37 = vrot.slane %v16215_v63, %v11048_v5  ;;  %10499 = vmatprep.subr.bf16.mxu0 %v16212_v48  ;;  %v13369_v4 = vpop.permute.xlu0 %6795  ;;  %v16219_v63 = vld [vmem:[#allocation19_spill] sm:$0xff] }
 0x219   : > { %16216 = vst [vmem:[#allocation59_spill] sm:$0xff] %v13369_v4  ;;  %v5698_v42 = vcombine.low %v13314_v17, %v13317_v38  ;;  %v16217_v62 = vcombine.low %v12899_v25, %v12913_v50  ;;  %v2463_v43 = vshll.u32 %v16180_v13, 16  ;;  %3460 = vrot.lane.b32.xlu1 %v3039_v52, %s10797_s14  ;;  %v1651_v35 = vcombine.low %v13320_v28, %v13359_v14 }
 0x21a   : > { %10440 = vmatpush3.bf16.msra.mxu1 %v10630_v30  ;;  %v1507_v4 = vcombine.low %v16219_v63, %v1506_v56  ;;  %v2466_v25 = vshrl.u32 %v16180_v13, 16  ;;  %v13398_v56 = vpop.permute.xlu1 %4013  ;;  %v5682_v63 = vcombine.low %v12536_v27, %v12601_v60  ;;  %v13408_v52 = vrot.slane %v3788_v49, %v11048_v5  ;;  %10447 = vmatprep.mubr.msk.bf16.mxu1 %vm10799_vm8, %v16212_v48 }
 0x21b   : > { %v13377_v12 = vrot.slane %v16217_v62, %v11048_v5  ;;  %v2471_v62 = vshll.u32 %v13135_v59, 16  ;;  %6815 = vrot.lane.b32.xlu0 %v6667_v54, %s10792_s19  ;;  %10441 = vmatprep.subr.bf16.mxu1 %v16212_v48  ;;  %16220 = vst [vmem:[#allocation48_spill] sm:$0xff] %v13398_v56  ;;  %v13403_v13 = vrot.slane %v1651_v35, %v11048_v5  ;;  %v2479_v49 = vshll.u32 %v16179_v20, 16 }
 0x21c   : > { %v1514_v54 = vrot.slane %v1507_v4, %v11048_v5  ;;  %v4581_v8 = vpop.permute.xlu0 %4580  ;;  %v16222_v30 = vcombine.low %v13112_v31, %v16175_v36  ;;  %v13418_v27 = vcombine.high %v13099_v26, %v13099_v26  ;;  %v13422_v35 = vsel %vm11520_vm15, %v2458_v2, %v2463_v43  ;;  %v16225_v2 = vld [vmem:[#allocation37_spill] sm:$0xff]  ;;  %10503 = vmatprep.mubr.msk.bf16.mxu0 %vm10799_vm8, %v16212_v48 }
 0x21d   : > { %16218 = vst [vmem:[#allocation72_spill] sm:$0xff] %v13377_v12  ;;  %16221 = vst [vmem:[#allocation49_spill] sm:$0xff] %v13403_v13  ;;  %5930 = vrot.lane.b32.xlu1 %v5713_v23, %s10790_s16  ;;  %v13431_v59 = vsel %vm11520_vm15, %v2466_v25, %v2471_v62  ;;  %v2482_v4 = vshrl.u32 %v16179_v20, 16  ;;  %v2487_v43 = vshll.u32 %v16181_v18, 16  ;;  %v13442_v23 = vrot.slane %v5698_v42, %v11048_v5  ;;  %v16227_v20 = vld [vmem:[#allocation14_spill] sm:$0xff]  ;;  %v16228_v18 = vld [vmem:[#allocation53_spill] sm:$0xff] }
 0x21e   : > { %v13414_v12 = vrot.slane %v16222_v30, %v11048_v5  ;;  %4654 = vst.msk [vmem:[#allocation2 + $0x8] sm:$0xf] %vm4651_vm3, %v4581_v8  ;;  %10442 = vmatpush3.bf16.msra.mxu1 %v10631_v34  ;;  %v10632_v8 = vld [vmem:[%s15736_s3 + $0x18] sm:$0xff]   ;;  %v16224_v34 = vld [vmem:[#allocation52_spill] sm:$0xff]  ;;  %v16229_v30 = vcombine.low %v16227_v20, %v16228_v18  ;;  %v13460_v42 = vpop.permute.xlu1 %6797  ;;  %v13463_v56 = vrot.slane %v5682_v63, %v11048_v5 }
 0x21f   : > { %2006 = vst.msk [vmem:[#allocation2 + $0x2c] sm:$0xf] %vm1994_vm0, %v13403_v13  ;;  %2000 = vst.msk [vmem:[#allocation2 + $0x14] sm:$0xf] %vm1994_vm0, %v1514_v54  ;;  %4600 = vrot.lane.b32.xlu0 %v13308_v45, %s10791_s18  ;;  %10443 = vmatprep.subr.bf16.mxu1 %v16212_v48  ;;  %v16226_v25 = vcombine.low %v16224_v34, %v16225_v2  ;;  %v10633_v45 = vld [vmem:[%s15736_s3 + $0x20] ss:$0 sps:$4 sm:$0xff]   ;;  %v2481_v2 = vsel %vm11520_vm15, %v2474_v40, %v2479_v49 }
 0x220   : > { %16223 = vst [vmem:[#allocation50_spill] sm:$0xff] %v13414_v12  ;;  %v13455_v54 = vrot.slane %v16229_v30, %v11048_v5  ;;  %v13473_v18 = vpop.permute.xlu0 %5463  ;;  %v6216_v63 = vcombine.low %v13422_v35, %v2481_v2  ;;  %v3160_v49 = vcombine.low %v2481_v2, %v16227_v20  ;;  %v2425_v13 = vshrl.u32 %v16172_v29, 16 }
 0x221   : > { %v13449_v62 = vrot.slane %v16226_v25, %v11048_v5  ;;  %v2489_v25 = vsel %vm11520_vm15, %v2482_v4, %v2487_v43  ;;  %16230 = vst [vmem:[#allocation51_spill] sm:$0xff] %v13473_v18  ;;  %6813 = vrot.lane.b32.xlu1 %v13343_v24, %s10792_s19  ;;  %v2446_v4 = vshll.u32 %v13418_v27, 16  ;;  %v2430_v18 = vshll.u32 %v13099_v26, 16 }
 0x222   : > { %v4912_v30 = vcombine.low %v13431_v59, %v2489_v25  ;;  %10444 = vmatpush3.bf16.msra.mxu1 %v10632_v8  ;;  %v3161_v43 = vcombine.low %v2489_v25, %v16224_v34  ;;  %v13492_v20 = vrot.slane %v6216_v63, %v11048_v5  ;;  %v13495_v2 = vrot.slane %v3160_v49, %v11048_v5  ;;  %v13498_v40 = vpop.permute.xlu1 %6825 }
 0x223   : > { %5483 = vrot.lane.b32.xlu0 %v13311_v16, %s10793_s20  ;;  %v7070_v8 = vsel %vm7068_vm7, %v10633_v45, 0  ;;  %v3796_v34 = vcombine.low %v13235_v53, %v13408_v52  ;;  %10445 = vmatprep.subr.bf16.mxu1 %v16212_v48  ;;  %v2432_v25 = vsel %vm11520_vm15, %v2425_v13, %v2430_v18  ;;  %v2438_v53 = vshll.u32 %v13112_v31, 16 }
 0x224   : > { %v13489_v17 = vrot.slane %v4912_v30, %v11048_v5  ;;  %v13504_v16 = vrot.slane %v3161_v43, %v11048_v5  ;;  %v2433_v30 = vshrl.u32 %v13099_v26, 16  ;;  %v13509_v63 = vpop.permute.xlu0 %4011  ;;  %v2441_v52 = vshrl.u32 %v13112_v31, 16 }
 0x225   : > { %4598 = vrot.lane.b32.xlu1 %v13343_v24, %s10791_s18  ;;  %v2450_v18 = vshrl.u32 %v16202_v0, 16  ;;  %v2455_v43 = vshll.u32 %v16175_v36, 16  ;;  %v2409_v45 = vshrl.u32 %v12601_v60, 16  ;;  %v16231_v31 = vcombine.low %v13071_v19, %v13240_v10 }
 0x226   : > { %10446 = vmatpush3.bf16.msra.mxu1 %v7070_v8  ;;  %v4322_v24 = vcombine.low %v13317_v38, %v13414_v12  ;;  %v2440_v8 = vsel %vm11520_vm15, %v2433_v30, %v2438_v53  ;;  %v2448_v13 = vsel %vm11520_vm15, %v2441_v52, %v2446_v4  ;;  %v5161_v36 = vpop.permute.xlu1 %5160  ;;  %v3803_v60 = vrot.slane %v3796_v34, %v11048_v5 }
 0x227   : > { %5475 = vrot.lane.b32.xlu0 %v13349_v15, %s10793_s20  ;;  %v3747_v49 = vrot.slane %v16231_v31, %v11048_v5  ;;  %v2457_v15 = vsel %vm11520_vm15, %v2450_v18, %v2455_v43  ;;  %v6200_v0 = vcombine.low %v2432_v25, %v2448_v13  ;;  %v2414_v48 = vshll.u32 %v13246_v22, 16  ;;  %5235 = vst.msk [vmem:[#allocation2 + $0x4] sm:$0xf] %vm5233_vm4, %v5161_v36  ;;  %v16232_v43 = vld [vmem:[#allocation60_spill] sm:$0xff]  ;;  %v16233_v36 = vld [vmem:[#allocation10_spill] sm:$0xff] }
 0x228   : > { %v5941_v10 = vpop.permute.xlu0 %5940  ;;  %v4896_v31 = vcombine.low %v2440_v8, %v2457_v15  ;;  %v2417_v38 = vshrl.u32 %v13246_v22, 16  ;;  %v2422_v30 = vshll.u32 %v16172_v29, 16  ;;  %v3136_v53 = vcombine.low %v2448_v13, %v13422_v35  ;;  %5536 = vst.msk [vmem:[#allocation2 + $0x4] sm:$0xf] %vm5534_vm5, %v12928_v41 }
 0x229   : > { %6002 = vst.msk [vmem:[#allocation2 + $0x38] sm:$0xf] %vm5987_vm6, %v5941_v10  ;;  %5481 = vrot.lane.b32.xlu1 %v13274_v11, %s10793_s20  ;;  %v5690_v4 = vcombine.low %v13463_v56, %v13297_v57  ;;  %v13552_v34 = vrot.slane %v6200_v0, %v11048_v5  ;;  %v2416_v22 = vsel %vm11520_vm15, %v2409_v45, %v2414_v48  ;;  %5989 = vst.msk [vmem:[#allocation2 + $0x4] sm:$0xf] %vm5987_vm6, %v12981_v44  ;;  %v16234_v10 = vld [vmem:[#allocation25_spill] sm:$0xff] }
 0x22a   : > { %v3137_v29 = vcombine.low %v2457_v15, %v13431_v59  ;;  %v13562_v41 = vrot.slane %v4896_v31, %v11048_v5  ;;  %v2424_v11 = vsel %vm11520_vm15, %v2417_v38, %v2422_v30  ;;  %v6184_v0 = vcombine.low %v12909_v1, %v2416_v22  ;;  %v3453_v48 = vpop.permute.xlu1 %3452 }
 0x22b   : > { %5928 = vrot.lane.b32.xlu0 %v13442_v23, %s10790_s16  ;;  %v13568_v56 = vrot.slane %v3136_v53, %v11048_v5  ;;  %v4880_v35 = vcombine.low %v12913_v50, %v2424_v11  ;;  %v3112_v59 = vcombine.low %v2416_v22, %v2432_v25  ;;  %v3113_v45 = vcombine.low %v2424_v11, %v2440_v8  ;;  %v16266_v50 = vld [vmem:[#allocation40_spill] sm:$0xff] }
 0x22c   : > { %v13572_v44 = vrot.slane %v3137_v29, %v11048_v5  ;;  %v13574_v23 = vpop.permute.xlu0 %6823  ;;  %3525 = vst.msk [vmem:[#allocation2 + $0xc] sm:$0xf] %vm3521_vm1, %v3453_v48  ;;  %v6644_v52 = vcombine.low %v13099_v26, %v13418_v27  ;;  %v13582_v13 = vrot.slane %v6184_v0, %v11048_v5  ;;  %v2694_v8 = vshrl.u32 %v16232_v43, 16  ;;  %v16265_v26 = vld [vmem:[#allocation31_spill] sm:$0xff] }
 0x22d   : > { %4082 = vst.msk [vmem:[#allocation2 + $0xc] sm:$0xf] %vm4078_vm2, %v13023_v3  ;;  %4029 = vrot.lane.b32.xlu1 %v3803_v60, %s10794_s11  ;;  %v13590_v25 = vrot.slane %v4880_v35, %v11048_v5  ;;  %v13593_v18 = vrot.slane %v3112_v59, %v11048_v5  ;;  %v13598_v27 = vrot.slane %v3113_v45, %v11048_v5  ;;  %v2699_v15 = vshll.u32 %v16233_v36, 16 }
 0x22e   : > { %v2702_v3 = vshrl.u32 %v16233_v36, 16  ;;  %v2707_v60 = vshll.u32 %v16234_v10, 16  ;;  %4655 = vst.msk [vmem:[#allocation2 + $0xc] sm:$0xf] %vm4651_vm3, %v13064_v58  ;;  %v5189_v31 = vpop.permute.xlu1 %5188  ;;  %v5697_v38 = vrot.slane %v5690_v4, %v11048_v5  ;;  %v4329_v11 = vrot.slane %v4322_v24, %v11048_v5  ;;  %v16235_v4 = vld [vmem:[#allocation29_spill] sm:$0xff] }
 0x22f   : > { %4023 = vrot.lane.b32.xlu0 %v3747_v49, %s10794_s11  ;;  %5249 = vst.msk [vmem:[#allocation2 + $0x3c] sm:$0xf] %vm5233_vm4, %v5189_v31  ;;  %v5324_v58 = vcombine.low %v13414_v12, %v13300_v61  ;;  %v2710_v49 = vshrl.u32 %v16234_v10, 16  ;;  %v2715_v0 = vshll.u32 %v16235_v4, 16  ;;  %v16236_v48 = vcombine.high %v13116_v55, %v13116_v55 }
 0x230   : > { %v4609_v29 = vpop.permute.xlu0 %4608  ;;  %v16238_v59 = vcombine.high %v13119_v47, %v13119_v47  ;;  %v4121_v24 = vcombine.high %v13204_v6, %v13204_v6  ;;  %5550 = vst.msk [vmem:[#allocation2 + $0x3c] sm:$0xf] %vm5534_vm5, %v13168_v21  ;;  %v6651_v55 = vrot.slane %v6644_v52, %v11048_v5  ;;  %v13654_v52 = vrot.slane %v13225_v9, %v16166_v39 }
 0x231   : > { %v13624_v35 = vrot.slane %v16236_v48, %v16166_v39  ;;  %4668 = vst.msk [vmem:[#allocation2 + $0x40] sm:$0xf] %vm4651_vm3, %v4609_v29  ;;  %5926 = vrot.lane.b32.xlu1 %v5697_v38, %s10790_s16  ;;  %v13650_v38 = vrot.slane %v13204_v6, %v16166_v39  ;;  %v16240_v47 = vcombine.low %v13297_v57, %v13320_v28 }
 0x232   : > { %v13630_v45 = vrot.slane %v16238_v59, %v16166_v39  ;;  %v4122_v59 = vcombine.high %v13225_v9, %v13225_v9  ;;  %6003 = vst.msk [vmem:[#allocation2 + $0x3c] sm:$0xf] %vm5987_vm6, %v13211_v33  ;;  %v3481_v29 = vpop.permute.xlu1 %3480  ;;  %v13662_v33 = vsel %vm11520_vm15, %v2694_v8, %v2699_v15  ;;  %v5331_v9 = vrot.slane %v5324_v58, %v11048_v5  ;;  %v16242_v8 = vld [vmem:[#allocation74_spill] sm:$0xff] }
 0x233   : > { %16237 = vst [vmem:[#allocation32_spill] sm:$0xff] %v13624_v35  ;;  %4596 = vrot.lane.b32.xlu0 %v4329_v11, %s10791_s18  ;;  %v4313_v48 = vrot.slane %v16240_v47, %v11048_v5  ;;  %v13666_v11 = vsel %vm11520_vm15, %v2702_v3, %v2707_v60  ;;  %3539 = vst.msk [vmem:[#allocation2 + $0x44] sm:$0xf] %vm3521_vm1, %v3481_v29  ;;  %v13674_v21 = vsel %vm11520_vm15, %v2710_v49, %v2715_v0  ;;  %v16245_v58 = vld [vmem:[#allocation42_spill] sm:$0xff]  ;;  %v16246_v49 = vld [vmem:[#allocation23_spill] sm:$0xff] }
 0x234   : > { %16239 = vst [vmem:[#allocation18_spill] sm:$0xff] %v13630_v45  ;;  %v13668_v6 = vpop.permute.xlu0 %5491  ;;  %16241 = vst [vmem:[#allocation20_spill] sm:$0xff] %v13674_v21  ;;  %v13678_v57 = vrot.slane %v4121_v24, %v16166_v39  ;;  %v6652_v15 = vcombine.low %v6651_v55, %v13414_v12  ;;  %v13685_v3 = vrot.slane %v4122_v59, %v16166_v39  ;;  %v16248_v47 = vld [vmem:[#allocation90_spill] sm:$0xff] }
 0x235   : > { %4096 = vst.msk [vmem:[#allocation2 + $0x44] sm:$0xf] %vm4078_vm2, %v16242_v8  ;;  %6809 = vrot.lane.b32.xlu1 %v4313_v48, %s10792_s19  ;;  %v13689_v60 = vcombine.high %v13650_v38, %v13650_v38  ;;  %v4936_v0 = vcombine.low %v13449_v62, %v16246_v49  ;;  %v13698_v24 = vcombine.high %v13654_v52, %v13654_v52  ;;  %v16250_v49 = vld [vmem:[#allocation66_spill] sm:$0xff] }
 0x236   : > { %16243 = vst [vmem:[#allocation19_spill] sm:$0xff] %v13685_v3  ;;  %4669 = vst.msk [vmem:[#allocation2 + $0x44] sm:$0xf] %vm4651_vm3, %v16245_v58  ;;  %v6328_v59 = vcombine.low %v16248_v47, %v13666_v11  ;;  %v6497_v29 = vpop.permute.xlu1 %6496  ;;  %v5024_v8 = vcombine.low %v13662_v33, %v13674_v21  ;;  %v16249_v58 = vld [vmem:[#allocation88_spill] sm:$0xff]  ;;  %v16251_v31 = vcombine.low %v13300_v61, %v16250_v49  ;;  %v16252_v55 = vld [vmem:[#allocation38_spill] sm:$0xff] }
 0x237   : > { %16244 = vst [vmem:[#allocation52_spill] sm:$0xff] %v13689_v60  ;;  %5479 = vrot.lane.b32.xlu0 %v5331_v9, %s10793_s20  ;;  %16247 = vst [vmem:[#allocation37_spill] sm:$0xff] %v13698_v24  ;;  %v3305_v9 = vcombine.low %v16249_v58, %v13662_v33  ;;  %v16253_v47 = vcombine.low %v16252_v55, %v13366_v37  ;;  %v1851_v30 = vcombine.low %v16233_v36, %v16235_v4  ;;  %v16256_v58 = vld [vmem:[#allocation72_spill] sm:$0xff]  ;;  %v16297_v21 = vld [vmem:[#allocation45_spill] sm:$0xff] }
 0x238   : > { %v13707_v28 = vpop.permute.xlu0 %6498  ;;  %6571 = vst.msk [vmem:[#allocation2 + $0x4] sm:$0xf] %vm6569_vm9, %v6497_v29  ;;  %v3787_v22 = vrot.slane %v16251_v31, %v11048_v5  ;;  %v6659_v33 = vrot.slane %v6652_v15, %v11048_v5  ;;  %v16254_v29 = vld [vmem:[#allocation46_spill] sm:$0xff]  ;;  %v16257_v55 = vcombine.low %v13366_v37, %v16256_v58  ;;  %v13736_v36 = vcombine.high %v16235_v4, %v16235_v4 }
 0x239   : > { %v4879_v53 = vrot.slane %v16253_v47, %v11048_v5  ;;  %6872 = vst.msk [vmem:[#allocation2 + $0x4] sm:$0xf] %vm6870_vm10, %v13460_v42  ;;  %4594 = vrot.lane.b32.xlu1 %v4313_v48, %s10791_s18  ;;  %v16255_v61 = vcombine.low %v13359_v14, %v16254_v29  ;;  %v16259_v42 = vcombine.low %v13492_v20, %v13489_v17  ;;  %v16262_v58 = vld [vmem:[#allocation82_spill] sm:$0xff]  ;;  %v2813_v24 = vshll.u32 %v16301_v51, 16 }
 0x23a   : > { %v13732_v49 = vrot.slane %v16257_v55, %v11048_v5  ;;  %16258 = vst [vmem:[#allocation14_spill] sm:$0xff] %v13736_v36  ;;  %v16260_v14 = vcombine.low %v13455_v54, %v13449_v62  ;;  %v16261_v37 = vcombine.low %v13489_v17, %v13495_v2  ;;  %v5165_v29 = vpop.permute.xlu1 %5164  ;;  %v13761_v20 = vrot.slane %v5024_v8, %v11048_v5  ;;  %v16263_v62 = vld [vmem:[#allocation28_spill] sm:$0xff] }
 0x23b   : > { %v3763_v31 = vrot.slane %v16255_v61, %v11048_v5  ;;  %4027 = vrot.lane.b32.xlu0 %v3787_v22, %s10794_s11  ;;  %v13743_v48 = vrot.slane %v16259_v42, %v11048_v5  ;;  %v13758_v22 = vrot.slane %v4936_v0, %v11048_v5  ;;  %v6335_v61 = vrot.slane %v6328_v59, %v11048_v5  ;;  %v16264_v17 = vld [vmem:[#allocation76_spill] sm:$0xff]  ;;  %v16267_v59 = vld [vmem:[#allocation49_spill] sm:$0xff] }
 0x23c   : > { %v13749_v15 = vrot.slane %v16260_v14, %v11048_v5  ;;  %v13755_v47 = vrot.slane %v16261_v37, %v11048_v5  ;;  %v2743_v55 = vshrl.u32 %v16262_v58, 16  ;;  %v2748_v54 = vshll.u32 %v16263_v62, 16  ;;  %v13766_v42 = vpop.permute.xlu0 %5166  ;;  %5237 = vst.msk [vmem:[#allocation2 + $0xc] sm:$0xf] %vm5233_vm4, %v5165_v29 }
 0x23d   : > { %v2735_v14 = vshrl.u32 %v16264_v17, 16  ;;  %v2740_v37 = vshll.u32 %v16262_v58, 16  ;;  %v13772_v0 = vrot.slane %v1851_v30, %v11048_v5  ;;  %v1852_v8 = vcombine.low %v16234_v10, %v16265_v26  ;;  %5538 = vst.msk [vmem:[#allocation2 + $0xc] sm:$0xf] %vm5534_vm5, %v16266_v50  ;;  %5477 = vrot.lane.b32.xlu1 %v16267_v59, %s10793_s20 }
 0x23e   : > { %v16268_v29 = vcombine.low %v13495_v2, %v13504_v16  ;;  %v16269_v30 = vcombine.low %v13552_v34, %v13562_v41  ;;  %v2726_v10 = vshrl.u32 %v16265_v26, 16  ;;  %v2731_v43 = vshll.u32 %v13736_v36, 16 }
 0x23f   : > { %6811 = vrot.lane.b32.xlu0 %v6659_v33, %s10792_s19  ;;  %v16270_v50 = vcombine.low %v13562_v41, %v13568_v56  ;;  %v2718_v2 = vshrl.u32 %v16235_v4, 16  ;;  %v2723_v16 = vshll.u32 %v16265_v26, 16  ;;  %v13804_v34 = vrot.slane %v1852_v8, %v11048_v5 }
 0x240   : > { %v13784_v1 = vrot.slane %v16268_v29, %v11048_v5  ;;  %v13790_v39 = vrot.slane %v16269_v30, %v11048_v5  ;;  %v3457_v29 = vpop.permute.xlu1 %3456  ;;  %v16272_v30 = vcombine.low %v13568_v56, %v13572_v44  ;;  %v6336_v33 = vcombine.low %v6335_v61, %v13761_v20  ;;  %v3459_v26 = vpop.permute.xlu0 %3458  ;;  %v16274_v56 = vld [vmem:[#allocation93_spill] sm:$0xff]  ;;  %v16275_v44 = vld [vmem:[#allocation87_spill] sm:$0xff] }
 0x241   : > { %v13799_v59 = vrot.slane %v16270_v50, %v11048_v5  ;;  %16271 = vst [vmem:[#allocation53_spill] sm:$0xff] %v13804_v34  ;;  %v13815_v41 = vsel %vm11520_vm15, %v2743_v55, %v2748_v54  ;;  %v10227_v50 = vcombine.high %v16235_v4, %v16264_v17  ;;  %3527 = vst.msk [vmem:[#allocation2 + $0x14] sm:$0xf] %vm3521_vm1, %v3457_v29  ;;  %v16277_v55 = vld [vmem:[#allocation77_spill] sm:$0xff]  ;;  %v16279_v4 = vld [vmem:[#allocation48_spill] sm:$0xff]  ;;  %4025 = vrot.lane.b32.xlu1 %v3763_v31, %s10794_s11 }
 0x242   : > { %v13810_v12 = vrot.slane %v16272_v30, %v11048_v5  ;;  %16273 = vst [vmem:[#allocation10_spill] sm:$0xff] %v13815_v41  ;;  %v13822_v8 = vsel %vm11520_vm15, %v2735_v14, %v2740_v37  ;;  %v16276_v30 = vcombine.low %v16274_v56, %v16275_v44  ;;  %v1867_v61 = vcombine.low %v13772_v0, %v13804_v34  ;;  %v16278_v54 = vld [vmem:[#allocation13_spill] sm:$0xff]  ;;  %v16282_v44 = vld [vmem:[#allocation79_spill] sm:$0xff] }
 0x243   : > { %v3949_v45 = vcombine.low %v16278_v54, %v16277_v55  ;;  %3528 = vst.msk [vmem:[#allocation2 + $0x18] sm:$0xf] %vm3521_vm1, %v3459_v26  ;;  %v16280_v14 = vcombine.low %v13582_v13, %v13590_v25  ;;  %v13846_v29 = vsel %vm11520_vm15, %v2726_v10, %v2731_v43  ;;  %v13849_v56 = vrot.slane %v3305_v9, %v11048_v5  ;;  %v16283_v26 = vld [vmem:[#allocation65_spill] sm:$0xff] }
 0x244   : > { %v13828_v36 = vrot.slane %v16276_v30, %v11048_v5  ;;  %4084 = vst.msk [vmem:[#allocation2 + $0x14] sm:$0xf] %vm4078_vm2, %v16279_v4  ;;  %16281 = vst [vmem:[#allocation25_spill] sm:$0xff] %v13846_v29  ;;  %v4490_v30 = vcombine.low %v16283_v26, %v16282_v44  ;;  %v16284_v34 = vld [vmem:[#allocation41_spill] sm:$0xff]  ;;  %5174 = vrot.lane.b32.xlu0 %v4879_v53, %s10795_s12  ;;  %v13858_v13 = vsel %vm11520_vm15, %v2718_v2, %v2723_v16  ;;  %v6525_v31 = vpop.permute.xlu1 %6524 }
 0x245   : > { %v13842_v37 = vrot.slane %v16280_v14, %v11048_v5  ;;  %4085 = vst.msk [vmem:[#allocation2 + $0x18] sm:$0xf] %vm4078_vm2, %v16284_v34  ;;  %v5040_v4 = vcombine.low %v13846_v29, %v13815_v41  ;;  %v13863_v43 = vrot.slane %v1867_v61, %v11048_v5  ;;  %v13866_v9 = vrot.slane %v3949_v45, %v11048_v5  ;;  %v6495_v61 = vpop.permute.xlu0 %6494  ;;  %v16291_v41 = vld [vmem:[#allocation35_spill] sm:$0xff] }
 0x246   : > { %v16287_v10 = vcombine.low %v13590_v25, %v13593_v18  ;;  %v6344_v53 = vcombine.low %v13858_v13, %v13822_v8  ;;  %v13877_v2 = vrot.slane %v10227_v50, %v11048_v5  ;;  %v13880_v16 = vrot.slane %v4490_v30, %v11048_v5  ;;  %6585 = vst.msk [vmem:[#allocation2 + $0x3c] sm:$0xf] %vm6569_vm9, %v6525_v31  ;;  %v16294_v31 = vld [vmem:[#allocation59_spill] sm:$0xff] }
 0x247   : > { %16285 = vst [vmem:[#allocation74_spill] sm:$0xff] %v13863_v43  ;;  %16286 = vst [vmem:[#allocation42_spill] sm:$0xff] %v13866_v9  ;;  %v16289_v45 = vcombine.low %v13593_v18, %v13598_v27  ;;  %v13890_v14 = vrot.slane %v6336_v33, %v11048_v5  ;;  %v3296_v30 = vcombine.low %v16291_v41, %v13828_v36  ;;  %6512 = vrot.lane.b32.xlu1 %v13743_v48, %s10796_s13  ;;  %v16292_v18 = vld [vmem:[#allocation92_spill] sm:$0xff]  ;;  %v16295_v48 = vld [vmem:[#allocation26_spill] sm:$0xff] }
 0x248   : > { %v13872_v34 = vrot.slane %v16287_v10, %v11048_v5  ;;  %16288 = vst [vmem:[#allocation23_spill] sm:$0xff] %v13880_v16  ;;  %v16290_v10 = vld [vmem:[#allocation64_spill] sm:$0xff]  ;;  %2015 = vst.msk [vmem:[#allocation2 + $0x50] sm:$0xf] %vm1994_vm0, %v13863_v43  ;;  %v2783_v41 = vshrl.u32 %v16278_v54, 16  ;;  %3466 = vrot.lane.b32.xlu0 %v13732_v49, %s10797_s14  ;;  %v5193_v27 = vpop.permute.xlu1 %5192  ;;  %v13924_v43 = vrot.slane %v6344_v53, %v11048_v5  ;;  %v16298_v29 = vld [vmem:[#allocation63_spill] sm:$0xff] }
 0x249   : > { %v13887_v25 = vrot.slane %v16289_v45, %v11048_v5  ;;  %v4450_v50 = vcombine.low %v16290_v10, %v13772_v0  ;;  %6570 = vst.msk [vmem:[#allocation2] sm:$0xf] %vm6569_vm9, %v6495_v61  ;;  %v16293_v33 = vld [vmem:[#allocation84_spill] sm:$0xff]  ;;  %v2792_v10 = vshrl.u32 %v16283_v26, 16  ;;  %v2797_v0 = vshll.u32 %v16277_v55, 16  ;;  %v16299_v16 = vld [vmem:[#allocation67_spill] sm:$0xff]  ;;  %v5163_v46 = vpop.permute.xlu0 %5162 }
 0x24a   : > { %6886 = vst.msk [vmem:[#allocation2 + $0x3c] sm:$0xf] %vm6870_vm10, %v13498_v40  ;;  %v13909_v36 = vcombine.high %v16293_v33, %v16293_v33  ;;  %6871 = vst.msk [vmem:[#allocation2] sm:$0xf] %vm6870_vm10, %v16294_v31  ;;  %v13917_v40 = vrot.slane %v5040_v4, %v11048_v5  ;;  %v16296_v61 = vld [vmem:[#allocation44_spill] sm:$0xff]  ;;  %v2800_v7 = vshrl.u32 %v16277_v55, 16 }
 0x24b   : > { %5251 = vst.msk [vmem:[#allocation2 + $0x44] sm:$0xf] %vm5233_vm4, %v5193_v27  ;;  %v13933_v45 = vrot.slane %v4450_v50, %v11048_v5  ;;  %v2805_v35 = vshll.u32 %v16282_v44, 16  ;;  %v2808_v53 = vshrl.u32 %v16282_v44, 16  ;;  %5236 = vst.msk [vmem:[#allocation2 + $0x8] sm:$0xf] %vm5233_vm4, %v5163_v46  ;;  %5180 = vrot.lane.b32.xlu1 %v13755_v47, %s10795_s12  ;;  %v1875_v27 = vcombine.low %v16264_v17, %v16263_v62 }
 0x24c   : > { %v2788_v4 = vshll.u32 %v13909_v36, 16  ;;  %v16300_v31 = vld [vmem:[#allocation70_spill] sm:$0xff]  ;;  %v13951_v49 = vsel %vm11520_vm15, %v2792_v10, %v2797_v0  ;;  %v16302_v46 = vld [vmem:[#allocation51_spill] sm:$0xff]  ;;  %6514 = vrot.lane.b32.xlu0 %v13749_v15, %s10796_s13  ;;  %v2751_v47 = vshrl.u32 %v16263_v62, 16  ;;  %v1923_v0 = vcombine.low %v16277_v55, %v16301_v51  ;;  %v5919_v19 = vpop.permute.xlu1 %5918 }
 0x24d   : > { %5552 = vst.msk [vmem:[#allocation2 + $0x44] sm:$0xf] %vm5534_vm5, %v16300_v31  ;;  %5537 = vst.msk [vmem:[#allocation2 + $0x8] sm:$0xf] %vm5534_vm5, %v16302_v46  ;;  %v13961_v17 = vsel %vm11520_vm15, %v2800_v7, %v2805_v35  ;;  %v16304_v31 = vld [vmem:[#allocation62_spill] sm:$0xff]  ;;  %v16305_v10 = vld [vmem:[#allocation27_spill] sm:$0xff]  ;;  %v13972_v15 = vsel %vm11520_vm15, %v2808_v53, %v2813_v24  ;;  %v10238_v35 = vcombine.high %v16293_v33, %v16283_v26  ;;  %v3455_v55 = vpop.permute.xlu0 %3454 }
 0x24e   : > { %v13947_v50 = vsel %vm11520_vm15, %v2783_v41, %v2788_v4  ;;  %v16303_v41 = vld [vmem:[#allocation24_spill] sm:$0xff]  ;;  %5990 = vst.msk [vmem:[#allocation2 + $0x8] sm:$0xf] %vm5987_vm6, %v16305_v10  ;;  %v16306_v46 = vld [vmem:[#allocation15_spill] sm:$0xff]  ;;  %5991 = vst.msk [vmem:[#allocation2 + $0xc] sm:$0xf] %vm5987_vm6, %v5919_v19  ;;  %v13987_v53 = vrot.slane %v1923_v0, %v11048_v5 }
 0x24f   : > { %v1564_v4 = vcombine.low %v16304_v31, %v16303_v41  ;;  %v2756_v3 = vshll.u32 %v16306_v46, 16  ;;  %v6376_v7 = vcombine.low %v13947_v50, %v13961_v17  ;;  %6572 = vst.msk [vmem:[#allocation2 + $0x8] sm:$0xf] %vm6569_vm9, %v13707_v28  ;;  %v3328_v41 = vcombine.low %v13666_v11, %v13858_v13  ;;  %v16307_v10 = vld [vmem:[#allocation36_spill] sm:$0xff]  ;;  %3472 = vrot.lane.b32.xlu1 %v13784_v1, %s10797_s14  ;;  %v16309_v0 = vld [vmem:[#allocation17_spill] sm:$0xff] }
 0x250   : > { %v5072_v31 = vcombine.low %v13951_v49, %v13972_v15  ;;  %6873 = vst.msk [vmem:[#allocation2 + $0x8] sm:$0xf] %vm6870_vm10, %v16307_v10  ;;  %v6352_v11 = vcombine.low %v13924_v43, %v13917_v40  ;;  %v1876_v28 = vcombine.low %v16262_v58, %v16306_v46  ;;  %5182 = vrot.lane.b32.xlu0 %v13758_v22, %s10795_s12 }
 0x251   : > { %v1578_v24 = vrot.slane %v1564_v4, %v11048_v5  ;;  %3526 = vst.msk [vmem:[#allocation2 + $0x10] sm:$0xf] %vm3521_vm1, %v3455_v55  ;;  %v10634_v19 = vld [vmem:[#allocation2] sm:$0xff]   ;;  %v13999_v13 = vrot.slane %v6376_v7, %v11048_v5  ;;  %v14002_v4 = vrot.slane %v10238_v35, %v11048_v5  ;;  %v14009_v1 = vrot.slane %v3296_v30, %v11048_v5  ;;  %v16310_v55 = vld [vmem:[#allocation85_spill] sm:$0xff]  ;;  %v16312_v35 = vld [vmem:[#allocation80_spill] sm:$0xff]  ;;  %v6523_v10 = vpop.permute.xlu0 %6522 }
 0x252   : > { %4083 = vst.msk [vmem:[#allocation2 + $0x10] sm:$0xf] %vm4078_vm2, %v13509_v63  ;;  %v14012_v43 = vrot.slane %v1875_v27, %v11048_v5  ;;  %v14015_v58 = vrot.slane %v5072_v31, %v11048_v5  ;;  %10448 = vmatmul.mubr.msk.bf16.vlgmr.msra.gmra.mrb[16].mxu1 %vm7028_vm11, %v10634_v19  ;;  %v14021_v63 = vpop.permute.xlu1 %6801  ;;  %v16311_v22 = vcombine.low %v16292_v18, %v13849_v56 }
 0x253   : > { %v1579_v7 = vcombine.low %v16309_v0, %v1578_v24  ;;  %4656 = vst.msk [vmem:[#allocation2 + $0x10] sm:$0xf] %vm4651_vm3, %v16310_v55  ;;  %v14031_v27 = vsel %vm11520_vm15, %v2751_v47, %v2756_v3  ;;  %v3932_v31 = vcombine.low %v16263_v62, %v16312_v35  ;;  %v16313_v56 = vcombine.low %v16296_v61, %v16295_v48  ;;  %v16315_v0 = vld [vmem:[#allocation86_spill] sm:$0xff]  ;;  %v16323_v3 = vld [vmem:[#allocation81_spill] sm:$0xff] }
 0x254   : > { %16308 = vst [vmem:[#allocation90_spill] sm:$0xff] %v14012_v43  ;;  %v14027_v30 = vrot.slane %v16311_v22, %v11048_v5  ;;  %5238 = vst.msk [vmem:[#allocation2 + $0x10] sm:$0xf] %vm5233_vm4, %v13766_v42  ;;  %v14046_v19 = vrot.slane %v3328_v41, %v11048_v5  ;;  %v16314_v47 = vmov 0.0   ;;  %6508 = vrot.lane.b32.xlu1 %v13842_v37, %s10796_s13  ;;  %v14059_v42 = vrot.slane %v6352_v11, %v11048_v5  ;;  %v16322_v24 = vld [vmem:[#allocation78_spill] sm:$0xff] }
 0x255   : > { %v14043_v18 = vrot.slane %v16313_v56, %v11048_v5  ;;  %v1586_v62 = vrot.slane %v1579_v7, %v11048_v5  ;;  %10451 = vmatprep.mubr.msk.bf16.mxu1 %vm10799_vm8, %v16314_v47  ;;  %5539 = vst.msk [vmem:[#allocation2 + $0x10] sm:$0xf] %vm5534_vm5, %v16315_v0  ;;  %v16316_v48 = vcombine.low %v16297_v21, %v13877_v2  ;;  %v5191_v0 = vpop.permute.xlu0 %5190 }
 0x256   : > { %6584 = vst.msk [vmem:[#allocation2 + $0x38] sm:$0xf] %vm6569_vm9, %v6523_v10  ;;  %v16317_v41 = vcombine.low %v16299_v16, %v16298_v29  ;;  %v14074_v55 = vrot.slane %v1876_v28, %v11048_v5  ;;  %6510 = vrot.lane.b32.xlu0 %v13790_v39, %s10796_s13  ;;  %v4466_v37 = vcombine.low %v16297_v21, %v14012_v43  ;;  %v16318_v16 = vld [vmem:[#allocation43_spill] sm:$0xff]  ;;  %v16319_v28 = vld [vmem:[#allocation54_spill] sm:$0xff]  ;;  %v2767_v39 = vshrl.u32 %v16312_v35, 16 }
 0x257   : > { %v14065_v61 = vrot.slane %v16316_v48, %v11048_v5  ;;  %6885 = vst.msk [vmem:[#allocation2 + $0x38] sm:$0xf] %vm6870_vm10, %v13574_v23  ;;  %v3352_v11 = vcombine.low %v13822_v8, %v14031_v27  ;;  %v4474_v29 = vcombine.low %v16306_v46, %v16293_v33  ;;  %v16320_v22 = vcombine.low %v16318_v16, %v16319_v28  ;;  %v4587_v23 = vpop.permute.xlu1 %4586 }
 0x258   : > { %v14071_v7 = vrot.slane %v16317_v41, %v11048_v5  ;;  %2003 = vst.msk [vmem:[#allocation2 + $0x20] sm:$0xf] %vm1994_vm0, %v1586_v62  ;;  %v14092_v56 = vrot.slane %v3932_v31, %v11048_v5  ;;  %v2772_v21 = vshll.u32 %v16293_v33, 16  ;;  %v2816_v8 = vshrl.u32 %v16301_v51, 16  ;;  %v16321_v31 = vld [vmem:[#allocation61_spill] sm:$0xff]  ;;  %5176 = vrot.lane.b32.xlu1 %v13872_v34, %s10795_s12  ;;  %v16324_v62 = vld [vmem:[#allocation16_spill] sm:$0xff] }
 0x259   : > { %v1562_v10 = vrot.slane %v16320_v22, %v11048_v5  ;;  %4657 = vst.msk [vmem:[#allocation2 + $0x14] sm:$0xf] %vm4651_vm3, %v4587_v23  ;;  %v2759_v48 = vshrl.u32 %v16306_v46, 16  ;;  %v2764_v41 = vshll.u32 %v16312_v35, 16  ;;  %v2821_v16 = vshll.u32 %v16321_v31, 16 }
 0x25a   : > { %5250 = vst.msk [vmem:[#allocation2 + $0x40] sm:$0xf] %vm5233_vm4, %v5191_v0  ;;  %v2775_v28 = vshrl.u32 %v16293_v33, 16  ;;  %v2780_v22 = vshll.u32 %v16278_v54, 16  ;;  %v1924_v23 = vcombine.low %v16282_v44, %v16321_v31  ;;  %v3972_v46 = vcombine.low %v16301_v51, %v16322_v24  ;;  %5178 = vrot.lane.b32.xlu0 %v13799_v59, %s10795_s12 }
 0x25b   : > { %2002 = vst.msk [vmem:[#allocation2 + $0x1c] sm:$0xf] %vm1994_vm0, %v1562_v10  ;;  %v14120_v34 = vrot.slane %v4474_v29, %v11048_v5  ;;  %v2823_v0 = vsel %vm11520_vm15, %v2816_v8, %v2821_v16  ;;  %v4506_v44 = vcombine.low %v16321_v31, %v16323_v3  ;;  %v14128_v51 = vpop.permute.xlu1 %5922  ;;  %v14141_v8 = vpop.permute.xlu0 %5924  ;;  %v14144_v16 = vrot.slane %v4466_v37, %v11048_v5 }
 0x25c   : > { %5551 = vst.msk [vmem:[#allocation2 + $0x40] sm:$0xf] %vm5534_vm5, %v13668_v6  ;;  %16325 = vst [vmem:[#allocation88_spill] sm:$0xff] %v14128_v51  ;;  %v14132_v6 = vsel %vm11520_vm15, %v2767_v39, %v2772_v21  ;;  %v3400_v59 = vcombine.low %v13961_v17, %v2823_v0  ;;  %v14136_v29 = vrot.slane %v1924_v23, %v11048_v5  ;;  %3468 = vrot.lane.b32.xlu1 %v13887_v25, %s10797_s14 }
 0x25d   : > { %6004 = vst.msk [vmem:[#allocation2 + $0x40] sm:$0xf] %vm5987_vm6, %v16324_v62  ;;  %v14139_v10 = vrot.slane %v3972_v46, %v11048_v5  ;;  %v14148_v62 = vsel %vm11520_vm15, %v2759_v48, %v2764_v41  ;;  %v14151_v39 = vrot.slane %v4506_v44, %v11048_v5  ;;  %v14155_v17 = vcombine.high %v13678_v57, %v13678_v57 }
 0x25e   : > { %16326 = vst [vmem:[#allocation66_spill] sm:$0xff] %v14136_v29  ;;  %v14161_v21 = vsel %vm11520_vm15, %v2775_v28, %v2780_v22  ;;  %v14164_v37 = vrot.slane %v3400_v59, %v11048_v5  ;;  %v1939_v48 = vcombine.low %v13987_v53, %v14136_v29  ;;  %v14170_v41 = vcombine.high %v16322_v24, %v16322_v24 }
 0x25f   : > { %16327 = vst [vmem:[#allocation38_spill] sm:$0xff] %v14151_v39  ;;  %3470 = vrot.lane.b32.xlu0 %v13810_v12, %s10797_s14  ;;  %v14175_v23 = vrot.slane %v3352_v11, %v11048_v5  ;;  %v3376_v28 = vcombine.low %v14132_v6, %v13947_v50  ;;  %v5947_v46 = vpop.permute.xlu1 %5946  ;;  %v2824_v12 = vshrl.u32 %v16321_v31, 16  ;;  %v2829_v11 = vshll.u32 %v16322_v24, 16  ;;  %v14190_v26 = vpop.permute.xlu0 %6807 }
 0x260   : > { %16328 = vst [vmem:[#allocation46_spill] sm:$0xff] %v14170_v41  ;;  %v14186_v59 = vrot.slane %v1939_v48, %v11048_v5  ;;  %16330 = vst [vmem:[#allocation82_spill] sm:$0xff] %v14190_v26  ;;  %v4530_v22 = vcombine.low %v13678_v57, %v14155_v17  ;;  %v2832_v25 = vshrl.u32 %v16322_v24, 16  ;;  %v2837_v44 = vshll.u32 %v16323_v3, 16  ;;  %6528 = vrot.lane.b32.xlu1 %v14059_v42, %s10796_s13 }
 0x261   : > { %6005 = vst.msk [vmem:[#allocation2 + $0x44] sm:$0xf] %vm5987_vm6, %v5947_v46  ;;  %v3948_v31 = vcombine.low %v16293_v33, %v13909_v36  ;;  %v2831_v48 = vsel %vm11520_vm15, %v2824_v12, %v2829_v11  ;;  %v2840_v46 = vshrl.u32 %v16323_v3, 16  ;;  %v2845_v50 = vshll.u32 %v14170_v41, 16 }
 0x262   : > { %16329 = vst [vmem:[#allocation72_spill] sm:$0xff] %v14186_v59  ;;  %2018 = vst.msk [vmem:[#allocation2 + $0x5c] sm:$0xf] %vm1994_vm0, %v14186_v59  ;;  %v14212_v51 = vrot.slane %v3376_v28, %v11048_v5  ;;  %v14216_v42 = vsel %vm11520_vm15, %v2832_v25, %v2837_v44  ;;  %v4685_v36 = vshll.u32 %v13678_v57, 16  ;;  %v4688_v59 = vshrl.u32 %v13678_v57, 16 }
 0x263   : > { %6526 = vrot.lane.b32.xlu0 %v13890_v14, %s10796_s13  ;;  %16331 = vst [vmem:[#allocation28_spill] sm:$0xff] %v14216_v42  ;;  %v14220_v33 = vpop.permute.xlu1 %6805  ;;  %v14224_v12 = vsel %vm11520_vm15, %v2840_v46, %v2845_v50  ;;  %v6392_v11 = vcombine.low %v2823_v0, %v14216_v42  ;;  %v4693_v14 = vshll.u32 %v13689_v60, 16  ;;  %v4696_v28 = vshrl.u32 %v13689_v60, 16  ;;  %v5921_v47 = vpop.permute.xlu0 %5920 }
 0x264   : > { %16332 = vst [vmem:[#allocation76_spill] sm:$0xff] %v14220_v33  ;;  %16333 = vst [vmem:[#allocation31_spill] sm:$0xff] %v14224_v12  ;;  %v14230_v25 = vrot.slane %v4530_v22, %v11048_v5  ;;  %v5088_v44 = vcombine.low %v2831_v48, %v14224_v12  ;;  %v4701_v43 = vshll.u32 %v14155_v17, 16  ;;  %v4704_v33 = vshrl.u32 %v14155_v17, 16  ;;  %6829 = vrot.lane.b32.xlu1 %v14065_v61, %s10792_s19 }
 0x265   : > { %5992 = vst.msk [vmem:[#allocation2 + $0x10] sm:$0xf] %vm5987_vm6, %v5921_v47  ;;  %v14239_v0 = vrot.slane %v6392_v11, %v11048_v5  ;;  %v16335_v50 = vshrl.u32 %v13650_v38, 16  ;;  %v4695_v46 = vsel %vm11520_vm15, %v4688_v59, %v4693_v14  ;;  %v4709_v12 = vshll.u32 %v13654_v52, 16 }
 0x266   : > { %v14251_v47 = vrot.slane %v5088_v44, %v11048_v5  ;;  %v14255_v61 = vsel %vm11520_vm15, %v4696_v28, %v4701_v43  ;;  %v4531_v11 = vcombine.low %v13689_v60, %v13654_v52  ;;  %v14264_v59 = vrot.slane %v3948_v31, %v11048_v5 }
 0x267   : > { %16334 = vst [vmem:[#allocation40_spill] sm:$0xff] %v14239_v0  ;;  %v4687_v22 = vsel %vm11520_vm15, %v16335_v50, %v4685_v36  ;;  %6827 = vrot.lane.b32.xlu0 %v13933_v45, %s10792_s19  ;;  %v3377_v36 = vcombine.low %v14161_v21, %v13951_v49  ;;  %v14261_v50 = vpop.permute.xlu1 %4590  ;;  %v4711_v14 = vsel %vm11520_vm15, %v4704_v33, %v4709_v12  ;;  %v14270_v43 = vpop.permute.xlu0 %6803 }
 0x268   : > { %16336 = vst [vmem:[#allocation49_spill] sm:$0xff] %v14251_v47  ;;  %16337 = vst [vmem:[#allocation93_spill] sm:$0xff] %v14261_v50  ;;  %v6408_v44 = vcombine.low %v4687_v22, %v14255_v61  ;;  %v3401_v26 = vcombine.low %v13972_v15, %v2831_v48  ;;  %v5112_v60 = vcombine.low %v4695_v46, %v4711_v14  ;;  %3484 = vrot.lane.b32.xlu1 %v14027_v30, %s10797_s14 }
 0x269   : > { %v14275_v49 = vrot.slane %v4531_v11, %v11048_v5  ;;  %v14278_v50 = vrot.slane %v3377_v36, %v11048_v5  ;;  %v6360_v33 = vcombine.low %v14031_v27, %v14132_v6  ;;  %v5404_v30 = vcombine.low %v16322_v24, %v14170_v41  ;;  %v16349_v27 = vld [vmem:[#allocation19_spill] sm:$0xff] }
 0x26a   : > { %v14285_v15 = vrot.slane %v6408_v44, %v11048_v5  ;;  %v14288_v31 = vrot.slane %v3401_v26, %v11048_v5  ;;  %v14295_v12 = vrot.slane %v5112_v60, %v11048_v5  ;;  %v16343_v46 = vcombine.low %v13761_v20, %v14046_v19 }
 0x26b   : > { %16338 = vst [vmem:[#allocation87_spill] sm:$0xff] %v14275_v49  ;;  %16339 = vst [vmem:[#allocation77_spill] sm:$0xff] %v14278_v50  ;;  %3482 = vrot.lane.b32.xlu0 %v14009_v1, %s10797_s14  ;;  %v14303_v26 = vpop.permute.xlu1 %5473  ;;  %v16344_v60 = vcombine.low %v13877_v2, %v14074_v55  ;;  %v4589_v44 = vpop.permute.xlu0 %4588  ;;  %v5048_v48 = vcombine.low %v13917_v40, %v14175_v23  ;;  %v16345_v20 = vcombine.low %v14092_v56, %v14120_v34 }
 0x26c   : > { %16340 = vst [vmem:[#allocation13_spill] sm:$0xff] %v14285_v15  ;;  %16341 = vst [vmem:[#allocation48_spill] sm:$0xff] %v14288_v31  ;;  %v5039_v11 = vrot.slane %v16343_v46, %v11048_v5  ;;  %4041 = vrot.lane.b32.xlu1 %v14071_v7, %s10794_s11  ;;  %v16346_v40 = vcombine.low %v14148_v62, %v14161_v21  ;;  %v5089_v6 = vcombine.low %v14216_v42, %v4687_v22  ;;  %v16372_v15 = vld [vmem:[#allocation74_spill] sm:$0xff] }
 0x26d   : > { %16342 = vst [vmem:[#allocation79_spill] sm:$0xff] %v14295_v12  ;;  %v14313_v1 = vrot.slane %v16344_v60, %v11048_v5  ;;  %v14325_v46 = vrot.slane %v16345_v20, %v11048_v5  ;;  %v4507_v60 = vcombine.low %v16322_v24, %v13650_v38  ;;  %4658 = vst.msk [vmem:[#allocation2 + $0x18] sm:$0xf] %vm4651_vm3, %v4589_v44  ;;  %v4712_v36 = vshrl.u32 %v13654_v52, 16 }
 0x26e   : > { %v14338_v14 = vrot.slane %v16346_v40, %v11048_v5  ;;  %v14341_v20 = vrot.slane %v6360_v33, %v11048_v5  ;;  %v14348_v44 = vrot.slane %v5404_v30, %v11048_v5  ;;  %v4717_v21 = vshll.u32 %v16349_v27, 16  ;;  %v16352_v30 = vld [vmem:[#allocation12_spill] sm:$0xff] }
 0x26f   : > { %4039 = vrot.lane.b32.xlu0 %v14043_v18, %s10794_s11  ;;  %v14351_v7 = vrot.slane %v4507_v60, %v11048_v5  ;;  %v5405_v40 = vcombine.low %v16323_v3, %v13678_v57  ;;  %v14356_v33 = vpop.permute.xlu1 %4021  ;;  %v14359_v22 = vrot.slane %v5089_v6, %v11048_v5  ;;  %v5428_v28 = vcombine.low %v14155_v17, %v16349_v27  ;;  %v16351_v18 = vld [vmem:[#allocation34_spill] sm:$0xff]  ;;  %v16354_v60 = vld [vmem:[#allocation37_spill] sm:$0xff]  ;;  %v14369_v29 = vpop.permute.xlu0 %5471  ;;  %v16356_v17 = vld [vmem:[#allocation39_spill] sm:$0xff] }
 0x270   : > { %16347 = vst [vmem:[#allocation41_spill] sm:$0xff] %v14348_v44  ;;  %v16353_v2 = vcombine.low %v16351_v18, %v16352_v30  ;;  %v5842_v41 = vcombine.low %v13654_v52, %v16354_v60  ;;  %v4719_v6 = vsel %vm11520_vm15, %v4712_v36, %v4717_v21  ;;  %v5843_v31 = vcombine.low %v16349_v27, %v16356_v17 }
 0x271   : > { %16348 = vst [vmem:[#allocation64_spill] sm:$0xff] %v14351_v7  ;;  %16350 = vst [vmem:[#allocation35_spill] sm:$0xff] %v14359_v22  ;;  %v14376_v50 = vrot.slane %v5405_v40, %v11048_v5  ;;  %4614 = vrot.lane.b32.xlu1 %v14144_v16, %s10791_s18  ;;  %v14386_v18 = vrot.slane %v5428_v28, %v11048_v5  ;;  %v1899_v21 = vcombine.low %v16312_v35, %v16278_v54  ;;  %v16363_v35 = vld [vmem:[#allocation47_spill] sm:$0xff] }
 0x272   : > { %v1634_v42 = vrot.slane %v16353_v2, %v11048_v5  ;;  %v5113_v2 = vcombine.low %v14255_v61, %v4719_v6  ;;  %v14390_v36 = vrot.slane %v5842_v41, %v11048_v5  ;;  %v14399_v40 = vrot.slane %v5843_v31, %v11048_v5  ;;  %v16360_v61 = vld [vmem:[#allocation32_spill] sm:$0xff]  ;;  %v16364_v31 = vld [vmem:[#allocation23_spill] sm:$0xff] }
 0x273   : > { %16355 = vst [vmem:[#allocation92_spill] sm:$0xff] %v14376_v50  ;;  %16357 = vst [vmem:[#allocation59_spill] sm:$0xff] %v14386_v18  ;;  %4612 = vrot.lane.b32.xlu0 %v13933_v45, %s10791_s18  ;;  %v14403_v28 = vcombine.high %v16360_v61, %v16360_v61  ;;  %v5055_v41 = vrot.slane %v5048_v48, %v11048_v5  ;;  %v16362_v45 = vld [vmem:[#allocation57_spill] sm:$0xff]  ;;  %v14415_v52 = vpop.permute.xlu0 %4019  ;;  %v16365_v57 = vcombine.low %v13866_v9, %v16364_v31 }
 0x274   : > { %2005 = vst.msk [vmem:[#allocation2 + $0x28] sm:$0xf] %vm1994_vm0, %v1634_v42  ;;  %16358 = vst [vmem:[#allocation26_spill] sm:$0xff] %v14390_v36  ;;  %v14405_v42 = vpop.permute.xlu1 %5469  ;;  %v14409_v30 = vrot.slane %v5113_v2, %v11048_v5  ;;  %v5867_v16 = vcombine.low %v16363_v35, %v16362_v45  ;;  %v14427_v2 = vcombine.high %v16349_v27, %v16349_v27  ;;  %v4720_v22 = vshrl.u32 %v16349_v27, 16  ;;  %v16367_v18 = vld [vmem:[#allocation25_spill] sm:$0xff] }
 0x275   : > { %16359 = vst [vmem:[#allocation44_spill] sm:$0xff] %v14399_v40  ;;  %v5817_v50 = vrot.slane %v16365_v57, %v11048_v5  ;;  %v5866_v48 = vcombine.low %v16360_v61, %v14403_v28  ;;  %5196 = vrot.lane.b32.xlu1 %v5055_v41, %s10795_s12  ;;  %v6368_v54 = vcombine.low %v14341_v20, %v14338_v14  ;;  %v4725_v41 = vshll.u32 %v16354_v60, 16 }
 0x276   : > { %16361 = vst [vmem:[#allocation45_spill] sm:$0xff] %v14409_v30  ;;  %v14435_v57 = vrot.slane %v5867_v16, %v11048_v5  ;;  %v14440_v40 = vrot.slane %v1899_v21, %v11048_v5  ;;  %v4728_v20 = vshrl.u32 %v16354_v60, 16  ;;  %v16368_v30 = vld [vmem:[#allocation20_spill] sm:$0xff]  ;;  %v4733_v9 = vshll.u32 %v14427_v2, 16 }
 0x277   : > { %5194 = vrot.lane.b32.xlu0 %v5039_v11, %s10795_s12  ;;  %v14443_v36 = vrot.slane %v5866_v48, %v11048_v5  ;;  %v3329_v16 = vcombine.low %v16368_v30, %v16367_v18  ;;  %v6021_v49 = vshll.u32 %v16360_v61, 16  ;;  %v6024_v11 = vshrl.u32 %v16360_v61, 16  ;;  %v6507_v21 = vpop.permute.xlu0 %6506 }
 0x278   : > { %v14447_v7 = vpop.permute.xlu1 %4017  ;;  %v14458_v44 = vsel %vm11520_vm15, %v4720_v22, %v4725_v41  ;;  %v6037_v47 = vshll.u32 %v14403_v28, 16  ;;  %v6040_v0 = vshrl.u32 %v14403_v28, 16  ;;  %v14466_v18 = vsel %vm11520_vm15, %v4728_v20, %v4733_v9  ;;  %v16371_v41 = vld [vmem:[#allocation18_spill] sm:$0xff] }
 0x279   : > { %16366 = vst [vmem:[#allocation63_spill] sm:$0xff] %v14443_v36  ;;  %5497 = vrot.lane.b32.xlu1 %v14313_v1, %s10793_s20  ;;  %v16369_v30 = vshrl.u32 %v16356_v17, 16  ;;  %v16370_v36 = vshll.u32 %v16363_v35, 16  ;;  %v6053_v12 = vshll.u32 %v16371_v41, 16  ;;  %v16373_v1 = vld [vmem:[#allocation10_spill] sm:$0xff]  ;;  %v6424_v9 = vcombine.low %v4719_v6, %v14466_v18 }
 0x27a   : > { %v3353_v39 = vcombine.low %v16373_v1, %v14148_v62  ;;  %v16374_v20 = vshrl.u32 %v16363_v35, 16  ;;  %v6740_v6 = vcombine.low %v16349_v27, %v14427_v2  ;;  %v6741_v35 = vcombine.low %v16354_v60, %v16360_v61 }
 0x27b   : > { %v6023_v48 = vsel %vm11520_vm15, %v16369_v30, %v6021_v49  ;;  %v6031_v22 = vsel %vm11520_vm15, %v6024_v11, %v16370_v36  ;;  %5495 = vrot.lane.b32.xlu0 %v16372_v15, %s10793_s20  ;;  %v16375_v36 = vshll.u32 %v16362_v45, 16  ;;  %v16376_v15 = vshrl.u32 %v16362_v45, 16 }
 0x27c   : > { %v6425_v17 = vcombine.low %v14458_v44, %v6023_v48  ;;  %v6039_v49 = vsel %vm11520_vm15, %v16374_v20, %v6037_v47  ;;  %v6501_v30 = vpop.permute.xlu1 %6500  ;;  %v6503_v48 = vpop.permute.xlu0 %6502  ;;  %v14501_v47 = vrot.slane %v6424_v9, %v11048_v5  ;;  %v14514_v61 = vrot.slane %v6741_v35, %v11048_v5 }
 0x27d   : > { %v6047_v11 = vsel %vm11520_vm15, %v6040_v0, %v16375_v36  ;;  %v6055_v62 = vsel %vm11520_vm15, %v16376_v15, %v6053_v12  ;;  %6573 = vst.msk [vmem:[#allocation2 + $0xc] sm:$0xf] %vm6569_vm9, %v6501_v30  ;;  %6574 = vst.msk [vmem:[#allocation2 + $0x10] sm:$0xf] %vm6569_vm9, %v6503_v48  ;;  %5950 = vrot.lane.b32.xlu1 %v5817_v50, %s10790_s16  ;;  %v14511_v12 = vrot.slane %v6740_v6, %v11048_v5  ;;  %v16379_v6 = vld [vmem:[#allocation29_spill] sm:$0xff] }
 0x27e   : > { %v14504_v1 = vrot.slane %v6425_v17, %v11048_v5  ;;  %v6448_v0 = vcombine.low %v6031_v22, %v6047_v11  ;;  %v6449_v20 = vcombine.low %v6039_v49, %v6055_v62  ;;  %6874 = vst.msk [vmem:[#allocation2 + $0xc] sm:$0xf] %vm6870_vm10, %v14021_v63  ;;  %v6764_v9 = vcombine.low %v14403_v28, %v16371_v41  ;;  %v16378_v62 = vld [vmem:[#allocation14_spill] sm:$0xff] }
 0x27f   : > { %6875 = vst.msk [vmem:[#allocation2 + $0x10] sm:$0xf] %vm6870_vm10, %v14270_v43  ;;  %5948 = vrot.lane.b32.xlu0 %v14325_v46, %s10790_s16  ;;  %v6375_v22 = vrot.slane %v6368_v54, %v11048_v5  ;;  %v16377_v43 = vcombine.low %v13999_v13, %v14015_v58  ;;  %v3367_v46 = vrot.slane %v3353_v39, %v11048_v5 }
 0x280   : > { %v6440_v63 = vcombine.low %v14501_v47, %v14504_v1  ;;  %v14526_v50 = vrot.slane %v6448_v0, %v11048_v5  ;;  %v14529_v17 = vrot.slane %v6449_v20, %v11048_v5  ;;  %v14531_v49 = vpop.permute.xlu1 %5172  ;;  %v14541_v30 = vrot.slane %v6764_v9, %v11048_v5  ;;  %v5171_v36 = vpop.permute.xlu0 %5170 }
 0x281   : > { %v6391_v28 = vrot.slane %v16377_v43, %v11048_v5  ;;  %v4482_v11 = vcombine.low %v14120_v34, %v14440_v40  ;;  %v3343_v15 = vrot.slane %v3329_v16, %v11048_v5  ;;  %v3916_v35 = vcombine.low %v16379_v6, %v16378_v62  ;;  %5240 = vst.msk [vmem:[#allocation2 + $0x18] sm:$0xf] %vm5233_vm4, %v5171_v36  ;;  %v16386_v6 = vld [vmem:[#allocation50_spill] sm:$0xff] }
 0x282   : > { %v6464_v13 = vcombine.low %v14526_v50, %v14529_v17  ;;  %5541 = vst.msk [vmem:[#allocation2 + $0x18] sm:$0xf] %vm5534_vm5, %v14369_v29  ;;  %v16380_v34 = vcombine.low %v14002_v4, %v13987_v53  ;;  %v3368_v0 = vcombine.low %v14175_v23, %v3367_v46  ;;  %v1953_v20 = vrot.slane %v16322_v24, %v11048_v5  ;;  %v16381_v29 = vld [vmem:[#allocation75_spill] sm:$0xff]  ;;  %v16383_v24 = vld [vmem:[#allocation82_spill] sm:$0xff] }
 0x283   : > { %6532 = vrot.lane.b32.xlu1 %v6391_v28, %s10796_s13  ;;  %6530 = vrot.lane.b32.xlu0 %v6375_v22, %s10796_s13  ;;  %5994 = vst.msk [vmem:[#allocation2 + $0x18] sm:$0xf] %vm5987_vm6, %v14141_v8  ;;  %v14568_v9 = vrot.slane %v16323_v3, %v11048_v5  ;;  %v16382_v22 = vld [vmem:[#allocation71_spill] sm:$0xff]  ;;  %v4489_v8 = vrot.slane %v4482_v11, %v11048_v5 }
 0x284   : > { %v6731_v16 = vrot.slane %v16380_v34, %v11048_v5  ;;  %v3465_v48 = vpop.permute.xlu1 %3464  ;;  %v1660_v43 = vcombine.low %v16382_v22, %v16381_v29  ;;  %6576 = vst.msk [vmem:[#allocation2 + $0x18] sm:$0xf] %vm6569_vm9, %v6507_v21  ;;  %v3463_v4 = vpop.permute.xlu0 %3462  ;;  %v3344_v23 = vcombine.low %v14046_v19, %v3343_v15  ;;  %v3923_v46 = vrot.slane %v3916_v35, %v11048_v5  ;;  %v16384_v21 = vld [vmem:[#allocation90_spill] sm:$0xff]  ;;  %v16390_v29 = vld [vmem:[#allocation88_spill] sm:$0xff] }
 0x285   : > { %3531 = vst.msk [vmem:[#allocation2 + $0x24] sm:$0xf] %vm3521_vm1, %v3465_v48  ;;  %v10635_v28 = vld [vmem:[#allocation2 + $0x8] sm:$0xff]   ;;  %3530 = vst.msk [vmem:[#allocation2 + $0x20] sm:$0xf] %vm3521_vm1, %v3463_v4  ;;  %v1891_v36 = vcombine.low %v16384_v21, %v14074_v55  ;;  %v3940_v19 = vcombine.low %v14074_v55, %v14092_v56  ;;  %v16385_v15 = vmov 0.0   ;;  %v1961_v62 = vcombine.low %v1953_v20, %v14568_v9 }
 0x286   : > { %6877 = vst.msk [vmem:[#allocation2 + $0x18] sm:$0xf] %vm6870_vm10, %v16383_v24  ;;  %v1674_v3 = vrot.slane %v1660_v43, %v11048_v5  ;;  %10452 = vmatmul.mubr.msk.bf16.gmra.mrb[20].mxu1 %vm7028_vm11, %v10635_v28  ;;  %v16388_v56 = vld [vmem:[#allocation60_spill] sm:$0xff]  ;;  %v16391_v4 = vld [vmem:[#allocation65_spill] sm:$0xff]  ;;  %v5608_v17 = vcombine.high %v16362_v45, %v16362_v45 }
 0x287   : > { %4088 = vst.msk [vmem:[#allocation2 + $0x24] sm:$0xf] %vm4078_vm2, %v14356_v33  ;;  %6833 = vrot.lane.b32.xlu1 %v6731_v16, %s10792_s19  ;;  %4087 = vst.msk [vmem:[#allocation2 + $0x20] sm:$0xf] %vm4078_vm2, %v14415_v52  ;;  %6831 = vrot.lane.b32.xlu0 %v4489_v8, %s10792_s19  ;;  %v3375_v33 = vrot.slane %v3368_v0, %v11048_v5  ;;  %v3351_v52 = vrot.slane %v3344_v23, %v11048_v5  ;;  %v16387_v16 = vld [vmem:[#allocation53_spill] sm:$0xff]  ;;  %v16392_v28 = vld [vmem:[#allocation84_spill] sm:$0xff] }
 0x288   : > { %v5169_v11 = vpop.permute.xlu1 %5168  ;;  %10455 = vmatprep.mubr.msk.bf16.mxu1 %vm10799_vm8, %v16385_v15  ;;  %v1675_v35 = vcombine.low %v16386_v6, %v1674_v3  ;;  %v4593_v34 = vpop.permute.xlu0 %4592  ;;  %v3924_v48 = vcombine.low %v16387_v16, %v3923_v46  ;;  %v16389_v0 = vld [vmem:[#allocation21_spill] sm:$0xff]  ;;  %v3947_v22 = vrot.slane %v3940_v19, %v11048_v5  ;;  %v1898_v43 = vrot.slane %v1891_v36, %v11048_v5  ;;  %v10695_v50 = vld.sshfl [vmem:[%s10927_s24 + $0x8] sm:$0x33 pattern:$0x75316420] }
 0x289   : > { %5239 = vst.msk [vmem:[#allocation2 + $0x14] sm:$0xf] %vm5233_vm4, %v5169_v11  ;;  %v1828_v20 = vcombine.low %v16389_v0, %v16388_v56  ;;  %v1900_v23 = vcombine.low %v16392_v28, %v16391_v4  ;;  %v4498_v46 = vcombine.low %v16364_v31, %v13987_v53  ;;  %v1968_v3 = vrot.slane %v1961_v62, %v11048_v5  ;;  %v16393_v11 = vld [vmem:[#allocation76_spill] sm:$0xff]  ;;  %v16394_v53 = vld [vmem:[#allocation22_spill] sm:$0xff]  ;;  %v16396_v56 = vld [vmem:[#allocation93_spill] sm:$0xff] }
 0x28a   : > { %4660 = vst.msk [vmem:[#allocation2 + $0x20] sm:$0xf] %vm4651_vm3, %v4593_v34  ;;  %v1682_v55 = vrot.slane %v1675_v35, %v11048_v5  ;;  %v3931_v36 = vrot.slane %v3924_v48, %v11048_v5  ;;  %v16395_v35 = vld [vmem:[#allocation52_spill] sm:$0xff]  ;;  %v5064_v48 = vcombine.low %v14338_v14, %v14212_v51  ;;  %v16397_v14 = vcombine.low %v14015_v58, %v14164_v37 }
 0x28b   : > { %5540 = vst.msk [vmem:[#allocation2 + $0x14] sm:$0xf] %vm5534_vm5, %v14405_v42  ;;  %3488 = vrot.lane.b32.xlu1 %v3375_v33, %s10797_s14  ;;  %3486 = vrot.lane.b32.xlu0 %v3351_v52, %s10797_s14  ;;  %v1842_v24 = vrot.slane %v1828_v20, %v11048_v5  ;;  %v1914_v19 = vrot.slane %v1900_v23, %v11048_v5  ;;  %v16398_v4 = vld [vmem:[#allocation72_spill] sm:$0xff] }
 0x28c   : > { %5993 = vst.msk [vmem:[#allocation2 + $0x14] sm:$0xf] %vm5987_vm6, %v16390_v29  ;;  %v6505_v42 = vpop.permute.xlu1 %6504  ;;  %v14619_v21 = vpop.permute.xlu0 %5932  ;;  %v4505_v6 = vrot.slane %v4498_v46, %v11048_v5  ;;  %v5826_v34 = vcombine.low %v13650_v38, %v16395_v35 }
 0x28d   : > { %2007 = vst.msk [vmem:[#allocation2 + $0x30] sm:$0xf] %vm1994_vm0, %v1682_v55  ;;  %2016 = vst.msk [vmem:[#allocation2 + $0x54] sm:$0xf] %vm1994_vm0, %v1898_v43  ;;  %v1843_v31 = vcombine.low %v16394_v53, %v1842_v24  ;;  %v1915_v33 = vcombine.low %v14440_v40, %v1914_v19  ;;  %v16402_v19 = vld [vmem:[#allocation79_spill] sm:$0xff] }
 0x28e   : > { %6575 = vst.msk [vmem:[#allocation2 + $0x14] sm:$0xf] %vm6569_vm9, %v6505_v42  ;;  %v5833_v0 = vrot.slane %v5826_v34, %v11048_v5  ;;  %v16399_v42 = vld [vmem:[#allocation38_spill] sm:$0xff]  ;;  %v16407_v34 = vld [vmem:[#allocation41_spill] sm:$0xff] }
 0x28f   : > { %6876 = vst.msk [vmem:[#allocation2 + $0x14] sm:$0xf] %vm6870_vm10, %v16393_v11  ;;  %4045 = vrot.lane.b32.xlu1 %v3947_v22, %s10794_s11  ;;  %4043 = vrot.lane.b32.xlu0 %v3931_v36, %s10794_s11  ;;  %v1850_v52 = vrot.slane %v1843_v31, %v11048_v5  ;;  %v1922_v55 = vrot.slane %v1915_v33, %v11048_v5  ;;  %v16401_v36 = vld [vmem:[#allocation13_spill] sm:$0xff]  ;;  %v16404_v33 = vld [vmem:[#allocation40_spill] sm:$0xff] }
 0x290   : > { %2020 = vst.msk [vmem:[#allocation2 + $0x60] sm:$0x3] %vm2019_vm12, %v1968_v3  ;;  %v3461_v62 = vpop.permute.xlu1 %3460  ;;  %v14636_v16 = vpop.permute.xlu0 %6815  ;;  %v5834_v22 = vcombine.low %v5833_v0, %v14230_v25  ;;  %v16400_v46 = vcombine.low %v14139_v10, %v16399_v42  ;;  %v16403_v11 = vcombine.low %v16401_v36, %v16402_v19 }
 0x291   : > { %3529 = vst.msk [vmem:[#allocation2 + $0x1c] sm:$0xf] %vm3521_vm1, %v3461_v62  ;;  %v16405_v62 = vld [vmem:[#allocation49_spill] sm:$0xff] }
 0x292   : > { %4086 = vst.msk [vmem:[#allocation2 + $0x1c] sm:$0xf] %vm4078_vm2, %v14447_v7  ;;  %v5087_v7 = vrot.slane %v16397_v14, %v11048_v5  ;;  %v5841_v28 = vrot.slane %v5834_v22, %v11048_v5  ;;  %v5825_v24 = vrot.slane %v16400_v46, %v11048_v5  ;;  %v6423_v53 = vrot.slane %v16403_v11, %v11048_v5 }
 0x293   : > { %4618 = vrot.lane.b32.xlu1 %v4505_v6, %s10791_s18  ;;  %2014 = vst.msk [vmem:[#allocation2 + $0x4c] sm:$0xf] %vm1994_vm0, %v1850_v52  ;;  %4616 = vrot.lane.b32.xlu0 %v4489_v8, %s10791_s18  ;;  %2017 = vst.msk [vmem:[#allocation2 + $0x58] sm:$0xf] %vm1994_vm0, %v1922_v55  ;;  %v5071_v8 = vrot.slane %v5064_v48, %v11048_v5  ;;  %v16406_v6 = vcombine.low %v16404_v33, %v16405_v62  ;;  %v16408_v55 = vld [vmem:[#allocation87_spill] sm:$0xff] }
 0x294   : > { %4659 = vst.msk [vmem:[#allocation2 + $0x1c] sm:$0xf] %vm4651_vm3, %v16396_v56  ;;  %v14652_v38 = vpop.permute.xlu1 %5930  ;;  %v14661_v20 = vpop.permute.xlu0 %4600  ;;  %v6732_v52 = vcombine.low %v16399_v42, %v16407_v34  ;;  %v16409_v56 = vcombine.low %v14230_v25, %v16408_v55  ;;  %v16412_v25 = vld [vmem:[#allocation77_spill] sm:$0xff] }
 0x295   : > { %5241 = vst.msk [vmem:[#allocation2 + $0x1c] sm:$0xf] %vm5233_vm4, %v14531_v49  ;;  %v5396_v49 = vcombine.low %v14440_v40, %v14264_v59  ;;  %v6407_v35 = vrot.slane %v16406_v6, %v11048_v5 }
 0x296   : > { %5542 = vst.msk [vmem:[#allocation2 + $0x1c] sm:$0xf] %vm5534_vm5, %v14303_v26  ;;  %v10636_v29 = vld [vmem:[#allocation2 + $0x10] sm:$0xff]   ;;  %v4553_v14 = vrot.slane %v16409_v56, %v11048_v5  ;;  %v6739_v0 = vrot.slane %v6732_v52, %v11048_v5 }
 0x297   : > { %5200 = vrot.lane.b32.xlu1 %v5087_v7, %s10795_s12  ;;  %5198 = vrot.lane.b32.xlu0 %v5071_v8, %s10795_s12  ;;  %v5403_v43 = vrot.slane %v5396_v49, %v11048_v5 }
 0x298   : > { %10456 = vmatmul.mubr.msk.bf16.gmra.mrb[24].mxu1 %vm7028_vm11, %v10636_v29  ;;  %v14669_v58 = vpop.permute.xlu1 %6813  ;;  %v14674_v26 = vpop.permute.xlu0 %5483  ;;  %v16410_v29 = vld [vmem:[#allocation48_spill] sm:$0xff] }
 0x299   : > { %10459 = vmatprep.mubr.msk.bf16.mxu1 %vm10799_vm8, %v16385_v15  ;;  %v16411_v49 = vcombine.low %v14164_v37, %v16410_v29  ;;  %v16414_v37 = vld [vmem:[#allocation66_spill] sm:$0xff] }
 0x29b   : > { %5501 = vrot.lane.b32.xlu1 %v16398_v4, %s10793_s20  ;;  %5499 = vrot.lane.b32.xlu0 %v5403_v43, %s10793_s20  ;;  %v3423_v22 = vrot.slane %v16411_v49, %v11048_v5  ;;  %v16413_v4 = vcombine.low %v14212_v51, %v16412_v25  ;;  %v16416_v51 = vld [vmem:[#allocation42_spill] sm:$0xff]  ;;  %v16420_v49 = vld [vmem:[#allocation45_spill] sm:$0xff] }
 0x29c   : > { %v14680_v40 = vpop.permute.xlu1 %4598  ;;  %v5476_v23 = vpop.permute.xlu0 %5475 }
 0x29f   : > { %5954 = vrot.lane.b32.xlu1 %v5841_v28, %s10790_s16  ;;  %5952 = vrot.lane.b32.xlu0 %v5825_v24, %s10790_s16  ;;  %v3399_v28 = vrot.slane %v16413_v4, %v11048_v5  ;;  %v16415_v24 = vcombine.low %v16414_v37, %v14139_v10  ;;  %v16418_v10 = vld [vmem:[#allocation64_spill] sm:$0xff]  ;;  %v10694_v4 = vld.sshfl [vmem:[%s10927_s24 + $0x44] sm:$0x33 pattern:$0x75316420] }
 0x2a0   : > { %v14689_v3 = vpop.permute.xlu1 %5481  ;;  %v5929_v31 = vpop.permute.xlu0 %5928  ;;  %v16419_v52 = vcombine.low %v16399_v42, %v16418_v10  ;;  %v16422_v42 = vld [vmem:[#allocation35_spill] sm:$0xff] }
 0x2a1   : > { %v3987_v36 = vrot.slane %v16415_v24, %v11048_v5  ;;  %v16423_v37 = vcombine.low %v16405_v62, %v16422_v42  ;;  %v16425_v10 = vld [vmem:[#allocation59_spill] sm:$0xff] }
 0x2a2   : > { %v4529_v56 = vrot.slane %v16419_v52, %v11048_v5  ;;  %v16426_v52 = vcombine.low %v16408_v55, %v16425_v10 }
 0x2a3   : > { %6536 = vrot.lane.b32.xlu1 %v6423_v53, %s10796_s13  ;;  %6534 = vrot.lane.b32.xlu0 %v6407_v35, %s10796_s13  ;;  %v16417_v53 = vcombine.low %v14264_v59, %v16416_v51  ;;  %v10693_v59 = vld.sshfl [vmem:[%s10927_s24 + $0x40] sm:$0x33 pattern:$0x75316420]  ;;  %v5111_v24 = vrot.slane %v16423_v37, %v11048_v5 }
 0x2a4   : > { %v14703_v48 = vpop.permute.xlu1 %4029  ;;  %v14709_v7 = vpop.permute.xlu0 %4023  ;;  %v5443_v62 = vrot.slane %v16426_v52, %v11048_v5  ;;  %v7766_v52 = vcombine.high %v10694_v4, %v10694_v4 }
 0x2a5   : > { %v3971_v33 = vrot.slane %v16417_v53, %v11048_v5 }
 0x2a7   : > { %6837 = vrot.lane.b32.xlu1 %v4553_v14, %s10792_s19  ;;  %6835 = vrot.lane.b32.xlu0 %v6739_v0, %s10792_s19  ;;  %v10691_v0 = vld.sshfl [vmem:[%s10927_s24] sm:$0x33 pattern:$0x75316420] }
 0x2a8   : > { %v5927_v8 = vpop.permute.xlu1 %5926  ;;  %v14718_v43 = vpop.permute.xlu0 %4596 }
 0x2a9   : > { %5995 = vst.msk [vmem:[#allocation2 + $0x1c] sm:$0xf] %vm5987_vm6, %v5927_v8  ;;  %v10692_v8 = vld.sshfl [vmem:[%s10927_s24 + $0x4] sm:$0x33 pattern:$0x75316420] }
 0x2aa   : > { %v7390_v37 = vcombine.high %v10692_v8, %v10692_v8 }
 0x2ab   : > { %3492 = vrot.lane.b32.xlu1 %v3423_v22, %s10797_s14  ;;  %3490 = vrot.lane.b32.xlu0 %v3399_v28, %s10797_s14  ;;  %v16421_v22 = vcombine.low %v16402_v19, %v16420_v49 }
 0x2ac   : > { %v14727_v46 = vpop.permute.xlu1 %6809  ;;  %v14733_v11 = vpop.permute.xlu0 %5479 }
 0x2ad   : > { %v5135_v25 = vrot.slane %v16421_v22, %v11048_v5 }
 0x2af   : > { %4049 = vrot.lane.b32.xlu1 %v3987_v36, %s10794_s11  ;;  %4047 = vrot.lane.b32.xlu0 %v3971_v33, %s10794_s11  ;;  %v16424_v36 = vld [vmem:[#allocation8_spill] sm:$0xff]  ;;  %v7742_v33 = vcombine.high %v10693_v59, %v10693_v59 }
 0x2b0   : > { %v4595_v6 = vpop.permute.xlu1 %4594  ;;  %v14741_v35 = vpop.permute.xlu0 %4027  ;;  %v7373_v51 = vrot.slane %v10691_v0, %v16424_v36  ;;  %v7397_v53 = vrot.slane %v10692_v8, %v16424_v36  ;;  %v7749_v19 = vrot.slane %v10693_v59, %v16424_v36 }
 0x2b1   : > { %4661 = vst.msk [vmem:[#allocation2 + $0x24] sm:$0xf] %vm4651_vm3, %v4595_v6  ;;  %v7756_v55 = vrot.slane %v7742_v33, %v16424_v36 }
 0x2b2   : > { %v7381_v59 = vcombine.high %v7373_v51, %v7373_v51  ;;  %v7757_v10 = vcombine.high %v7749_v19, %v7749_v19 }
 0x2b3   : > { %4622 = vrot.lane.b32.xlu1 %v4553_v14, %s10791_s18  ;;  %4620 = vrot.lane.b32.xlu0 %v4529_v56, %s10791_s18  ;;  %v7366_v14 = vcombine.high %v10691_v0, %v10691_v0  ;;  %v7773_v56 = vrot.slane %v10694_v4, %v16424_v36  ;;  %v16427_v0 = vld [vmem:[#allocation92_spill] sm:$0xff] }
 0x2b4   : > { %v14753_v29 = vpop.permute.xlu1 %5477  ;;  %v14760_v28 = vpop.permute.xlu0 %6811  ;;  %v16428_v22 = vcombine.low %v16407_v34, %v16427_v0  ;;  %v14804_v4 = vcombine.low %v7373_v51, %v7381_v59 }
 0x2b5   : > { %v7380_v42 = vrot.slane %v7366_v14, %v16424_v36  ;;  %v16429_v14 = vld [vmem:[#allocation63_spill] sm:$0xff]  ;;  %v7781_v0 = vcombine.high %v7773_v56, %v7773_v56 }
 0x2b6   : > { %v8025_v47 = vrot.slane %v14804_v4, %v11048_v5 }
 0x2b7   : > { %5204 = vrot.lane.b32.xlu1 %v5135_v25, %s10795_s12  ;;  %5202 = vrot.lane.b32.xlu0 %v5111_v24, %s10795_s12  ;;  %v5427_v25 = vrot.slane %v16428_v22, %v11048_v5  ;;  %v7405_v24 = vcombine.high %v7397_v53, %v7397_v53  ;;  %v16431_v22 = vld [vmem:[#allocation26_spill] sm:$0xff]  ;;  %v7382_v39 = vcombine.high %v7380_v42, %v7380_v42 }
 0x2b8   : > { %v14771_v6 = vpop.permute.xlu1 %4025  ;;  %v5175_v49 = vpop.permute.xlu0 %5174 }
 0x2b9   : > { %5242 = vst.msk [vmem:[#allocation2 + $0x20] sm:$0xf] %vm5233_vm4, %v5175_v49  ;;  %v16430_v49 = vcombine.low %v16429_v14, %v14435_v57  ;;  %v14806_v33 = vcombine.low %v7397_v53, %v7405_v24  ;;  %v14826_v53 = vcombine.low %v7773_v56, %v7781_v0  ;;  %v16437_v56 = vcombine.low %v14435_v57, %v14541_v30 }
 0x2ba   : > { %5543 = vst.msk [vmem:[#allocation2 + $0x20] sm:$0xf] %vm5534_vm5, %v5476_v23  ;;  %v16432_v23 = vld [vmem:[#allocation44_spill] sm:$0xff]  ;;  %v4567_v0 = vrot.slane %v16354_v60, %v11048_v5  ;;  %v6061_v60 = vshll.u32 %v5608_v17, 16 }
 0x2bb   : > { %5505 = vrot.lane.b32.xlu1 %v5443_v62, %s10793_s20  ;;  %5503 = vrot.lane.b32.xlu0 %v5427_v25, %s10793_s20  ;;  %5996 = vst.msk [vmem:[#allocation2 + $0x20] sm:$0xf] %vm5987_vm6, %v5929_v31  ;;  %v5889_v62 = vrot.slane %v16430_v49, %v11048_v5  ;;  %v16433_v54 = vcombine.low %v16431_v22, %v16432_v23 }
 0x2bc   : > { %v14789_v34 = vpop.permute.xlu1 %6512  ;;  %v3467_v8 = vpop.permute.xlu0 %3466  ;;  %v14802_v31 = vrot.slane %v7390_v37, %v16424_v36  ;;  %v7758_v49 = vcombine.high %v7756_v55, %v7756_v55  ;;  %v16435_v37 = vld [vmem:[#allocation28_spill] sm:$0xff]  ;;  %v8049_v1 = vrot.slane %v14806_v33, %v11048_v5  ;;  %v5142_v22 = vrot.slane %v14458_v44, %v11048_v5 }
 0x2bd   : > { %v5865_v25 = vrot.slane %v16433_v54, %v11048_v5  ;;  %3532 = vst.msk [vmem:[#allocation2 + $0x28] sm:$0xf] %vm3521_vm1, %v3467_v8  ;;  %v16434_v54 = vld [vmem:[#allocation46_spill] sm:$0xff]  ;;  %v14814_v8 = vrot.slane %v7766_v52, %v16424_v36  ;;  %v3430_v24 = vrot.slane %v16435_v37, %v11048_v5  ;;  %v14838_v52 = vcombine.low %v7380_v42, %v7382_v39 }
 0x2be   : > { %4089 = vst.msk [vmem:[#allocation2 + $0x28] sm:$0xf] %vm4078_vm2, %v14709_v7  ;;  %v3994_v14 = vrot.slane %v16434_v54, %v11048_v5  ;;  %v6471_v7 = vrot.slane %v6464_v13, %v11048_v5  ;;  %v14846_v13 = vcombine.high %v16371_v41, %v16371_v41  ;;  %v4560_v39 = vrot.slane %v16349_v27, %v11048_v5  ;;  %v10697_v37 = vld.sshfl [vmem:[%s10927_s24 + $0x10] sm:$0x33 pattern:$0x75316420] }
 0x2bf   : > { %5958 = vrot.lane.b32.xlu1 %v5889_v62, %s10790_s16  ;;  %5956 = vrot.lane.b32.xlu0 %v5865_v25, %s10790_s16  ;;  %v14816_v62 = vcombine.low %v7749_v19, %v7757_v10  ;;  %4662 = vst.msk [vmem:[#allocation2 + $0x28] sm:$0xf] %vm4651_vm3, %v14718_v43  ;;  %v6447_v19 = vrot.slane %v6440_v63, %v11048_v5  ;;  %v16436_v43 = vld [vmem:[#allocation31_spill] sm:$0xff]  ;;  %v6056_v44 = vshrl.u32 %v16371_v41, 16 }
 0x2c0   : > { %v14820_v51 = vpop.permute.xlu1 %5180  ;;  %v14828_v59 = vpop.permute.xlu0 %6514  ;;  %v3437_v10 = vrot.slane %v16436_v43, %v11048_v5  ;;  %v3995_v63 = vcombine.low %v14568_v9, %v3994_v14  ;;  %v6779_v42 = vrot.slane %v16437_v56, %v11048_v5  ;;  %v5149_v23 = vrot.slane %v14466_v18, %v11048_v5  ;;  %v10696_v25 = vld.sshfl [vmem:[%s10927_s24 + $0xc] sm:$0x33 pattern:$0x75316420]  ;;  %v16441_v56 = vld [vmem:[#allocation91_spill] sm:$0xff] }
 0x2c1   : > { %v7413_v9 = vcombine.high %v10695_v50, %v10695_v50  ;;  %v16438_v27 = vcombine.low %v14511_v12, %v14514_v61  ;;  %v6064_v18 = vshrl.u32 %v5608_v17, 16  ;;  %v6069_v14 = vshll.u32 %v14846_v13, 16  ;;  %v16439_v12 = vld [vmem:[#allocation89_spill] sm:$0xff] }
 0x2c2   : > { %v3438_v30 = vcombine.low %v3430_v24, %v3437_v10  ;;  %v4002_v61 = vrot.slane %v3995_v63, %v11048_v5  ;;  %v4568_v43 = vcombine.low %v4560_v39, %v4567_v0  ;;  %v5150_v10 = vcombine.low %v5142_v22, %v5149_v23  ;;  %v16442_v22 = vld [vmem:[#allocation68_spill] sm:$0xff] }
 0x2c3   : > { %6540 = vrot.lane.b32.xlu1 %v6471_v7, %s10796_s13  ;;  %6538 = vrot.lane.b32.xlu0 %v6447_v19, %s10796_s13  ;;  %v6763_v57 = vrot.slane %v16438_v27, %v11048_v5  ;;  %v14879_v7 = vcombine.low %v7756_v55, %v7758_v49  ;;  %v14882_v19 = vrot.slane %v10695_v50, %v16424_v36  ;;  %v16443_v27 = vld [vmem:[#allocation56_spill] sm:$0xff] }
 0x2c4   : > { %v3473_v45 = vpop.permute.xlu1 %3472  ;;  %v14867_v54 = vpop.permute.xlu0 %5182  ;;  %v5896_v55 = vrot.slane %v16371_v41, %v11048_v5  ;;  %v5903_v49 = vrot.slane %v5608_v17, %v11048_v5  ;;  %v7437_v50 = vcombine.high %v10696_v25, %v10696_v25  ;;  %v5450_v39 = vrot.slane %v14427_v2, %v11048_v5  ;;  %v10698_v17 = vld.sshfl [vmem:[%s10927_s24 + $0x4c] sm:$0x33 pattern:$0x75316420] }
 0x2c5   : > { %3535 = vst.msk [vmem:[#allocation2 + $0x34] sm:$0xf] %vm3521_vm1, %v3473_v45  ;;  %v14895_v45 = vrot.slane %v10696_v25, %v16424_v36  ;;  %v14904_v41 = vrot.slane %v7413_v9, %v16424_v36  ;;  %v6063_v23 = vsel %vm11520_vm15, %v6056_v44, %v6061_v60  ;;  %v6071_v2 = vsel %vm11520_vm15, %v6064_v18, %v6069_v14  ;;  %v10699_v25 = vld.sshfl [vmem:[%s10927_s24 + $0x48] sm:$0x33 pattern:$0x75316420] }
 0x2c6   : > { %4092 = vst.msk [vmem:[#allocation2 + $0x34] sm:$0xf] %vm4078_vm2, %v14703_v48  ;;  %v16440_v48 = vld [vmem:[#allocation11_spill] sm:$0xff]  ;;  %v7428_v9 = vcombine.high %v14882_v19, %v14882_v19  ;;  %v7460_v32 = vcombine.high %v10697_v37, %v10697_v37  ;;  %v4575_v60 = vrot.slane %v4568_v43, %v11048_v5  ;;  %v5157_v18 = vrot.slane %v5150_v10, %v11048_v5 }
 0x2c7   : > { %6841 = vrot.lane.b32.xlu1 %v6779_v42, %s10792_s19  ;;  %4665 = vst.msk [vmem:[#allocation2 + $0x34] sm:$0xf] %vm4651_vm3, %v16439_v12  ;;  %6839 = vrot.lane.b32.xlu0 %v6763_v57, %s10792_s19  ;;  %v3445_v42 = vrot.slane %v3438_v30, %v11048_v5  ;;  %v8042_v57 = vcombine.low %v14802_v31, %v14882_v19  ;;  %v16444_v30 = vld [vmem:[#allocation69_spill] sm:$0xff]  ;;  %vm4676_vm15 = vcmask 255168  }
 0x2c8   : > { %5247 = vst.msk [vmem:[#allocation2 + $0x34] sm:$0xf] %vm5233_vm4, %v16440_v48  ;;  %v6509_v24 = vpop.permute.xlu1 %6508  ;;  %v6511_v63 = vpop.permute.xlu0 %6510  ;;  %v5904_v14 = vcombine.low %v5896_v55, %v5903_v49  ;;  %v14938_v48 = vrot.slane %v7437_v50, %v16424_v36  ;;  %v7789_v43 = vcombine.high %v10699_v25, %v10699_v25  ;;  %v8032_v55 = vrot.slane %v14838_v52, %v11048_v5 }
 0x2c9   : > { %5548 = vst.msk [vmem:[#allocation2 + $0x34] sm:$0xf] %vm5534_vm5, %v16441_v56  ;;  %v8056_v31 = vrot.slane %v8042_v57, %v11048_v5  ;;  %v7813_v56 = vcombine.high %v10698_v17, %v10698_v17  ;;  %v14962_v50 = vrot.slane %v10699_v25, %v16424_v36  ;;  %v8361_v52 = vrot.slane %v14816_v62, %v11048_v5  ;;  %v16446_v57 = vld [vmem:[#allocation33_spill] sm:$0xff] }
 0x2ca   : > { %6577 = vst.msk [vmem:[#allocation2 + $0x1c] sm:$0xf] %vm6569_vm9, %v6509_v24  ;;  %6578 = vst.msk [vmem:[#allocation2 + $0x20] sm:$0xf] %vm6569_vm9, %v6511_v63  ;;  %v7452_v24 = vcombine.high %v14895_v45, %v14895_v45  ;;  %v14965_v63 = vrot.slane %v10697_v37, %v16424_v36  ;;  %v5911_v33 = vrot.slane %v5904_v14, %v11048_v5 }
 0x2cb   : > { %6001 = vst.msk [vmem:[#allocation2 + $0x34] sm:$0xf] %vm5987_vm6, %v16442_v22  ;;  %4051 = vrot.lane.b32.xlu1 %v4002_v61, %s10794_s11  ;;  %3494 = vrot.lane.b32.xlu0 %v3445_v42, %s10797_s14  ;;  %v6478_v61 = vrot.slane %v6063_v23, %v11048_v5  ;;  %v14986_v42 = vrot.slane %v7789_v43, %v16424_v36  ;;  %v15031_v23 = vld.sshfl [vmem:[%s10927_s24 + $0x54] sm:$0x33 pattern:$0x75316420] }
 0x2cc   : > { %6878 = vst.msk [vmem:[#allocation2 + $0x1c] sm:$0xf] %vm6870_vm10, %v14727_v46  ;;  %6879 = vst.msk [vmem:[#allocation2 + $0x20] sm:$0xf] %vm6870_vm10, %v14760_v28  ;;  %v6786_v46 = vrot.slane %v14846_v13, %v11048_v5  ;;  %v5177_v44 = vpop.permute.xlu1 %5176  ;;  %v5179_v12 = vpop.permute.xlu0 %5178  ;;  %v5451_v28 = vcombine.low %v4567_v0, %v5450_v39  ;;  %v6485_v13 = vrot.slane %v6071_v2, %v11048_v5  ;;  %v16445_v2 = vld [vmem:[#allocation83_spill] sm:$0xff]  ;;  %v16450_v43 = vld [vmem:[#allocation73_spill] sm:$0xff] }
 0x2cd   : > { %6583 = vst.msk [vmem:[#allocation2 + $0x34] sm:$0xf] %vm6569_vm9, %v16443_v27  ;;  %v14947_v0 = vrot.slane %v10698_v17, %v16424_v36  ;;  %v7804_v39 = vcombine.high %v14962_v50, %v14962_v50  ;;  %v14991_v17 = vrot.slane %v7813_v56, %v16424_v36  ;;  %v8066_v22 = vcombine.low %v7428_v9, %v14895_v45 }
 0x2ce   : > { %6884 = vst.msk [vmem:[#allocation2 + $0x34] sm:$0xf] %vm6870_vm10, %v16444_v30  ;;  %v6787_v10 = vcombine.low %v5903_v49, %v6786_v46  ;;  %v6486_v49 = vcombine.low %v6478_v61, %v6485_v13  ;;  %v8089_v4 = vcombine.low %v14938_v48, %v14965_v63  ;;  %v7475_v27 = vcombine.high %v14965_v63, %v14965_v63  ;;  %v10704_v46 = vld.sshfl [vmem:[%s10927_s24 + $0x1c] sm:$0x33 pattern:$0x75316420] }
 0x2cf   : > { %5243 = vst.msk [vmem:[#allocation2 + $0x24] sm:$0xf] %vm5233_vm4, %v5177_v44  ;;  %5244 = vst.msk [vmem:[#allocation2 + $0x28] sm:$0xf] %vm5233_vm4, %v5179_v12  ;;  %5206 = vrot.lane.b32.xlu1 %v5157_v18, %s10795_s12  ;;  %4624 = vrot.lane.b32.xlu0 %v4575_v60, %s10791_s18  ;;  %v16448_v60 = vld [vmem:[#allocation30_spill] sm:$0xff] }
 0x2d0   : > { %5544 = vst.msk [vmem:[#allocation2 + $0x24] sm:$0xf] %vm5534_vm5, %v14753_v29  ;;  %5545 = vst.msk [vmem:[#allocation2 + $0x28] sm:$0xf] %vm5534_vm5, %v14733_v11  ;;  %v14959_v29 = vcombine.low %v8049_v1, %v8056_v31  ;;  %v14968_v11 = vrot.slane %v7460_v32, %v16424_v36  ;;  %v8385_v1 = vrot.slane %v14826_v53, %v11048_v5  ;;  %v16447_v32 = vld [vmem:[#allocation55_spill] sm:$0xff]  ;;  %v16449_v18 = vld [vmem:[#allocation58_spill] sm:$0xff] }
 0x2d1   : > { %5997 = vst.msk [vmem:[#allocation2 + $0x24] sm:$0xf] %vm5987_vm6, %v14652_v38  ;;  %5998 = vst.msk [vmem:[#allocation2 + $0x28] sm:$0xf] %vm5987_vm6, %v14619_v21  ;;  %v3469_v38 = vpop.permute.xlu1 %3468  ;;  %v3471_v21 = vpop.permute.xlu0 %3470  ;;  %v6493_v19 = vrot.slane %v6486_v49, %v11048_v5  ;;  %v8097_v9 = vrot.slane %v8089_v4, %v11048_v5 }
 0x2d2   : > { %6579 = vst.msk [vmem:[#allocation2 + $0x24] sm:$0xf] %vm6569_vm9, %v14789_v34  ;;  %6580 = vst.msk [vmem:[#allocation2 + $0x28] sm:$0xf] %vm6569_vm9, %v14828_v59  ;;  %v5458_v34 = vrot.slane %v5451_v28, %v11048_v5  ;;  %v8064_v45 = vrot.slane %v14959_v29, %v11048_v5 }
 0x2d3   : > { %6880 = vst.msk [vmem:[#allocation2 + $0x24] sm:$0xf] %vm6870_vm10, %v14669_v58  ;;  %v10637_v37 = vld [vmem:[#allocation2 + $0x18] sm:$0xff]   ;;  %6881 = vst.msk [vmem:[#allocation2 + $0x28] sm:$0xf] %vm6870_vm10, %v14636_v16  ;;  %5960 = vrot.lane.b32.xlu1 %v5911_v33, %s10790_s16  ;;  %v7828_v58 = vcombine.high %v14947_v0, %v14947_v0  ;;  %v6794_v16 = vrot.slane %v6787_v10, %v11048_v5  ;;  %v15081_v10 = vrot.slane %v15031_v23, %v16424_v36 }
 0x2d4   : > { %3533 = vst.msk [vmem:[#allocation2 + $0x2c] sm:$0xf] %vm3521_vm1, %v3469_v38  ;;  %v14994_v59 = vld.sshfl [vmem:[%s10927_s24 + $0x14] sm:$0x33 pattern:$0x75316420]  ;;  %5507 = vrot.lane.b32.xlu0 %v5458_v34, %s10793_s20  ;;  %10460 = vmatmul.mubr.msk.bf16.gmra.mrb[28].mxu1 %vm7028_vm11, %v10637_v37  ;;  %v7531_v34 = vcombine.high %v10704_v46, %v10704_v46  ;;  %v7538_v37 = vrot.slane %v10704_v46, %v16424_v36 }
 0x2d5   : > { %3534 = vst.msk [vmem:[#allocation2 + $0x30] sm:$0xf] %vm3521_vm1, %v3471_v21  ;;  %10463 = vmatprep.mubr.msk.bf16.mxu1 %vm10799_vm8, %v16385_v15  ;;  %v7484_v30 = vcombine.high %v14994_v59, %v14994_v59  ;;  %v10705_v44 = vld.sshfl [vmem:[%s10927_s24 + $0x20] sm:$0x33 pattern:$0x75316420]  ;;  %v7491_v13 = vrot.slane %v14994_v59, %v16424_v36 }
 0x2d6   : > { %4090 = vst.msk [vmem:[#allocation2 + $0x2c] sm:$0xf] %vm4078_vm2, %v14771_v6  ;;  %4091 = vst.msk [vmem:[#allocation2 + $0x30] sm:$0xf] %vm4078_vm2, %v14741_v35  ;;  %v8033_v6 = vcombine.low %v8025_v47, %v8032_v55  ;;  %v6529_v35 = vpop.permute.xlu1 %6528  ;;  %v7554_v49 = vcombine.high %v10705_v44, %v10705_v44  ;;  %v7561_v59 = vrot.slane %v10705_v44, %v16424_v36 }
 0x2d7   : > { %4663 = vst.msk [vmem:[#allocation2 + $0x2c] sm:$0xf] %vm4651_vm3, %v14680_v40  ;;  %4664 = vst.msk [vmem:[#allocation2 + $0x30] sm:$0xf] %vm4651_vm3, %v14661_v20  ;;  %v7429_v40 = vcombine.high %v14904_v41, %v14904_v41  ;;  %v8090_v20 = vcombine.low %v7452_v24, %v14968_v11  ;;  %6843 = vrot.lane.b32.xlu1 %v6794_v16, %s10792_s19  ;;  %v7860_v24 = vcombine.high %v15031_v23, %v15031_v23 }
 0x2d8   : > { %5245 = vst.msk [vmem:[#allocation2 + $0x2c] sm:$0xf] %vm5233_vm4, %v14820_v51  ;;  %v10701_v47 = vld.sshfl [vmem:[%s10927_s24 + $0x50] sm:$0x33 pattern:$0x75316420]  ;;  %v6527_v51 = vpop.permute.xlu0 %6526  ;;  %6542 = vrot.lane.b32.xlu0 %v6493_v19, %s10796_s13  ;;  %v7569_v46 = vcombine.high %v7561_v59, %v7561_v59 }
 0x2d9   : > { %5246 = vst.msk [vmem:[#allocation2 + $0x30] sm:$0xf] %vm5233_vm4, %v14867_v54  ;;  %v8080_v54 = vrot.slane %v8066_v22, %v11048_v5  ;;  %v8104_v25 = vrot.slane %v8090_v20, %v11048_v5  ;;  %v7836_v31 = vcombine.high %v10701_v47, %v10701_v47  ;;  %v15072_v48 = vrot.slane %v10701_v47, %v16424_v36  ;;  %v10706_v55 = vld.sshfl [vmem:[%s10927_s24 + $0x58] sm:$0x33 pattern:$0x75316420] }
 0x2da   : > { %5546 = vst.msk [vmem:[#allocation2 + $0x2c] sm:$0xf] %vm5534_vm5, %v14689_v3  ;;  %5547 = vst.msk [vmem:[#allocation2 + $0x30] sm:$0xf] %vm5534_vm5, %v14674_v26  ;;  %v8065_v3 = vcombine.low %v14904_v41, %v7429_v40  ;;  %v8040_v41 = vrot.slane %v8033_v6, %v11048_v5  ;;  %v6830_v14 = vpop.permute.xlu1 %6829  ;;  %v10638_v12 = vld [vmem:[#allocation2 + $0x20] sm:$0xff]   ;;  %v7499_v40 = vcombine.high %v7491_v13, %v7491_v13 }
 0x2db   : > { %6587 = vst.msk [vmem:[#allocation2 + $0x44] sm:$0xf] %vm6569_vm9, %v6529_v35  ;;  %6586 = vst.msk [vmem:[#allocation2 + $0x40] sm:$0xf] %vm6569_vm9, %v6527_v51  ;;  %v8105_v61 = vcombine.low %v8097_v9, %v8104_v25  ;;  %8617 = vrot.lane.b32.xlu1 %v8064_v45, %s10797_s14  ;;  %v7498_v35 = vrot.slane %v7484_v30, %v16424_v36  ;;  %v15097_v22 = vrot.slane %v7836_v31, %v16424_v36 }
 0x2dc   : > { %5999 = vst.msk [vmem:[#allocation2 + $0x2c] sm:$0xf] %vm5987_vm6, %v16445_v2  ;;  %v10703_v26 = vld.sshfl [vmem:[%s10927_s24 + $0x18] sm:$0x33 pattern:$0x75316420]  ;;  %v8073_v28 = vrot.slane %v8065_v3, %v11048_v5  ;;  %v6828_v56 = vpop.permute.xlu0 %6827  ;;  %10464 = vmatmul.mubr.msk.bf16.gmra.mrb[32].mxu1 %vm7028_vm11, %v10638_v12  ;;  %8615 = vrot.lane.b32.xlu0 %v8040_v41, %s10797_s14  ;;  %v7851_v47 = vcombine.high %v15072_v48, %v15072_v48 }
 0x2dd   : > { %6000 = vst.msk [vmem:[#allocation2 + $0x30] sm:$0xf] %vm5987_vm6, %v16446_v57  ;;  %v8112_v38 = vrot.slane %v8105_v61, %v11048_v5  ;;  %v7507_v33 = vcombine.high %v10703_v26, %v10703_v26  ;;  %v7514_v21 = vrot.slane %v10703_v26, %v16424_v36  ;;  %10467 = vmatprep.mubr.msk.bf16.mxu1 %vm10799_vm8, %v16385_v15  ;;  %v10707_v4 = vld.sshfl [vmem:[%s10927_s24 + $0x5c] sm:$0x33 pattern:$0x75316420] }
 0x2de   : > { %6581 = vst.msk [vmem:[#allocation2 + $0x2c] sm:$0xf] %vm6569_vm9, %v16447_v32  ;;  %6582 = vst.msk [vmem:[#allocation2 + $0x30] sm:$0xf] %vm6569_vm9, %v16448_v60  ;;  %v8081_v29 = vcombine.low %v8073_v28, %v8080_v54  ;;  %v3485_v16 = vpop.permute.xlu1 %3484  ;;  %v7883_v23 = vcombine.high %v10706_v55, %v10706_v55  ;;  %v15104_v51 = vrot.slane %v10706_v55, %v16424_v36 }
 0x2df   : > { %6882 = vst.msk [vmem:[#allocation2 + $0x2c] sm:$0xf] %vm6870_vm10, %v16449_v18  ;;  %6883 = vst.msk [vmem:[#allocation2 + $0x30] sm:$0xf] %vm6870_vm10, %v16450_v43  ;;  %8621 = vrot.lane.b32.xlu1 %v8112_v38, %s10797_s14  ;;  %v15110_v45 = vrot.slane %v7860_v24, %v16424_v36  ;;  %v7875_v2 = vcombine.high %v15081_v10, %v15081_v10  ;;  %v7521_v3 = vrot.slane %v7507_v33, %v16424_v36 }
 0x2e0   : > { %6888 = vst.msk [vmem:[#allocation2 + $0x44] sm:$0xf] %vm6870_vm10, %v6830_v14  ;;  %6887 = vst.msk [vmem:[#allocation2 + $0x40] sm:$0xf] %vm6870_vm10, %v6828_v56  ;;  %v8088_v6 = vrot.slane %v8081_v29, %v11048_v5  ;;  %v3483_v20 = vpop.permute.xlu0 %3482  ;;  %v7522_v54 = vcombine.high %v7514_v21, %v7514_v21  ;;  %v7545_v9 = vrot.slane %v7531_v34, %v16424_v36 }
 0x2e1   : > { %3541 = vst.msk [vmem:[#allocation2 + $0x4c] sm:$0xf] %vm3521_vm1, %v3485_v16  ;;  %v10708_v19 = vld.sshfl [vmem:[%s10927_s24 + $0x24] sm:$0x33 pattern:$0x75316420]  ;;  %v7546_v25 = vcombine.high %v7538_v37, %v7538_v37  ;;  %v7568_v26 = vrot.slane %v7554_v49, %v16424_v36  ;;  %v7907_v32 = vcombine.high %v10707_v4, %v10707_v4  ;;  %v15119_v41 = vrot.slane %v10707_v4, %v16424_v36 }
 0x2e2   : > { %3540 = vst.msk [vmem:[#allocation2 + $0x48] sm:$0xf] %vm3521_vm1, %v3483_v20  ;;  %8619 = vrot.lane.b32.xlu0 %v8088_v6, %s10797_s14  ;;  %v4042_v57 = vpop.permute.xlu1 %4041  ;;  %v15122_v30 = vld.sshfl [vmem:[%s10927_s24 + $0x28] sm:$0x33 pattern:$0x75316420]  ;;  %v15129_v14 = vrot.slane %v7883_v23, %v16424_v36  ;;  %v7898_v12 = vcombine.high %v15104_v51, %v15104_v51  ;;  %v7578_v28 = vcombine.high %v10708_v19, %v10708_v19 }
 0x2e3   : > { %v15125_v44 = vld.sshfl [vmem:[%s10927_s24 + $0x2c] sm:$0x33 pattern:$0x75316420]  ;;  %4098 = vst.msk [vmem:[#allocation2 + $0x4c] sm:$0xf] %vm4078_vm2, %v4042_v57  ;;  %v15134_v61 = vrot.slane %v10708_v19, %v16424_v36  ;;  %v7476_v31 = vcombine.high %v14968_v11, %v14968_v11  ;;  %v8113_v24 = vcombine.low %v7475_v27, %v7491_v13  ;;  %v8137_v43 = vcombine.low %v7499_v40, %v7521_v3 }
 0x2e4   : > { %v4040_v60 = vpop.permute.xlu0 %4039  ;;  %v8138_v56 = vcombine.low %v7514_v21, %v7522_v54  ;;  %v7523_v29 = vcombine.high %v7521_v3, %v7521_v3  ;;  %v8162_v38 = vcombine.low %v7538_v37, %v7546_v25  ;;  %v7570_v33 = vcombine.high %v7568_v26, %v7568_v26  ;;  %v10711_v23 = vld.sshfl [vmem:[%s10927_s24 + $0x30] sm:$0x33 pattern:$0x75316420] }
 0x2e5   : > { %4097 = vst.msk [vmem:[#allocation2 + $0x48] sm:$0xf] %vm4078_vm2, %v4040_v60  ;;  %v8185_v34 = vcombine.low %v7561_v59, %v7569_v46  ;;  %v8114_v16 = vcombine.low %v7476_v31, %v7498_v35  ;;  %v8121_v11 = vrot.slane %v8113_v24, %v11048_v5  ;;  %v8145_v63 = vrot.slane %v8137_v43, %v11048_v5  ;;  %v10713_v25 = vld.sshfl [vmem:[%s10927_s24 + $0x38] sm:$0x33 pattern:$0x75316420] }
 0x2e6   : > { %v10639_v18 = vld [vmem:[#allocation2 + $0x28] sm:$0xff]   ;;  %v4615_v55 = vpop.permute.xlu1 %4614  ;;  %v8152_v27 = vrot.slane %v8138_v56, %v11048_v5  ;;  %v8161_v13 = vcombine.low %v7523_v29, %v7545_v9  ;;  %v8176_v21 = vrot.slane %v8162_v38, %v11048_v5  ;;  %v8186_v37 = vcombine.low %v7568_v26, %v7570_v33  ;;  %v10712_v9 = vld.sshfl [vmem:[%s10927_s24 + $0x34] sm:$0x33 pattern:$0x75316420]  ;;  %v10640_v46 = vld [vmem:[#allocation2 + $0x30] sm:$0xff]  }
 0x2e7   : > { %10468 = vmatmul.mubr.msk.bf16.gmra.mrb[36].mxu1 %vm7028_vm11, %v10639_v18  ;;  %4671 = vst.msk [vmem:[#allocation2 + $0x4c] sm:$0xf] %vm4651_vm3, %v4615_v55  ;;  %v8193_v59 = vrot.slane %v8185_v34, %v11048_v5  ;;  %v15153_v6 = vrot.slane %v7907_v32, %v16424_v36  ;;  %v7922_v35 = vcombine.high %v15119_v41, %v15119_v41  ;;  %v10714_v60 = vld.sshfl [vmem:[%s10927_s24 + $0x3c] sm:$0x33 pattern:$0x75316420] }
 0x2e8   : > { %10471 = vmatprep.mubr.msk.bf16.mxu1 %vm10799_vm8, %v16385_v15  ;;  %v4613_v49 = vpop.permute.xlu0 %4612  ;;  %v8128_v40 = vrot.slane %v8114_v16, %v11048_v5  ;;  %v8153_v4 = vcombine.low %v8145_v63, %v8152_v27  ;;  %v15159_v20 = vrot.slane %v7578_v28, %v16424_v36  ;;  %v8169_v3 = vrot.slane %v8161_v13, %v11048_v5  ;;  %v10715_v18 = vld.sshfl [vmem:[%s10927_s24 + $0x60] sm:$0x33 pattern:$0x75316420] }
 0x2e9   : > { %4670 = vst.msk [vmem:[#allocation2 + $0x48] sm:$0xf] %vm4651_vm3, %v4613_v49  ;;  %v8200_v54 = vrot.slane %v8186_v37, %v11048_v5  ;;  %v7601_v24 = vcombine.high %v15122_v30, %v15122_v30  ;;  %v7608_v43 = vrot.slane %v15122_v30, %v16424_v36  ;;  %v7625_v55 = vcombine.high %v15125_v44, %v15125_v44 }
 0x2ea   : > { %v5197_v19 = vpop.permute.xlu1 %5196  ;;  %v8129_v57 = vcombine.low %v8121_v11, %v8128_v40  ;;  %v8160_v32 = vrot.slane %v8153_v4, %v11048_v5  ;;  %v8177_v28 = vcombine.low %v8169_v3, %v8176_v21  ;;  %v7648_v29 = vcombine.high %v10711_v23, %v10711_v23 }
 0x2eb   : > { %5253 = vst.msk [vmem:[#allocation2 + $0x4c] sm:$0xf] %vm5233_vm4, %v5197_v19  ;;  %v8201_v31 = vcombine.low %v8193_v59, %v8200_v54  ;;  %v7655_v38 = vrot.slane %v10711_v23, %v16424_v36  ;;  %v7632_v30 = vrot.slane %v15125_v44, %v16424_v36  ;;  %v7672_v49 = vcombine.high %v10712_v9, %v10712_v9 }
 0x2ec   : > { %v5195_v26 = vpop.permute.xlu0 %5194  ;;  %v8136_v56 = vrot.slane %v8129_v57, %v11048_v5  ;;  %8625 = vrot.lane.b32.xlu1 %v8160_v32, %s10797_s14  ;;  %v7695_v16 = vcombine.high %v10713_v25, %v10713_v25  ;;  %v8184_v63 = vrot.slane %v8177_v28, %v11048_v5  ;;  %v7702_v27 = vrot.slane %v10713_v25, %v16424_v36 }
 0x2ed   : > { %5252 = vst.msk [vmem:[#allocation2 + $0x48] sm:$0xf] %vm5233_vm4, %v5195_v26  ;;  %v8208_v34 = vrot.slane %v8201_v31, %v11048_v5  ;;  %v7719_v13 = vcombine.high %v10714_v60, %v10714_v60  ;;  %v7726_v21 = vrot.slane %v10714_v60, %v16424_v36  ;;  %v7930_v37 = vcombine.high %v10715_v18, %v10715_v18 }
 0x2ee   : > { %v5498_v33 = vpop.permute.xlu1 %5497  ;;  %8623 = vrot.lane.b32.xlu0 %v8136_v56, %s10797_s14  ;;  %v7593_v44 = vcombine.high %v15134_v61, %v15134_v61  ;;  %v7615_v59 = vrot.slane %v7601_v24, %v16424_v36  ;;  %v7616_v40 = vcombine.high %v7608_v43, %v7608_v43  ;;  %v7679_v4 = vrot.slane %v10712_v9, %v16424_v36  ;;  %v10641_v9 = vld [vmem:[#allocation2 + $0x38] sm:$0xff]  }
 0x2ef   : > { %10472 = vmatmul.mubr.msk.bf16.gmra.mrb[40].mxu1 %vm7028_vm11, %v10640_v46  ;;  %5554 = vst.msk [vmem:[#allocation2 + $0x4c] sm:$0xf] %vm5534_vm5, %v5498_v33  ;;  %v7639_v23 = vrot.slane %v7625_v55, %v16424_v36  ;;  %v7640_v19 = vcombine.high %v7632_v30, %v7632_v30  ;;  %v7662_v3 = vrot.slane %v7648_v29, %v16424_v36 }
 0x2f0   : > { %10475 = vmatprep.mubr.msk.bf16.mxu1 %vm10799_vm8, %v16385_v15  ;;  %v5496_v11 = vpop.permute.xlu0 %5495  ;;  %8629 = vrot.lane.b32.xlu1 %v8208_v34, %s10797_s14  ;;  %v7663_v54 = vcombine.high %v7655_v38, %v7655_v38  ;;  %v7686_v26 = vrot.slane %v7672_v49, %v16424_v36  ;;  %v7687_v46 = vcombine.high %v7679_v4, %v7679_v4 }
 0x2f1   : > { %5553 = vst.msk [vmem:[#allocation2 + $0x48] sm:$0xf] %vm5534_vm5, %v5496_v11  ;;  %v7709_v57 = vrot.slane %v7695_v16, %v16424_v36  ;;  %v15202_v32 = vrot.slane %v10715_v18, %v16424_v36  ;;  %v7710_v28 = vcombine.high %v7702_v27, %v7702_v27  ;;  %v7733_v31 = vrot.slane %v7719_v13, %v16424_v36 }
 0x2f2   : > { %v5951_v25 = vpop.permute.xlu1 %5950  ;;  %8627 = vrot.lane.b32.xlu0 %v8184_v63, %s10797_s14  ;;  %v7734_v24 = vcombine.high %v7726_v21, %v7726_v21  ;;  %v15208_v56 = vrot.slane %v7930_v37, %v16424_v36  ;;  %v8209_v18 = vcombine.low %v15134_v61, %v7593_v44  ;;  %v8210_v55 = vcombine.low %v15159_v20, %v7608_v43 }
 0x2f3   : > { %6007 = vst.msk [vmem:[#allocation2 + $0x4c] sm:$0xf] %vm5987_vm6, %v5951_v25  ;;  %v7617_v29 = vcombine.high %v7615_v59, %v7615_v59  ;;  %v8234_v33 = vcombine.low %v7616_v40, %v7632_v30  ;;  %v8257_v49 = vcombine.low %v7639_v23, %v7655_v38  ;;  %v8258_v16 = vcombine.low %v7640_v19, %v7662_v3 }
 0x2f4   : > { %v5949_v60 = vpop.permute.xlu0 %5948  ;;  %v7664_v11 = vcombine.high %v7662_v3, %v7662_v3  ;;  %v8281_v63 = vcombine.low %v7663_v54, %v7679_v4  ;;  %v8217_v37 = vrot.slane %v8209_v18, %v11048_v5  ;;  %v8224_v25 = vrot.slane %v8210_v55, %v11048_v5  ;;  %v10642_v55 = vld [vmem:[#allocation2 + $0x40] sm:$0xff]  }
 0x2f5   : > { %6006 = vst.msk [vmem:[#allocation2 + $0x48] sm:$0xf] %vm5987_vm6, %v5949_v60  ;;  %v8233_v61 = vcombine.low %v7615_v59, %v7617_v29  ;;  %v8248_v20 = vrot.slane %v8234_v33, %v11048_v5  ;;  %v8265_v43 = vrot.slane %v8257_v49, %v11048_v5  ;;  %v8272_v30 = vrot.slane %v8258_v16, %v11048_v5 }
 0x2f6   : > { %v6533_v34 = vpop.permute.xlu1 %6532  ;;  %v8282_v38 = vcombine.low %v7664_v11, %v7686_v26  ;;  %v8289_v44 = vrot.slane %v8281_v63, %v11048_v5  ;;  %v8225_v40 = vcombine.low %v8217_v37, %v8224_v25  ;;  %v8305_v23 = vcombine.low %v7687_v46, %v7709_v57 }
 0x2f7   : > { %10476 = vmatmul.mubr.msk.bf16.gmra.mrb[44].mxu1 %vm7028_vm11, %v10641_v9  ;;  %6589 = vst.msk [vmem:[#allocation2 + $0x4c] sm:$0xf] %vm6569_vm9, %v6533_v34  ;;  %v8241_v4 = vrot.slane %v8233_v61, %v11048_v5  ;;  %v8306_v19 = vcombine.low %v7702_v27, %v7710_v28  ;;  %v8273_v54 = vcombine.low %v8265_v43, %v8272_v30 }
 0x2f8   : > { %10479 = vmatprep.mubr.msk.bf16.mxu1 %vm10799_vm8, %v16385_v15  ;;  %v6531_v13 = vpop.permute.xlu0 %6530  ;;  %v8296_v59 = vrot.slane %v8282_v38, %v11048_v5  ;;  %v7711_v60 = vcombine.high %v7709_v57, %v7709_v57  ;;  %v8330_v9 = vcombine.low %v7726_v21, %v7734_v24  ;;  %v8232_v29 = vrot.slane %v8225_v40, %v11048_v5 }
 0x2f9   : > { %6588 = vst.msk [vmem:[#allocation2 + $0x48] sm:$0xf] %vm6569_vm9, %v6531_v13  ;;  %v8249_v26 = vcombine.low %v8241_v4, %v8248_v20  ;;  %v8313_v33 = vrot.slane %v8305_v23, %v11048_v5  ;;  %v8320_v34 = vrot.slane %v8306_v19, %v11048_v5  ;;  %v8280_v27 = vrot.slane %v8273_v54, %v11048_v5 }
 0x2fa   : > { %v6834_v3 = vpop.permute.xlu1 %6833  ;;  %v8297_v46 = vcombine.low %v8289_v44, %v8296_v59  ;;  %v8329_v28 = vcombine.low %v7711_v60, %v7733_v31  ;;  %v8344_v57 = vrot.slane %v8330_v9, %v11048_v5  ;;  %8631 = vrot.lane.b32.xlu0 %v8232_v29, %s10797_s14  ;;  %v8368_v49 = vrot.slane %v14879_v7, %v11048_v5 }
 0x2fb   : > { %6890 = vst.msk [vmem:[#allocation2 + $0x4c] sm:$0xf] %vm6870_vm10, %v6834_v3  ;;  %v8256_v21 = vrot.slane %v8249_v26, %v11048_v5  ;;  %v8321_v24 = vcombine.low %v8313_v33, %v8320_v34  ;;  %v7945_v16 = vcombine.high %v15202_v32, %v15202_v32  ;;  %v8378_v63 = vcombine.low %v14814_v8, %v14962_v50 }
 0x2fc   : > { %v6832_v18 = vpop.permute.xlu0 %6831  ;;  %v8337_v31 = vrot.slane %v8329_v28, %v11048_v5  ;;  %v7805_v13 = vcombine.high %v14986_v42, %v14986_v42  ;;  %v8304_v7 = vrot.slane %v8297_v46, %v11048_v5  ;;  %v8369_v25 = vcombine.low %v8361_v52, %v8368_v49 }
 0x2fd   : > { %6889 = vst.msk [vmem:[#allocation2 + $0x48] sm:$0xf] %vm6870_vm10, %v6832_v18  ;;  %8633 = vrot.lane.b32.xlu1 %v8256_v21, %s10797_s14  ;;  %v8402_v61 = vcombine.low %v7804_v39, %v14947_v0  ;;  %v8425_v8 = vcombine.low %v14991_v17, %v15072_v48  ;;  %v8392_v43 = vrot.slane %v8378_v63, %v11048_v5 }
 0x2fe   : > { %v3489_v11 = vpop.permute.xlu1 %3488  ;;  %v8345_v20 = vcombine.low %v8337_v31, %v8344_v57  ;;  %v8401_v30 = vcombine.low %v14986_v42, %v7805_v13  ;;  %v8426_v62 = vcombine.low %v7828_v58, %v15097_v22  ;;  %8635 = vrot.lane.b32.xlu0 %v8280_v27, %s10797_s14  ;;  %v8328_v50 = vrot.slane %v8321_v24, %v11048_v5 }
 0x2ff   : > { %10480 = vmatmul.mubr.msk.bf16.gmra.mrb[48].mxu1 %vm7028_vm11, %v10642_v55  ;;  %3543 = vst.msk [vmem:[#allocation2 + $0x54] sm:$0xf] %vm3521_vm1, %v3489_v11  ;;  %v8416_v52 = vrot.slane %v8402_v61, %v11048_v5  ;;  %v8433_v39 = vrot.slane %v8425_v8, %v11048_v5  ;;  %v7852_v17 = vcombine.high %v15097_v22, %v15097_v22 }
 0x300   : > { %10483 = vmatprep.mubr.msk.bf16.mxu1 %vm10799_vm8, %v16385_v15  ;;  %v3487_v37 = vpop.permute.xlu0 %3486  ;;  %v8352_v44 = vrot.slane %v8345_v20, %v11048_v5  ;;  %v8393_v42 = vcombine.low %v8385_v1, %v8392_v43  ;;  %v8409_v0 = vrot.slane %v8401_v30, %v11048_v5  ;;  %v8440_v58 = vrot.slane %v8426_v62, %v11048_v5  ;;  %v10716_v62 = vld.sshfl [vmem:[%s10927_s24 + $0x64] sm:$0x33 pattern:$0x75316420] }
 0x301   : > { %3542 = vst.msk [vmem:[#allocation2 + $0x50] sm:$0xf] %vm3521_vm1, %v3487_v37  ;;  %8637 = vrot.lane.b32.xlu1 %v8304_v7, %s10797_s14  ;;  %v8449_v22 = vcombine.low %v7851_v47, %v15081_v10  ;;  %v8450_v23 = vcombine.low %v7852_v17, %v15110_v45  ;;  %v8473_v53 = vcombine.low %v7875_v2, %v15129_v14  ;;  %v15359_v17 = vld [vmem:[%s15737_s4] ss:$0 sm:$0xff] }
 0x302   : > { %v4046_v38 = vpop.permute.xlu1 %4045  ;;  %v8474_v1 = vcombine.low %v15104_v51, %v7898_v12  ;;  %v8376_v19 = vrot.slane %v8369_v25, %v11048_v5  ;;  %v8417_v3 = vcombine.low %v8409_v0, %v8416_v52  ;;  %v8441_v54 = vcombine.low %v8433_v39, %v8440_v58  ;;  %8639 = vrot.lane.b32.xlu0 %v8328_v50, %s10797_s14  ;;  %v10717_v50 = vld.sshfl [vmem:[%s10927_s24 + $0x68] sm:$0x33 pattern:$0x75316420] }
 0x303   : > { %4100 = vst.msk [vmem:[#allocation2 + $0x54] sm:$0xf] %vm4078_vm2, %v4046_v38  ;;  %v7899_v48 = vcombine.high %v15129_v14, %v15129_v14  ;;  %v8457_v10 = vrot.slane %v8449_v22, %v11048_v5  ;;  %v8464_v47 = vrot.slane %v8450_v23, %v11048_v5  ;;  %v8481_v45 = vrot.slane %v8473_v53, %v11048_v5  ;;  %v15365_v58 = vld.sshfl [vmem:[%s10927_s24 + $0x6c] sm:$0x33 pattern:$0x75316420] }
 0x304   : > { %v4044_v40 = vpop.permute.xlu0 %4043  ;;  %v10643_v4 = vld [vmem:[#allocation2 + $0x48] sm:$0xff]   ;;  %v8400_v2 = vrot.slane %v8393_v42, %v11048_v5  ;;  %v8488_v12 = vrot.slane %v8474_v1, %v11048_v5  ;;  %v8498_v9 = vcombine.low %v15119_v41, %v7922_v35  ;;  %v7946_v18 = vcombine.high %v15208_v56, %v15208_v56 }
 0x305   : > { %4099 = vst.msk [vmem:[#allocation2 + $0x50] sm:$0xf] %vm4078_vm2, %v4044_v40  ;;  %v8497_v14 = vcombine.low %v7899_v48, %v15153_v6  ;;  %8641 = vrot.lane.b32.xlu1 %v8352_v44, %s10797_s14  ;;  %v8465_v60 = vcombine.low %v8457_v10, %v8464_v47  ;;  %v8521_v55 = vcombine.low %v15202_v32, %v7945_v16 }
 0x306   : > { %v4619_v51 = vpop.permute.xlu1 %4618  ;;  %v8489_v29 = vcombine.low %v8481_v45, %v8488_v12  ;;  %8643 = vrot.lane.b32.xlu0 %v8376_v19, %s10797_s14  ;;  %v8424_v26 = vrot.slane %v8417_v3, %v11048_v5  ;;  %v8512_v33 = vrot.slane %v8498_v9, %v11048_v5  ;;  %v8522_v34 = vcombine.low %v15208_v56, %v7946_v18 }
 0x307   : > { %10484 = vmatmul.mubr.msk.bf16.gmra.mrb[52].mxu1 %vm7028_vm11, %v10643_v4  ;;  %4673 = vst.msk [vmem:[#allocation2 + $0x54] sm:$0xf] %vm4651_vm3, %v4619_v51  ;;  %v8505_v6 = vrot.slane %v8497_v14, %v11048_v5  ;;  %v8448_v35 = vrot.slane %v8441_v54, %v11048_v5  ;;  %v8529_v46 = vrot.slane %v8521_v55, %v11048_v5 }
 0x308   : > { %10487 = vmatprep.mubr.msk.bf16.mxu1 %vm10799_vm8, %v16385_v15  ;;  %v4617_v59 = vpop.permute.xlu0 %4616  ;;  %v8536_v28 = vrot.slane %v8522_v34, %v11048_v5  ;;  %v8472_v57 = vrot.slane %v8465_v60, %v11048_v5  ;;  %v8496_v24 = vrot.slane %v8489_v29, %v11048_v5  ;;  %v7954_v38 = vcombine.high %v10716_v62, %v10716_v62 }
 0x309   : > { %4672 = vst.msk [vmem:[#allocation2 + $0x50] sm:$0xf] %vm4651_vm3, %v4617_v59  ;;  %8645 = vrot.lane.b32.xlu1 %v8400_v2, %s10797_s14  ;;  %v8513_v32 = vcombine.low %v8505_v6, %v8512_v33  ;;  %v7961_v44 = vrot.slane %v10716_v62, %v16424_v36  ;;  %v7977_v42 = vcombine.high %v10717_v50, %v10717_v50 }
 0x30a   : > { %v5201_v27 = vpop.permute.xlu1 %5200  ;;  %8647 = vrot.lane.b32.xlu0 %v8424_v26, %s10797_s14  ;;  %v8537_v49 = vcombine.low %v8529_v46, %v8536_v28  ;;  %v7984_v0 = vrot.slane %v10717_v50, %v16424_v36  ;;  %v7968_v19 = vrot.slane %v7954_v38, %v16424_v36  ;;  %v8008_v51 = vrot.slane %v15365_v58, %v16424_v36 }
 0x30b   : > { %5255 = vst.msk [vmem:[#allocation2 + $0x54] sm:$0xf] %vm5233_vm4, %v5201_v27  ;;  %v8520_v16 = vrot.slane %v8513_v32, %v11048_v5  ;;  %v7969_v10 = vcombine.high %v7961_v44, %v7961_v44  ;;  %v7991_v47 = vrot.slane %v7977_v42, %v16424_v36 }
 0x30c   : > { %v5199_v41 = vpop.permute.xlu0 %5198  ;;  %v8544_v63 = vrot.slane %v8537_v49, %v11048_v5  ;;  %v7992_v45 = vcombine.high %v7984_v0, %v7984_v0  ;;  %v8546_v18 = vcombine.low %v7968_v19, %v7984_v0 }
 0x30d   : > { %5254 = vst.msk [vmem:[#allocation2 + $0x50] sm:$0xf] %vm5233_vm4, %v5199_v41  ;;  %8649 = vrot.lane.b32.xlu1 %v8448_v35, %s10797_s14  ;;  %v8545_v9 = vcombine.low %v7961_v44, %v7969_v10  ;;  %v7993_v55 = vcombine.high %v7991_v47, %v7991_v47  ;;  %v10648_v44 = vld [vmem:[%s15738_s5 + $0x8] ss:$0 sps:$4 sm:$0xff]  }
 0x30e   : > { %v5502_v56 = vpop.permute.xlu1 %5501  ;;  %8651 = vrot.lane.b32.xlu0 %v8472_v57, %s10797_s14  ;;  %v8570_v29 = vcombine.low %v7992_v45, %v8008_v51  ;;  %v8560_v34 = vrot.slane %v8546_v18, %v11048_v5 }
 0x30f   : > { %5556 = vst.msk [vmem:[#allocation2 + $0x54] sm:$0xf] %vm5534_vm5, %v5502_v56  ;;  %v8553_v33 = vrot.slane %v8545_v9, %v11048_v5  ;;  %v8569_v27 = vcombine.low %v7991_v47, %v7993_v55 }
 0x310   : > { %v5500_v21 = vpop.permute.xlu0 %5499  ;;  %v8584_v41 = vrot.slane %v8570_v29, %v11048_v5 }
 0x311   : > { %5555 = vst.msk [vmem:[#allocation2 + $0x50] sm:$0xf] %vm5534_vm5, %v5500_v21  ;;  %8653 = vrot.lane.b32.xlu1 %v8496_v24, %s10797_s14  ;;  %v8561_v35 = vcombine.low %v8553_v33, %v8560_v34  ;;  %v8577_v32 = vrot.slane %v8569_v27, %v11048_v5 }
 0x312   : > { %v5955_v11 = vpop.permute.xlu1 %5954  ;;  %8655 = vrot.lane.b32.xlu0 %v8520_v16, %s10797_s14  ;;  %v8001_v16 = vcombine.high %v15365_v58, %v15365_v58 }
 0x313   : > { %6009 = vst.msk [vmem:[#allocation2 + $0x54] sm:$0xf] %vm5987_vm6, %v5955_v11  ;;  %v8568_v57 = vrot.slane %v8561_v35, %v11048_v5  ;;  %v8585_v56 = vcombine.low %v8577_v32, %v8584_v41 }
 0x314   : > { %v5953_v31 = vpop.permute.xlu0 %5952 }
 0x315   : > { %6008 = vst.msk [vmem:[#allocation2 + $0x50] sm:$0xf] %vm5987_vm6, %v5953_v31  ;;  %8657 = vrot.lane.b32.xlu1 %v8544_v63, %s10797_s14  ;;  %v8592_v21 = vrot.slane %v8585_v56, %v11048_v5  ;;  %v10647_v63 = vld [vmem:[%s15738_s5] sm:$0xff]  }
 0x316   : > { %v6537_v13 = vpop.permute.xlu1 %6536  ;;  %8659 = vrot.lane.b32.xlu0 %v8568_v57, %s10797_s14  ;;  %10500 = vmatpush3.bf16.msra.mxu0 %v10647_v63 }
 0x317   : > { %6591 = vst.msk [vmem:[#allocation2 + $0x54] sm:$0xf] %vm6569_vm9, %v6537_v13  ;;  %v8015_v13 = vrot.slane %v8001_v16, %v16424_v36  ;;  %10501 = vmatprep.subr.bf16.mxu0 %v16385_v15 }
 0x318   : > { %v6535_v37 = vpop.permute.xlu0 %6534 }
 0x319   : > { %6590 = vst.msk [vmem:[#allocation2 + $0x50] sm:$0xf] %vm6569_vm9, %v6535_v37  ;;  %8661 = vrot.lane.b32.xlu1 %v8592_v21, %s10797_s14  ;;  %v8016_v37 = vcombine.high %v8008_v51, %v8008_v51 }
 0x31a   : > { %v6838_v7 = vpop.permute.xlu1 %6837 }
 0x31b   : > { %6892 = vst.msk [vmem:[#allocation2 + $0x54] sm:$0xf] %vm6870_vm10, %v6838_v7 }
 0x31c   : > { %v6836_v25 = vpop.permute.xlu0 %6835 }
 0x31d   : > { %6891 = vst.msk [vmem:[#allocation2 + $0x50] sm:$0xf] %vm6870_vm10, %v6836_v25 }
 0x31e   : > { %v3493_v61 = vpop.permute.xlu1 %3492 }
 0x31f   : > { %3545 = vst.msk [vmem:[#allocation2 + $0x5c] sm:$0xf] %vm3521_vm1, %v3493_v61 }
 0x320   : > { %v3491_v8 = vpop.permute.xlu0 %3490 }
 0x321   : > { %3544 = vst.msk [vmem:[#allocation2 + $0x58] sm:$0xf] %vm3521_vm1, %v3491_v8  ;;  %vm5258_vm1 = vcmask 320768   ;;  %v8599_v8 = vrot.slane %v8015_v13, %v11048_v5 }
 0x322   : > { %v4050_v20 = vpop.permute.xlu1 %4049 }
 0x323   : > { %4102 = vst.msk [vmem:[#allocation2 + $0x5c] sm:$0xf] %vm4078_vm2, %v4050_v20  ;;  %v8606_v20 = vrot.slane %v8016_v37, %v11048_v5 }
 0x324   : > { %v4048_v43 = vpop.permute.xlu0 %4047  ;;  %v10644_v30 = vld [vmem:[#allocation2 + $0x50] sm:$0xff]  }
 0x325   : > { %4101 = vst.msk [vmem:[#allocation2 + $0x58] sm:$0xf] %vm4078_vm2, %v4048_v43  ;;  %10488 = vmatmul.mubr.msk.bf16.gmra.mrb[56].mxu1 %vm7028_vm11, %v10644_v30  ;;  %v7106_v40 = vpop.f32.mrb[16].mxu1  ;;  %vm5559_vm2 = vcmask 386368   ;;  %v8607_v43 = vcombine.low %v8599_v8, %v8606_v20 }
 0x326   : > { %v4623_v52 = vpop.permute.xlu1 %4622  ;;  %10491 = vmatprep.mubr.msk.bf16.mxu1 %vm10799_vm8, %v16385_v15  ;;  %v7107_v4 = vadd.f32 %v15359_v17, %v7106_v40  ;;  %v10449_v22 = vpop.f32.mrb[17].mxu1 }
 0x327   : > { %4675 = vst.msk [vmem:[#allocation2 + $0x5c] sm:$0xf] %vm4651_vm3, %v4623_v52  ;;  %v7109_v1 = vpop.f32.mrb[18].mxu1  ;;  %v8614_v62 = vrot.slane %v8607_v43, %v11048_v5  ;;  %v8865_v5 = vsel %vm7068_vm7, %v10648_v44, 0  ;;  %vm9959_vm7 = vcmask 261120  }
 0x328   : > { %v4621_v39 = vpop.permute.xlu0 %4620  ;;  %v7208_v3 = vmax.f32 %v7107_v4, 0.0  ;;  %v7110_v54 = vadd.f32 %v15359_v17, %v7109_v1  ;;  %v10450_v48 = vpop.f32.mrb[19].mxu1  ;;  %10502 = vmatpush3.bf16.msra.mxu0 %v8865_v5 }
 0x329   : > { %4674 = vst.msk [vmem:[#allocation2 + $0x58] sm:$0xf] %vm4651_vm3, %v4621_v39  ;;  %vm6012_vm3 = vcmask 451968   ;;  %8663 = vrot.lane.b32.xlu0 %v8614_v62, %s10797_s14  ;;  %s10557_s14 = smul.u32 224, %s16457_s28 }
 0x32a   : > { %v5205_v23 = vpop.permute.xlu1 %5204  ;;  %v10328_v2 = vpack.c.bf16 %v7208_v3, %v7208_v3  ;;  %v7209_v12 = vmax.f32 %v7110_v54, 0.0 }
 0x32b   : > { %5257 = vst.msk [vmem:[#allocation2 + $0x5c] sm:$0xf] %vm5233_vm4, %v5205_v23  ;;  %s15542_s30 = scalar_lea.vmem %s15740_s7, %s10557_s14 }
 0x32c   : > { %v5203_v53 = vpop.permute.xlu0 %5202  ;;  %7334 = vst.msk [vmem:[#allocation3] sm:$0xf] %vm1994_vm0, %v10328_v2  ;;  %v10329_v60 = vpack.c.bf16 %v7209_v12, %v7209_v12 }
 0x32d   : > { %5256 = vst.msk [vmem:[#allocation2 + $0x58] sm:$0xf] %vm5233_vm4, %v5203_v53  ;;  %vm6594_vm4 = vcmask 517568  }
 0x32e   : > { %v5506_v14 = vpop.permute.xlu1 %5505  ;;  %7335 = vst.msk [vmem:[#allocation3 + $0x4] sm:$0xf] %vm1994_vm0, %v10329_v60 }
 0x32f   : > { %5558 = vst.msk [vmem:[#allocation2 + $0x5c] sm:$0xf] %vm5534_vm5, %v5506_v14 }
 0x330   : > { %v5504_v59 = vpop.permute.xlu0 %5503 }
 0x331   : > { %5557 = vst.msk [vmem:[#allocation2 + $0x58] sm:$0xf] %vm5534_vm5, %v5504_v59  ;;  %vm6895_vm5 = vcmask 583168  }
 0x332   : > { %v5959_v6 = vpop.permute.xlu1 %5958 }
 0x333   : > { %6011 = vst.msk [vmem:[#allocation2 + $0x5c] sm:$0xf] %vm5987_vm6, %v5959_v6 }
 0x334   : > { %v5957_v26 = vpop.permute.xlu0 %5956 }
 0x335   : > { %6010 = vst.msk [vmem:[#allocation2 + $0x58] sm:$0xf] %vm5987_vm6, %v5957_v26  ;;  %vm8690_vm6 = vcmask 191552  }
 0x336   : > { %v6541_v46 = vpop.permute.xlu1 %6540 }
 0x337   : > { %6593 = vst.msk [vmem:[#allocation2 + $0x5c] sm:$0xf] %vm6569_vm9, %v6541_v46 }
 0x338   : > { %v6539_v28 = vpop.permute.xlu0 %6538 }
 0x339   : > { %6592 = vst.msk [vmem:[#allocation2 + $0x58] sm:$0xf] %vm6569_vm9, %v6539_v28  ;;  %vm8824_vm9 = vcmask 195584  }
 0x33a   : > { %v6842_v24 = vpop.permute.xlu1 %6841 }
 0x33b   : > { %6894 = vst.msk [vmem:[#allocation2 + $0x5c] sm:$0xf] %vm6870_vm10, %v6842_v24 }
 0x33c   : > { %v6840_v49 = vpop.permute.xlu0 %6839 }
 0x33d   : > { %6893 = vst.msk [vmem:[#allocation2 + $0x58] sm:$0xf] %vm6870_vm10, %v6840_v49 }
 0x33e   : > { %v4052_v11 = vpop.permute.xlu1 %4051 }
 0x340   : > { %v3495_v31 = vpop.permute.xlu0 %3494 }
 0x341   : > { %3547 = vst.msk [vmem:[#allocation2 + $0x60] sm:$0x3] %vm3546_vm13, %v3495_v31 }
 0x342   : > { %4104 = vst.msk [vmem:[#allocation2 + $0x60] sm:$0x3] %vm4103_vm14, %v4052_v11  ;;  %v5207_v7 = vpop.permute.xlu1 %5206 }
 0x344   : > { %v4625_v25 = vpop.permute.xlu0 %4624  ;;  %v10645_v61 = vld [vmem:[#allocation2 + $0x58] sm:$0xff]  }
 0x345   : > { %4677 = vst.msk [vmem:[#allocation2 + $0x60] sm:$0x3] %vm4676_vm15, %v4625_v25  ;;  %10492 = vmatmul.mubr.msk.bf16.gmra.mrb[60].mxu1 %vm7028_vm11, %v10645_v61 }
 0x346   : > { %5259 = vst.msk [vmem:[#allocation2 + $0x60] sm:$0x3] %vm5258_vm1, %v5207_v7  ;;  %v5961_v30 = vpop.permute.xlu1 %5960  ;;  %10495 = vmatprep.mubr.msk.bf16.mxu1 %vm10799_vm8, %v16385_v15 }
 0x348   : > { %v5508_v36 = vpop.permute.xlu0 %5507 }
 0x349   : > { %5560 = vst.msk [vmem:[#allocation2 + $0x60] sm:$0x3] %vm5559_vm2, %v5508_v36 }
 0x34a   : > { %6013 = vst.msk [vmem:[#allocation2 + $0x60] sm:$0x3] %vm6012_vm3, %v5961_v30  ;;  %v6844_v50 = vpop.permute.xlu1 %6843 }
 0x34c   : > { %v6543_v52 = vpop.permute.xlu0 %6542 }
 0x34d   : > { %6595 = vst.msk [vmem:[#allocation2 + $0x60] sm:$0x3] %vm6594_vm4, %v6543_v52 }
 0x34e   : > { %6896 = vst.msk [vmem:[#allocation2 + $0x60] sm:$0x3] %vm6895_vm5, %v6844_v50  ;;  %v8618_v39 = vpop.permute.xlu1 %8617 }
 0x34f   : > { %8692 = vst.msk [vmem:[#allocation3 + $0x4] sm:$0xf] %vm8690_vm6, %v8618_v39 }
 0x350   : > { %v8616_v38 = vpop.permute.xlu0 %8615 }
 0x351   : > { %8691 = vst.msk [vmem:[#allocation3] sm:$0xf] %vm8690_vm6, %v8616_v38 }
 0x352   : > { %v8622_v10 = vpop.permute.xlu1 %8621 }
 0x354   : > { %v8620_v54 = vpop.permute.xlu0 %8619 }
 0x355   : > { %v10646_v42 = vld [vmem:[#allocation2 + $0x60] ss:$0 sps:$4 sm:$0x33]  }
 0x356   : > { %10496 = vmatmul.mubr.msk.bf16.gmra.mrb[64].mxu1 %vm7028_vm11, %v10646_v42 }
 0x358   : > { %v10649_v0 = vld [vmem:[#allocation3] sm:$0xff]  }
 0x359   : > { %10504 = vmatmul.mubr.msk.bf16.vlgmr.msra.gmra.mrb[16].mxu0 %vm8824_vm9, %v10649_v0  ;;  %v7114_v58 = vpop.f32.mrb[20].mxu1 }
 0x35a   : > { %10507 = vmatprep.mubr.msk.bf16.mxu0 %vm10799_vm8, %v16385_v15  ;;  %v7115_v40 = vadd.f32 %v15359_v17, %v7114_v58  ;;  %v10453_v4 = vpop.f32.mrb[21].mxu1 }
 0x35b   : > { %v7117_v22 = vpop.f32.mrb[22].mxu1 }
 0x35c   : > { %v7210_v23 = vmax.f32 %v7115_v40, 0.0  ;;  %v7118_v53 = vadd.f32 %v15359_v17, %v7117_v22  ;;  %v10454_v1 = vpop.f32.mrb[23].mxu1 }
 0x35e   : > { %v10330_v19 = vpack.c.bf16 %v7210_v23, %v7210_v23  ;;  %v7211_v3 = vmax.f32 %v7118_v53, 0.0  ;;  %v8626_v6 = vpop.permute.xlu1 %8625 }
 0x360   : > { %7336 = vst.msk [vmem:[#allocation3 + $0x8] sm:$0xf] %vm1994_vm0, %v10330_v19  ;;  %v10331_v48 = vpack.c.bf16 %v7211_v3, %v7211_v3  ;;  %v8624_v55 = vpop.permute.xlu0 %8623 }
 0x361   : > { %8693 = vst.msk [vmem:[#allocation3 + $0x8] sm:$0xf] %vm8690_vm6, %v8620_v54 }
 0x362   : > { %7337 = vst.msk [vmem:[#allocation3 + $0xc] sm:$0xf] %vm1994_vm0, %v10331_v48  ;;  %v8630_v24 = vpop.permute.xlu1 %8629 }
 0x363   : > { %8694 = vst.msk [vmem:[#allocation3 + $0xc] sm:$0xf] %vm8690_vm6, %v8622_v10 }
 0x364   : > { %v8628_v56 = vpop.permute.xlu0 %8627 }
 0x36a   : > { %v10650_v2 = vld [vmem:[#allocation3 + $0x8] sm:$0xff]  }
 0x36b   : > { %v7122_v47 = vpop.f32.mrb[24].mxu1  ;;  %10508 = vmatmul.mubr.msk.bf16.gmra.mrb[20].mxu0 %vm8824_vm9, %v10650_v2 }
 0x36c   : > { %v7123_v45 = vadd.f32 %v15359_v17, %v7122_v47  ;;  %v10457_v51 = vpop.f32.mrb[25].mxu1  ;;  %10511 = vmatprep.mubr.msk.bf16.mxu0 %vm10799_vm8, %v16385_v15  ;;  %v8632_v61 = vpop.permute.xlu0 %8631 }
 0x36d   : > { %v7125_v12 = vpop.f32.mrb[26].mxu1 }
 0x36e   : > { %v7212_v14 = vmax.f32 %v7123_v45, 0.0  ;;  %v7126_v59 = vadd.f32 %v15359_v17, %v7125_v12  ;;  %v10458_v60 = vpop.f32.mrb[27].mxu1 }
 0x36f   : > { %v8634_v20 = vpop.permute.xlu1 %8633 }
 0x370   : > { %v10332_v9 = vpack.c.bf16 %v7212_v14, %v7212_v14  ;;  %v7213_v18 = vmax.f32 %v7126_v59, 0.0  ;;  %v8636_v42 = vpop.permute.xlu0 %8635 }
 0x372   : > { %7338 = vst.msk [vmem:[#allocation3 + $0x10] sm:$0xf] %vm1994_vm0, %v10332_v9  ;;  %v10333_v29 = vpack.c.bf16 %v7213_v18, %v7213_v18 }
 0x373   : > { %8695 = vst.msk [vmem:[#allocation3 + $0x10] sm:$0xf] %vm8690_vm6, %v8624_v55  ;;  %v8638_v58 = vpop.permute.xlu1 %8637 }
 0x374   : > { %7339 = vst.msk [vmem:[#allocation3 + $0x14] sm:$0xf] %vm1994_vm0, %v10333_v29  ;;  %v8640_v10 = vpop.permute.xlu0 %8639 }
 0x375   : > { %8696 = vst.msk [vmem:[#allocation3 + $0x14] sm:$0xf] %vm8690_vm6, %v8626_v6 }
 0x377   : > { %v8642_v45 = vpop.permute.xlu1 %8641 }
 0x378   : > { %v8644_v6 = vpop.permute.xlu0 %8643 }
 0x37c   : > { %v10651_v26 = vld [vmem:[#allocation3 + $0x10] sm:$0xff]  }
 0x37d   : > { %10512 = vmatmul.mubr.msk.bf16.gmra.mrb[24].mxu0 %vm8824_vm9, %v10651_v26 }
 0x37e   : > { %10515 = vmatprep.mubr.msk.bf16.mxu0 %vm10799_vm8, %v16385_v15 }
 0x3a7   : > { %v7130_v33 = vpop.f32.mrb[28].mxu1 }
 0x3a8   : > { %v7131_v34 = vadd.f32 %v15359_v17, %v7130_v33  ;;  %v10461_v27 = vpop.f32.mrb[29].mxu1  ;;  %v8646_v33 = vpop.permute.xlu1 %8645 }
 0x3a9   : > { %v7133_v41 = vpop.f32.mrb[30].mxu1 }
 0x3aa   : > { %v7214_v35 = vmax.f32 %v7131_v34, 0.0  ;;  %v7134_v32 = vadd.f32 %v15359_v17, %v7133_v41  ;;  %v10462_v46 = vpop.f32.mrb[31].mxu1 }
 0x3ac   : > { %v10334_v28 = vpack.c.bf16 %v7214_v35, %v7214_v35  ;;  %v7215_v57 = vmax.f32 %v7134_v32, 0.0 }
 0x3ae   : > { %7340 = vst.msk [vmem:[#allocation3 + $0x18] sm:$0xf] %vm1994_vm0, %v10334_v28  ;;  %v10335_v21 = vpack.c.bf16 %v7215_v57, %v7215_v57 }
 0x3af   : > { %v7138_v49 = vpop.f32.mrb[32].mxu1  ;;  %8697 = vst.msk [vmem:[#allocation3 + $0x18] sm:$0xf] %vm8690_vm6, %v8628_v56 }
 0x3b0   : > { %7341 = vst.msk [vmem:[#allocation3 + $0x1c] sm:$0xf] %vm1994_vm0, %v10335_v21  ;;  %v7139_v16 = vadd.f32 %v15359_v17, %v7138_v49  ;;  %v10465_v11 = vpop.f32.mrb[33].mxu1 }
 0x3b1   : > { %v7141_v31 = vpop.f32.mrb[34].mxu1  ;;  %8698 = vst.msk [vmem:[#allocation3 + $0x1c] sm:$0xf] %vm8690_vm6, %v8630_v24  ;;  %v8648_v24 = vpop.permute.xlu0 %8647 }
 0x3b2   : > { %v7216_v63 = vmax.f32 %v7139_v16, 0.0  ;;  %v7142_v13 = vadd.f32 %v15359_v17, %v7141_v31  ;;  %v10466_v37 = vpop.f32.mrb[35].mxu1  ;;  %v8650_v16 = vpop.permute.xlu1 %8649 }
 0x3b4   : > { %v10336_v7 = vpack.c.bf16 %v7216_v63, %v7216_v63  ;;  %v7217_v25 = vmax.f32 %v7142_v13, 0.0 }
 0x3b6   : > { %7342 = vst.msk [vmem:[#allocation3 + $0x20] sm:$0xf] %vm1994_vm0, %v10336_v7  ;;  %v10337_v8 = vpack.c.bf16 %v7217_v25, %v7217_v25 }
 0x3b7   : > { %8699 = vst.msk [vmem:[#allocation3 + $0x20] sm:$0xf] %vm8690_vm6, %v8632_v61 }
 0x3b8   : > { %7343 = vst.msk [vmem:[#allocation3 + $0x24] sm:$0xf] %vm1994_vm0, %v10337_v8  ;;  %v10652_v62 = vld [vmem:[#allocation3 + $0x18] sm:$0xff]  }
 0x3b9   : > { %8700 = vst.msk [vmem:[#allocation3 + $0x24] sm:$0xf] %vm8690_vm6, %v8634_v20  ;;  %10516 = vmatmul.mubr.msk.bf16.gmra.mrb[28].mxu0 %vm8824_vm9, %v10652_v62 }
 0x3ba   : > { %v7146_v43 = vpop.f32.mrb[36].mxu1  ;;  %10519 = vmatprep.mubr.msk.bf16.mxu0 %vm10799_vm8, %v16385_v15 }
 0x3bb   : > { %v7147_v30 = vadd.f32 %v15359_v17, %v7146_v43  ;;  %v10469_v36 = vpop.f32.mrb[37].mxu1  ;;  %v8652_v43 = vpop.permute.xlu0 %8651 }
 0x3bc   : > { %v7149_v50 = vpop.f32.mrb[38].mxu1  ;;  %v8654_v36 = vpop.permute.xlu1 %8653 }
 0x3bd   : > { %v7218_v52 = vmax.f32 %v7147_v30, 0.0  ;;  %v7150_v39 = vadd.f32 %v15359_v17, %v7149_v50  ;;  %v10470_v38 = vpop.f32.mrb[39].mxu1 }
 0x3bf   : > { %v10338_v44 = vpack.c.bf16 %v7218_v52, %v7218_v52  ;;  %v7219_v5 = vmax.f32 %v7150_v39, 0.0 }
 0x3c0   : > { %v10653_v23 = vld [vmem:[#allocation3 + $0x20] sm:$0xff]  }
 0x3c1   : > { %7344 = vst.msk [vmem:[#allocation3 + $0x28] sm:$0xf] %vm1994_vm0, %v10338_v44  ;;  %v10339_v0 = vpack.c.bf16 %v7219_v5, %v7219_v5  ;;  %10520 = vmatmul.mubr.msk.bf16.gmra.mrb[32].mxu0 %vm8824_vm9, %v10653_v23  ;;  %v8658_v23 = vpop.permute.xlu1 %8657 }
 0x3c2   : > { %v7154_v40 = vpop.f32.mrb[40].mxu1  ;;  %8701 = vst.msk [vmem:[#allocation3 + $0x28] sm:$0xf] %vm8690_vm6, %v8636_v42  ;;  %10523 = vmatprep.mubr.msk.bf16.mxu0 %vm10799_vm8, %v16385_v15 }
 0x3c3   : > { %7345 = vst.msk [vmem:[#allocation3 + $0x2c] sm:$0xf] %vm1994_vm0, %v10339_v0  ;;  %v7155_v4 = vadd.f32 %v15359_v17, %v7154_v40  ;;  %v10473_v22 = vpop.f32.mrb[41].mxu1 }
 0x3c4   : > { %v7157_v53 = vpop.f32.mrb[42].mxu1  ;;  %8702 = vst.msk [vmem:[#allocation3 + $0x2c] sm:$0xf] %vm8690_vm6, %v8638_v58 }
 0x3c5   : > { %v7220_v1 = vmax.f32 %v7155_v4, 0.0  ;;  %v7158_v19 = vadd.f32 %v15359_v17, %v7157_v53  ;;  %v10474_v3 = vpop.f32.mrb[43].mxu1  ;;  %v8656_v4 = vpop.permute.xlu0 %8655 }
 0x3c7   : > { %v10340_v54 = vpack.c.bf16 %v7220_v1, %v7220_v1  ;;  %v7221_v48 = vmax.f32 %v7158_v19, 0.0 }
 0x3c9   : > { %7346 = vst.msk [vmem:[#allocation3 + $0x30] sm:$0xf] %vm1994_vm0, %v10340_v54  ;;  %v10341_v47 = vpack.c.bf16 %v7221_v48, %v7221_v48 }
 0x3ca   : > { %v7162_v51 = vpop.f32.mrb[44].mxu1  ;;  %8703 = vst.msk [vmem:[#allocation3 + $0x30] sm:$0xf] %vm8690_vm6, %v8640_v10 }
 0x3cb   : > { %7347 = vst.msk [vmem:[#allocation3 + $0x34] sm:$0xf] %vm1994_vm0, %v10341_v47  ;;  %v7163_v2 = vadd.f32 %v15359_v17, %v7162_v51  ;;  %v10477_v12 = vpop.f32.mrb[45].mxu1  ;;  %v10654_v14 = vld [vmem:[#allocation3 + $0x28] sm:$0xff]  }
 0x3cc   : > { %v7165_v59 = vpop.f32.mrb[46].mxu1  ;;  %8704 = vst.msk [vmem:[#allocation3 + $0x34] sm:$0xf] %vm8690_vm6, %v8642_v45  ;;  %10524 = vmatmul.mubr.msk.bf16.gmra.mrb[36].mxu0 %vm8824_vm9, %v10654_v14  ;;  %v8662_v14 = vpop.permute.xlu1 %8661 }
 0x3cd   : > { %v7222_v60 = vmax.f32 %v7163_v2, 0.0  ;;  %v7166_v9 = vadd.f32 %v15359_v17, %v7165_v59  ;;  %v10478_v18 = vpop.f32.mrb[47].mxu1  ;;  %10527 = vmatprep.mubr.msk.bf16.mxu0 %vm10799_vm8, %v16385_v15  ;;  %v8660_v2 = vpop.permute.xlu0 %8659  ;;  %v10800_v59 = vmov 1983009808  }
 0x3cf   : > { %v10342_v55 = vpack.c.bf16 %v7222_v60, %v7222_v60  ;;  %v7223_v29 = vmax.f32 %v7166_v9, 0.0  ;;  %v9055_v60 = vunpack.c.l.s4 %v10800_v59 }
 0x3d1   : > { %7348 = vst.msk [vmem:[#allocation3 + $0x38] sm:$0xf] %vm1994_vm0, %v10342_v55  ;;  %v10343_v26 = vpack.c.bf16 %v7223_v29, %v7223_v29  ;;  %v9056_v55 = vunpack.c.0.s8 %v9055_v60 }
 0x3d2   : > { %v7170_v34 = vpop.f32.mrb[48].mxu1  ;;  %8705 = vst.msk [vmem:[#allocation3 + $0x38] sm:$0xf] %vm8690_vm6, %v8644_v6 }
 0x3d3   : > { %7349 = vst.msk [vmem:[#allocation3 + $0x3c] sm:$0xf] %vm1994_vm0, %v10343_v26  ;;  %v7171_v27 = vadd.f32 %v15359_v17, %v7170_v34  ;;  %v10481_v41 = vpop.f32.mrb[49].mxu1  ;;  %v10655_v35 = vld [vmem:[#allocation3 + $0x30] sm:$0xff]   ;;  %v15517_v26 = vld [vmem:[%s15739_s6] ss:$0 sm:$0xff] }
 0x3d4   : > { %v7173_v32 = vpop.f32.mrb[50].mxu1  ;;  %8706 = vst.msk [vmem:[#allocation3 + $0x3c] sm:$0xf] %vm8690_vm6, %v8646_v33  ;;  %10528 = vmatmul.mubr.msk.bf16.gmra.mrb[40].mxu0 %vm8824_vm9, %v10655_v35 }
 0x3d5   : > { %v7224_v46 = vmax.f32 %v7171_v27, 0.0  ;;  %v7174_v28 = vadd.f32 %v15359_v17, %v7173_v32  ;;  %v10482_v57 = vpop.f32.mrb[51].mxu1  ;;  %10531 = vmatprep.mubr.msk.bf16.mxu0 %vm10799_vm8, %v16385_v15  ;;  %v16451_v32 = vld [vmem:[#allocation7_spill] sm:$0xff] }
 0x3d6   : > { %v8664_v57 = vpop.permute.xlu0 %8663 }
 0x3d7   : > { %v10344_v56 = vpack.c.bf16 %v7224_v46, %v7224_v46  ;;  %v7225_v21 = vmax.f32 %v7174_v28, 0.0 }
 0x3d9   : > { %7350 = vst.msk [vmem:[#allocation3 + $0x40] sm:$0xf] %vm1994_vm0, %v10344_v56  ;;  %v10345_v49 = vpack.c.bf16 %v7225_v21, %v7225_v21 }
 0x3da   : > { %v7178_v11 = vpop.f32.mrb[52].mxu1  ;;  %8707 = vst.msk [vmem:[#allocation3 + $0x40] sm:$0xf] %vm8690_vm6, %v8648_v24 }
 0x3db   : > { %7351 = vst.msk [vmem:[#allocation3 + $0x44] sm:$0xf] %vm1994_vm0, %v10345_v49  ;;  %v7179_v31 = vadd.f32 %v15359_v17, %v7178_v11  ;;  %v10485_v63 = vpop.f32.mrb[53].mxu1  ;;  %v10656_v13 = vld [vmem:[#allocation3 + $0x38] sm:$0xff]  }
 0x3dc   : > { %v7181_v37 = vpop.f32.mrb[54].mxu1  ;;  %8708 = vst.msk [vmem:[#allocation3 + $0x44] sm:$0xf] %vm8690_vm6, %v8650_v16  ;;  %10532 = vmatmul.mubr.msk.bf16.gmra.mrb[44].mxu0 %vm8824_vm9, %v10656_v13 }
 0x3dd   : > { %v7226_v7 = vmax.f32 %v7179_v31, 0.0  ;;  %v7182_v25 = vadd.f32 %v15359_v17, %v7181_v37  ;;  %v10486_v61 = vpop.f32.mrb[55].mxu1  ;;  %10535 = vmatprep.mubr.msk.bf16.mxu0 %vm10799_vm8, %v16385_v15 }
 0x3df   : > { %v10346_v8 = vpack.c.bf16 %v7226_v7, %v7226_v7  ;;  %v7227_v20 = vmax.f32 %v7182_v25, 0.0 }
 0x3e1   : > { %7352 = vst.msk [vmem:[#allocation3 + $0x48] sm:$0xf] %vm1994_vm0, %v10346_v8  ;;  %v10347_v30 = vpack.c.bf16 %v7227_v20, %v7227_v20 }
 0x3e2   : > { %8709 = vst.msk [vmem:[#allocation3 + $0x48] sm:$0xf] %vm8690_vm6, %v8652_v43 }
 0x3e3   : > { %7353 = vst.msk [vmem:[#allocation3 + $0x4c] sm:$0xf] %vm1994_vm0, %v10347_v30  ;;  %v10657_v62 = vld [vmem:[#allocation3 + $0x40] sm:$0xff]  }
 0x3e4   : > { %8710 = vst.msk [vmem:[#allocation3 + $0x4c] sm:$0xf] %vm8690_vm6, %v8654_v36  ;;  %10536 = vmatmul.mubr.msk.bf16.gmra.mrb[48].mxu0 %vm8824_vm9, %v10657_v62 }
 0x3e5   : > { %10539 = vmatprep.mubr.msk.bf16.mxu0 %vm10799_vm8, %v16385_v15 }
 0x3eb   : > { %v10658_v50 = vld [vmem:[#allocation3 + $0x48] sm:$0xff]  }
 0x3ec   : > { %10540 = vmatmul.mubr.msk.bf16.gmra.mrb[52].mxu0 %vm8824_vm9, %v10658_v50 }
 0x3ed   : > { %10543 = vmatprep.mubr.msk.bf16.mxu0 %vm10799_vm8, %v16385_v15 }
 0x3f8   : > { %v7186_v52 = vpop.f32.mrb[56].mxu1 }
 0x3f9   : > { %v7187_v39 = vadd.f32 %v15359_v17, %v7186_v52  ;;  %v10489_v38 = vpop.f32.mrb[57].mxu1 }
 0x3fa   : > { %v7189_v44 = vpop.f32.mrb[58].mxu1 }
 0x3fb   : > { %v7228_v5 = vmax.f32 %v7187_v39, 0.0  ;;  %v7190_v42 = vadd.f32 %v15359_v17, %v7189_v44  ;;  %v10490_v0 = vpop.f32.mrb[59].mxu1 }
 0x3fd   : > { %v10348_v58 = vpack.c.bf16 %v7228_v5, %v7228_v5  ;;  %v7229_v40 = vmax.f32 %v7190_v42, 0.0 }
 0x3ff   : > { %7354 = vst.msk [vmem:[#allocation3 + $0x50] sm:$0xf] %vm1994_vm0, %v10348_v58  ;;  %v10349_v22 = vpack.c.bf16 %v7229_v40, %v7229_v40 }
 0x400   : > { %8711 = vst.msk [vmem:[#allocation3 + $0x50] sm:$0xf] %vm8690_vm6, %v8656_v4 }
 0x401   : > { %7355 = vst.msk [vmem:[#allocation3 + $0x54] sm:$0xf] %vm1994_vm0, %v10349_v22 }
 0x402   : > { %8712 = vst.msk [vmem:[#allocation3 + $0x54] sm:$0xf] %vm8690_vm6, %v8658_v23 }
 0x409   : > { %v10659_v53 = vld [vmem:[#allocation3 + $0x50] sm:$0xff]  }
 0x40a   : > { %10544 = vmatmul.mubr.msk.bf16.gmra.mrb[56].mxu0 %vm8824_vm9, %v10659_v53 }
 0x40b   : > { %10547 = vmatprep.mubr.msk.bf16.mxu0 %vm10799_vm8, %v16385_v15 }
 0x418   : > { %v7194_v1 = vpop.f32.mrb[60].mxu1 }
 0x419   : > { %v7195_v19 = vadd.f32 %v15359_v17, %v7194_v1  ;;  %v10493_v3 = vpop.f32.mrb[61].mxu1 }
 0x41a   : > { %v7197_v54 = vpop.f32.mrb[62].mxu1 }
 0x41b   : > { %v7230_v48 = vmax.f32 %v7195_v19, 0.0  ;;  %v7198_v10 = vadd.f32 %v15359_v17, %v7197_v54  ;;  %v10494_v47 = vpop.f32.mrb[63].mxu1 }
 0x41d   : > { %v10350_v45 = vpack.c.bf16 %v7230_v48, %v7230_v48  ;;  %v7231_v51 = vmax.f32 %v7198_v10, 0.0 }
 0x41f   : > { %7356 = vst.msk [vmem:[#allocation3 + $0x58] sm:$0xf] %vm1994_vm0, %v10350_v45  ;;  %v10351_v12 = vpack.c.bf16 %v7231_v51, %v7231_v51 }
 0x420   : > { %8713 = vst.msk [vmem:[#allocation3 + $0x58] sm:$0xf] %vm8690_vm6, %v8660_v2 }
 0x421   : > { %7357 = vst.msk [vmem:[#allocation3 + $0x5c] sm:$0xf] %vm1994_vm0, %v10351_v12  ;;  %vm8715_vm0 = vcmask 189504  }
 0x422   : > { %8714 = vst.msk [vmem:[#allocation3 + $0x5c] sm:$0xf] %vm8690_vm6, %v8662_v14 }
 0x429   : > { %v7202_v9 = vpop.f32.mrb[64].mxu1  ;;  %v10660_v18 = vld [vmem:[#allocation3 + $0x58] sm:$0xff]  }
 0x42a   : > { %v7203_v29 = vadd.f32 %v15359_v17, %v7202_v9  ;;  %v10497_v6 = vpop.f32.mrb[65].mxu1  ;;  %10548 = vmatmul.mubr.msk.bf16.gmra.mrb[60].mxu0 %vm8824_vm9, %v10660_v18  ;;  %v15524_v17 = vsub.s32 %v9056_v55, %v16451_v32 }
 0x42b   : > { %v7205_v33 = vpop.f32.mrb[66].mxu1  ;;  %10551 = vmatprep.mubr.msk.bf16.mxu0 %vm10799_vm8, %v16385_v15  ;;  %vm9961_vm8 = vcmask 259072  }
 0x42c   : > { %v7232_v34 = vmax.f32 %v7203_v29, 0.0  ;;  %v10498_v27 = vpop.f32.mrb[67].mxu1  ;;  %v8901_v41 = vpop.f32.mrb[16].mxu0 }
 0x42d   : > { %v8902_v35 = vadd.f32 %v15517_v26, %v8901_v41  ;;  %v10505_v46 = vpop.f32.mrb[17].mxu0 }
 0x42e   : > { %v10352_v28 = vpack.c.bf16 %v7232_v34, %v7232_v34  ;;  %v8904_v56 = vpop.f32.mrb[18].mxu0 }
 0x42f   : > { %v9003_v21 = vmax.f32 %v8902_v35, 0.0  ;;  %v8905_v24 = vadd.f32 %v15517_v26, %v8904_v56  ;;  %v10506_v49 = vpop.f32.mrb[19].mxu0 }
 0x430   : > { %7358 = vst.msk [vmem:[#allocation3 + $0x60] sm:$0x3] %vm2019_vm12, %v10352_v28 }
 0x431   : > { %8716 = vst.msk [vmem:[#allocation3 + $0x60] sm:$0x3] %vm8715_vm0, %v8664_v57  ;;  %v9053_v15 = vcombine.high %v9003_v21, %v9003_v21  ;;  %v9060_v16 = vrot.slane %v9003_v21, %v15524_v17  ;;  %v9004_v11 = vmax.f32 %v8905_v24, 0.0 }
 0x433   : > { %v9067_v31 = vrot.slane %v9053_v15, %v15524_v17  ;;  %v9068_v63 = vcombine.high %v9060_v16, %v9060_v16  ;;  %v9070_v13 = vcombine.high %v9004_v11, %v9004_v11  ;;  %v9077_v37 = vrot.slane %v9004_v11, %v15524_v17 }
 0x435   : > { %v9069_v7 = vcombine.high %v9067_v31, %v9067_v31  ;;  %v9469_v25 = vcombine.low %v9060_v16, %v9068_v63  ;;  %v9084_v61 = vrot.slane %v9070_v13, %v15524_v17  ;;  %v9085_v8 = vcombine.high %v9077_v37, %v9077_v37 }
 0x437   : > { %v9470_v20 = vcombine.low %v9067_v31, %v9069_v7  ;;  %v9477_v43 = vrot.slane %v9469_v25, %v15524_v17  ;;  %v9486_v30 = vcombine.low %v9077_v37, %v9085_v8  ;;  %v9500_v36 = vrot.slane %v9084_v61, %v15524_v17 }
 0x438   : > { %v10661_v62 = vld [vmem:[#allocation3 + $0x60] ss:$0 sps:$4 sm:$0x33]   ;;  %v9086_v40 = vcombine.high %v9084_v61, %v9084_v61 }
 0x439   : > { %v9484_v50 = vrot.slane %v9470_v20, %v15524_v17  ;;  %v9493_v52 = vrot.slane %v9486_v30, %v15524_v17  ;;  %10552 = vmatmul.mubr.msk.bf16.gmra.mrb[64].mxu0 %vm8824_vm9, %v10661_v62 }
 0x43b   : > { %v9485_v39 = vcombine.low %v9477_v43, %v9484_v50  ;;  %v9501_v38 = vcombine.low %v9493_v52, %v9500_v36 }
 0x43d   : > { %9960 = vst.msk [vmem:[%s15542_s30] sm:$0xff] %vm9959_vm7, %v9485_v39 }
 0x43e   : > { %9962 = vst.msk [vmem:[%s15542_s30 + $0x8] sm:$0x3f] %vm9961_vm8, %v9501_v38  ;;  %v8909_v44 = vpop.f32.mrb[20].mxu0 }
 0x43f   : > { %v8910_v5 = vadd.f32 %v15517_v26, %v8909_v44  ;;  %v10509_v42 = vpop.f32.mrb[21].mxu0 }
 0x440   : > { %v8912_v0 = vpop.f32.mrb[22].mxu0 }
 0x441   : > { %v9005_v58 = vmax.f32 %v8910_v5, 0.0  ;;  %v8913_v4 = vadd.f32 %v15517_v26, %v8912_v0  ;;  %v10510_v22 = vpop.f32.mrb[23].mxu0 }
 0x443   : > { %v9087_v23 = vcombine.high %v9005_v58, %v9005_v58  ;;  %v9094_v53 = vrot.slane %v9005_v58, %v15524_v17  ;;  %v9006_v1 = vmax.f32 %v8913_v4, 0.0 }
 0x445   : > { %v9101_v19 = vrot.slane %v9087_v23, %v15524_v17  ;;  %v9102_v3 = vcombine.high %v9094_v53, %v9094_v53  ;;  %v9502_v54 = vcombine.low %v9086_v40, %v9094_v53  ;;  %v9111_v48 = vrot.slane %v9006_v1, %v15524_v17 }
 0x446   : > { %v9104_v51 = vcombine.high %v9006_v1, %v9006_v1 }
 0x447   : > { %v9503_v10 = vcombine.low %v9102_v3, %v9101_v19  ;;  %v9510_v47 = vrot.slane %v9502_v54, %v15524_v17  ;;  %v9103_v45 = vcombine.high %v9101_v19, %v9101_v19  ;;  %v9119_v2 = vcombine.high %v9111_v48, %v9111_v48 }
 0x448   : > { %v9118_v9 = vrot.slane %v9104_v51, %v15524_v17 }
 0x449   : > { %v9517_v12 = vrot.slane %v9503_v10, %v15524_v17  ;;  %v9519_v14 = vcombine.low %v9103_v45, %v9111_v48  ;;  %v9533_v59 = vrot.slane %v9119_v2, %v15524_v17 }
 0x44a   : > { %v9120_v6 = vcombine.high %v9118_v9, %v9118_v9 }
 0x44b   : > { %v9518_v60 = vcombine.low %v9510_v47, %v9517_v12  ;;  %v9526_v18 = vrot.slane %v9519_v14, %v15524_v17 }
 0x44c   : > { %v9535_v46 = vcombine.low %v9118_v9, %v9120_v6 }
 0x44d   : > { %9963 = vst.msk [vmem:[%s15542_s30 + $0x10] sm:$0xff] %vm9959_vm7, %v9518_v60  ;;  %v9534_v55 = vcombine.low %v9526_v18, %v9533_v59 }
 0x44e   : > { %v9543_v15 = vrot.slane %v9535_v46, %v15524_v17 }
 0x44f   : > { %9964 = vst.msk [vmem:[%s15542_s30 + $0x18] sm:$0x3f] %vm9961_vm8, %v9534_v55 }
 0x450   : > { %v8917_v29 = vpop.f32.mrb[24].mxu0 }
 0x451   : > { %v8918_v33 = vadd.f32 %v15517_v26, %v8917_v29  ;;  %v10513_v34 = vpop.f32.mrb[25].mxu0 }
 0x452   : > { %v8920_v27 = vpop.f32.mrb[26].mxu0 }
 0x453   : > { %v9007_v41 = vmax.f32 %v8918_v33, 0.0  ;;  %v8921_v35 = vadd.f32 %v15517_v26, %v8920_v27  ;;  %v10514_v32 = vpop.f32.mrb[27].mxu0 }
 0x455   : > { %v9121_v28 = vcombine.high %v9007_v41, %v9007_v41  ;;  %v9128_v57 = vrot.slane %v9007_v41, %v15524_v17  ;;  %v9008_v56 = vmax.f32 %v8921_v35, 0.0 }
 0x457   : > { %v9135_v21 = vrot.slane %v9121_v28, %v15524_v17  ;;  %v9136_v24 = vcombine.high %v9128_v57, %v9128_v57  ;;  %v9145_v49 = vrot.slane %v9008_v56, %v15524_v17  ;;  %v9138_v61 = vcombine.high %v9008_v56, %v9008_v56 }
 0x459   : > { %v9137_v16 = vcombine.high %v9135_v21, %v9135_v21  ;;  %v9536_v11 = vcombine.low %v9128_v57, %v9136_v24  ;;  %v9566_v13 = vrot.slane %v9145_v49, %v15524_v17  ;;  %v9153_v8 = vcombine.high %v9145_v49, %v9145_v49 }
 0x45a   : > { %v9152_v20 = vrot.slane %v9138_v61, %v15524_v17 }
 0x45b   : > { %v9550_v31 = vrot.slane %v9536_v11, %v15524_v17  ;;  %v9552_v63 = vcombine.low %v9135_v21, %v9137_v16 }
 0x45c   : > { %v9568_v62 = vcombine.low %v9153_v8, %v9152_v20  ;;  %v9154_v39 = vcombine.high %v9152_v20, %v9152_v20 }
 0x45d   : > { %v9551_v37 = vcombine.low %v9543_v15, %v9550_v31  ;;  %v9559_v7 = vrot.slane %v9552_v63, %v15524_v17 }
 0x45e   : > { %v9576_v58 = vrot.slane %v9568_v62, %v15524_v17 }
 0x45f   : > { %9965 = vst.msk [vmem:[%s15542_s30 + $0x20] sm:$0xff] %vm9959_vm7, %v9551_v37  ;;  %v9567_v25 = vcombine.low %v9559_v7, %v9566_v13 }
 0x461   : > { %9966 = vst.msk [vmem:[%s15542_s30 + $0x28] sm:$0x3f] %vm9961_vm8, %v9567_v25 }
 0x48c   : > { %v8925_v43 = vpop.f32.mrb[28].mxu0 }
 0x48d   : > { %v8926_v30 = vadd.f32 %v15517_v26, %v8925_v43  ;;  %v10517_v36 = vpop.f32.mrb[29].mxu0 }
 0x48e   : > { %v8928_v50 = vpop.f32.mrb[30].mxu0 }
 0x48f   : > { %v9009_v52 = vmax.f32 %v8926_v30, 0.0  ;;  %v8929_v38 = vadd.f32 %v15517_v26, %v8928_v50  ;;  %v10518_v44 = vpop.f32.mrb[31].mxu0 }
 0x491   : > { %v9155_v5 = vcombine.high %v9009_v52, %v9009_v52  ;;  %v9162_v42 = vrot.slane %v9009_v52, %v15524_v17  ;;  %v9010_v0 = vmax.f32 %v8929_v38, 0.0 }
 0x493   : > { %v9169_v40 = vrot.slane %v9155_v5, %v15524_v17  ;;  %v9170_v4 = vcombine.high %v9162_v42, %v9162_v42  ;;  %v9569_v22 = vcombine.low %v9154_v39, %v9162_v42  ;;  %v9172_v23 = vcombine.high %v9010_v0, %v9010_v0 }
 0x494   : > { %v9179_v53 = vrot.slane %v9010_v0, %v15524_v17  ;;  %v8933_v1 = vpop.f32.mrb[32].mxu0 }
 0x495   : > { %v9171_v19 = vcombine.high %v9169_v40, %v9169_v40  ;;  %v9583_v3 = vrot.slane %v9569_v22, %v15524_v17  ;;  %v9585_v54 = vcombine.low %v9170_v4, %v9169_v40  ;;  %v9186_v48 = vrot.slane %v9172_v23, %v15524_v17  ;;  %v10521_v10 = vpop.f32.mrb[33].mxu0 }
 0x496   : > { %v9187_v47 = vcombine.high %v9179_v53, %v9179_v53  ;;  %v8934_v45 = vadd.f32 %v15517_v26, %v8933_v1  ;;  %v8936_v51 = vpop.f32.mrb[34].mxu0 }
 0x497   : > { %v9584_v2 = vcombine.low %v9576_v58, %v9583_v3  ;;  %v9592_v12 = vrot.slane %v9585_v54, %v15524_v17  ;;  %v9599_v14 = vrot.slane %v9171_v19, %v15524_v17  ;;  %v9188_v59 = vcombine.high %v9186_v48, %v9186_v48  ;;  %v10522_v60 = vpop.f32.mrb[35].mxu0 }
 0x498   : > { %v9601_v9 = vcombine.low %v9179_v53, %v9187_v47  ;;  %v9011_v18 = vmax.f32 %v8934_v45, 0.0  ;;  %v8937_v55 = vadd.f32 %v15517_v26, %v8936_v51 }
 0x499   : > { %v9600_v29 = vcombine.low %v9592_v12, %v9599_v14  ;;  %9967 = vst.msk [vmem:[%s15542_s30 + $0x30] sm:$0xff] %vm9959_vm7, %v9584_v2  ;;  %v9602_v6 = vcombine.low %v9186_v48, %v9188_v59 }
 0x49a   : > { %v9609_v33 = vrot.slane %v9601_v9, %v15524_v17  ;;  %v9189_v34 = vcombine.high %v9011_v18, %v9011_v18  ;;  %v9196_v27 = vrot.slane %v9011_v18, %v15524_v17  ;;  %v9012_v41 = vmax.f32 %v8937_v55, 0.0 }
 0x49b   : > { %9968 = vst.msk [vmem:[%s15542_s30 + $0x38] sm:$0x3f] %vm9961_vm8, %v9600_v29  ;;  %v9616_v35 = vrot.slane %v9602_v6, %v15524_v17 }
 0x49c   : > { %v9203_v32 = vrot.slane %v9189_v34, %v15524_v17  ;;  %v9204_v46 = vcombine.high %v9196_v27, %v9196_v27  ;;  %v9206_v28 = vcombine.high %v9012_v41, %v9012_v41  ;;  %v9213_v57 = vrot.slane %v9012_v41, %v15524_v17 }
 0x49d   : > { %v9617_v21 = vcombine.low %v9609_v33, %v9616_v35 }
 0x49e   : > { %v9618_v15 = vcombine.low %v9196_v27, %v9204_v46  ;;  %v9632_v16 = vrot.slane %v9203_v32, %v15524_v17  ;;  %v9205_v11 = vcombine.high %v9203_v32, %v9203_v32  ;;  %v9220_v31 = vrot.slane %v9206_v28, %v15524_v17 }
 0x49f   : > { %v8941_v56 = vpop.f32.mrb[36].mxu0  ;;  %9969 = vst.msk [vmem:[%s15542_s30 + $0x40] sm:$0xff] %vm9959_vm7, %v9617_v21  ;;  %v9221_v13 = vcombine.high %v9213_v57, %v9213_v57 }
 0x4a0   : > { %v8942_v24 = vadd.f32 %v15517_v26, %v8941_v56  ;;  %v10525_v49 = vpop.f32.mrb[37].mxu0  ;;  %v9625_v61 = vrot.slane %v9618_v15, %v15524_v17  ;;  %v9634_v8 = vcombine.low %v9205_v11, %v9213_v57  ;;  %v9222_v20 = vcombine.high %v9220_v31, %v9220_v31 }
 0x4a1   : > { %v8944_v63 = vpop.f32.mrb[38].mxu0  ;;  %v9635_v43 = vcombine.low %v9221_v13, %v9220_v31 }
 0x4a2   : > { %v9013_v37 = vmax.f32 %v8942_v24, 0.0  ;;  %v8945_v7 = vadd.f32 %v15517_v26, %v8944_v63  ;;  %v10526_v25 = vpop.f32.mrb[39].mxu0  ;;  %v9633_v50 = vcombine.low %v9625_v61, %v9632_v16  ;;  %v9642_v52 = vrot.slane %v9634_v8, %v15524_v17 }
 0x4a3   : > { %v9649_v39 = vrot.slane %v9635_v43, %v15524_v17 }
 0x4a4   : > { %v9223_v30 = vcombine.high %v9013_v37, %v9013_v37  ;;  %v9230_v36 = vrot.slane %v9013_v37, %v15524_v17  ;;  %v9014_v62 = vmax.f32 %v8945_v7, 0.0  ;;  %9970 = vst.msk [vmem:[%s15542_s30 + $0x48] sm:$0x3f] %vm9961_vm8, %v9633_v50 }
 0x4a5   : > { %v9650_v40 = vcombine.low %v9642_v52, %v9649_v39 }
 0x4a6   : > { %v9237_v38 = vrot.slane %v9223_v30, %v15524_v17  ;;  %v9238_v44 = vcombine.high %v9230_v36, %v9230_v36  ;;  %v9651_v5 = vcombine.low %v9222_v20, %v9230_v36  ;;  %v9240_v42 = vcombine.high %v9014_v62, %v9014_v62 }
 0x4a7   : > { %v9247_v0 = vrot.slane %v9014_v62, %v15524_v17  ;;  %v8949_v58 = vpop.f32.mrb[40].mxu0  ;;  %9971 = vst.msk [vmem:[%s15542_s30 + $0x50] sm:$0xff] %vm9959_vm7, %v9650_v40 }
 0x4a8   : > { %v9239_v4 = vcombine.high %v9237_v38, %v9237_v38  ;;  %v9658_v22 = vrot.slane %v9651_v5, %v15524_v17  ;;  %v9665_v23 = vrot.slane %v9238_v44, %v15524_v17  ;;  %v10529_v53 = vpop.f32.mrb[41].mxu0  ;;  %v9254_v1 = vrot.slane %v9240_v42, %v15524_v17 }
 0x4a9   : > { %v9255_v19 = vcombine.high %v9247_v0, %v9247_v0  ;;  %v8950_v3 = vadd.f32 %v15517_v26, %v8949_v58  ;;  %v8952_v54 = vpop.f32.mrb[42].mxu0 }
 0x4aa   : > { %v9666_v48 = vcombine.low %v9658_v22, %v9665_v23  ;;  %v9667_v10 = vcombine.low %v9237_v38, %v9239_v4  ;;  %v8953_v47 = vadd.f32 %v15517_v26, %v8952_v54  ;;  %v10530_v45 = vpop.f32.mrb[43].mxu0  ;;  %v9256_v51 = vcombine.high %v9254_v1, %v9254_v1 }
 0x4ab   : > { %v9668_v2 = vcombine.low %v9247_v0, %v9255_v19  ;;  %v9015_v12 = vmax.f32 %v8950_v3, 0.0 }
 0x4ac   : > { %v9675_v14 = vrot.slane %v9667_v10, %v15524_v17  ;;  %9972 = vst.msk [vmem:[%s15542_s30 + $0x58] sm:$0x3f] %vm9961_vm8, %v9666_v48  ;;  %v9016_v59 = vmax.f32 %v8953_v47, 0.0  ;;  %v9684_v9 = vcombine.low %v9254_v1, %v9256_v51 }
 0x4ad   : > { %v9682_v60 = vrot.slane %v9668_v2, %v15524_v17  ;;  %v9257_v18 = vcombine.high %v9015_v12, %v9015_v12  ;;  %v9264_v55 = vrot.slane %v9015_v12, %v15524_v17 }
 0x4ae   : > { %v9274_v29 = vcombine.high %v9016_v59, %v9016_v59  ;;  %v9281_v6 = vrot.slane %v9016_v59, %v15524_v17  ;;  %v9691_v41 = vrot.slane %v9684_v9, %v15524_v17 }
 0x4af   : > { %v9683_v33 = vcombine.low %v9675_v14, %v9682_v60  ;;  %v9271_v34 = vrot.slane %v9257_v18, %v15524_v17  ;;  %v9272_v27 = vcombine.high %v9264_v55, %v9264_v55  ;;  %v8957_v35 = vpop.f32.mrb[44].mxu0  ;;  %v9698_v32 = vrot.slane %v9264_v55, %v15524_v17 }
 0x4b0   : > { %v9288_v46 = vrot.slane %v9274_v29, %v15524_v17  ;;  %v9289_v28 = vcombine.high %v9281_v6, %v9281_v6  ;;  %v8958_v57 = vadd.f32 %v15517_v26, %v8957_v35  ;;  %v10533_v56 = vpop.f32.mrb[45].mxu0 }
 0x4b1   : > { %9973 = vst.msk [vmem:[%s15542_s30 + $0x60] sm:$0xff] %vm9959_vm7, %v9683_v33  ;;  %v9700_v21 = vcombine.low %v9272_v27, %v9271_v34  ;;  %v9273_v24 = vcombine.high %v9271_v34, %v9271_v34  ;;  %v8960_v49 = vpop.f32.mrb[46].mxu0  ;;  %v9699_v15 = vcombine.low %v9691_v41, %v9698_v32 }
 0x4b2   : > { %v9290_v16 = vcombine.high %v9288_v46, %v9288_v46  ;;  %v9717_v11 = vcombine.low %v9289_v28, %v9288_v46  ;;  %v9017_v31 = vmax.f32 %v8958_v57, 0.0  ;;  %v10534_v63 = vpop.f32.mrb[47].mxu0  ;;  %v8961_v7 = vadd.f32 %v15517_v26, %v8960_v49 }
 0x4b3   : > { %v9708_v13 = vrot.slane %v9700_v21, %v15524_v17  ;;  %v9701_v37 = vcombine.low %v9273_v24, %v9281_v6  ;;  %9974 = vst.msk [vmem:[%s15542_s30 + $0x68] sm:$0x3f] %vm9961_vm8, %v9699_v15 }
 0x4b4   : > { %v9724_v25 = vrot.slane %v9717_v11, %v15524_v17  ;;  %v9731_v61 = vrot.slane %v9290_v16, %v15524_v17  ;;  %v9291_v8 = vcombine.high %v9017_v31, %v9017_v31  ;;  %v9298_v20 = vrot.slane %v9017_v31, %v15524_v17 }
 0x4b5   : > { %v9715_v43 = vrot.slane %v9701_v37, %v15524_v17  ;;  %v9018_v30 = vmax.f32 %v8961_v7, 0.0 }
 0x4b6   : > { %v9732_v36 = vcombine.low %v9724_v25, %v9731_v61  ;;  %v9305_v62 = vrot.slane %v9291_v8, %v15524_v17  ;;  %v9306_v50 = vcombine.high %v9298_v20, %v9298_v20 }
 0x4b7   : > { %v9716_v52 = vcombine.low %v9708_v13, %v9715_v43  ;;  %v9308_v39 = vcombine.high %v9018_v30, %v9018_v30  ;;  %v9315_v38 = vrot.slane %v9018_v30, %v15524_v17  ;;  %v8965_v44 = vpop.f32.mrb[48].mxu0 }
 0x4b8   : > { %9976 = vst.msk [vmem:[%s15542_s30 + $0x78] sm:$0x3f] %vm9961_vm8, %v9732_v36  ;;  %v9307_v5 = vcombine.high %v9305_v62, %v9305_v62  ;;  %v9733_v42 = vcombine.low %v9298_v20, %v9306_v50  ;;  %v8966_v0 = vadd.f32 %v15517_v26, %v8965_v44  ;;  %v10537_v58 = vpop.f32.mrb[49].mxu0 }
 0x4b9   : > { %9975 = vst.msk [vmem:[%s15542_s30 + $0x70] sm:$0xff] %vm9959_vm7, %v9716_v52  ;;  %v9322_v40 = vrot.slane %v9308_v39, %v15524_v17  ;;  %v9323_v4 = vcombine.high %v9315_v38, %v9315_v38  ;;  %v8968_v22 = vpop.f32.mrb[50].mxu0 }
 0x4ba   : > { %v9734_v23 = vcombine.low %v9305_v62, %v9307_v5  ;;  %v9741_v53 = vrot.slane %v9733_v42, %v15524_v17  ;;  %v9019_v1 = vmax.f32 %v8966_v0, 0.0  ;;  %v8969_v19 = vadd.f32 %v15517_v26, %v8968_v22  ;;  %v10538_v3 = vpop.f32.mrb[51].mxu0 }
 0x4bb   : > { %v9750_v54 = vcombine.low %v9315_v38, %v9323_v4  ;;  %v9764_v48 = vrot.slane %v9322_v40, %v15524_v17  ;;  %v9324_v10 = vcombine.high %v9322_v40, %v9322_v40 }
 0x4bc   : > { %v9748_v47 = vrot.slane %v9734_v23, %v15524_v17  ;;  %v9325_v45 = vcombine.high %v9019_v1, %v9019_v1  ;;  %v9332_v51 = vrot.slane %v9019_v1, %v15524_v17  ;;  %v9020_v2 = vmax.f32 %v8969_v19, 0.0 }
 0x4bd   : > { %v9757_v12 = vrot.slane %v9750_v54, %v15524_v17 }
 0x4be   : > { %v9749_v14 = vcombine.low %v9741_v53, %v9748_v47  ;;  %v9339_v59 = vrot.slane %v9325_v45, %v15524_v17  ;;  %v9340_v60 = vcombine.high %v9332_v51, %v9332_v51  ;;  %v9766_v9 = vcombine.low %v9324_v10, %v9332_v51 }
 0x4bf   : > { %v9765_v18 = vcombine.low %v9757_v12, %v9764_v48  ;;  %v9342_v55 = vcombine.high %v9020_v2, %v9020_v2  ;;  %v9349_v29 = vrot.slane %v9020_v2, %v15524_v17  ;;  %v8973_v6 = vpop.f32.mrb[52].mxu0 }
 0x4c0   : > { %9977 = vst.msk [vmem:[%s15542_s30 + $0x80] sm:$0xff] %vm9959_vm7, %v9749_v14  ;;  %v9767_v33 = vcombine.low %v9340_v60, %v9339_v59  ;;  %v9774_v34 = vrot.slane %v9766_v9, %v15524_v17  ;;  %v9341_v27 = vcombine.high %v9339_v59, %v9339_v59  ;;  %v8974_v41 = vadd.f32 %v15517_v26, %v8973_v6  ;;  %v10541_v35 = vpop.f32.mrb[53].mxu0 }
 0x4c1   : > { %9978 = vst.msk [vmem:[%s15542_s30 + $0x88] sm:$0x3f] %vm9961_vm8, %v9765_v18  ;;  %v9356_v32 = vrot.slane %v9342_v55, %v15524_v17  ;;  %v9357_v46 = vcombine.high %v9349_v29, %v9349_v29  ;;  %v8976_v28 = vpop.f32.mrb[54].mxu0 }
 0x4c2   : > { %v9781_v57 = vrot.slane %v9767_v33, %v15524_v17  ;;  %v9783_v56 = vcombine.low %v9341_v27, %v9349_v29  ;;  %v9021_v21 = vmax.f32 %v8974_v41, 0.0  ;;  %v8977_v24 = vadd.f32 %v15517_v26, %v8976_v28  ;;  %v10542_v49 = vpop.f32.mrb[55].mxu0 }
 0x4c3   : > { %v9358_v15 = vcombine.high %v9356_v32, %v9356_v32  ;;  %v9797_v16 = vrot.slane %v9357_v46, %v15524_v17 }
 0x4c4   : > { %v9782_v11 = vcombine.low %v9774_v34, %v9781_v57  ;;  %v9790_v31 = vrot.slane %v9783_v56, %v15524_v17  ;;  %v9359_v63 = vcombine.high %v9021_v21, %v9021_v21  ;;  %v9366_v13 = vrot.slane %v9021_v21, %v15524_v17 }
 0x4c5   : > { %v9799_v37 = vcombine.low %v9356_v32, %v9358_v15  ;;  %v9022_v7 = vmax.f32 %v8977_v24, 0.0 }
 0x4c6   : > { %9979 = vst.msk [vmem:[%s15542_s30 + $0x90] sm:$0xff] %vm9959_vm7, %v9782_v11  ;;  %v9798_v25 = vcombine.low %v9790_v31, %v9797_v16  ;;  %v9373_v61 = vrot.slane %v9359_v63, %v15524_v17  ;;  %v9374_v8 = vcombine.high %v9366_v13, %v9366_v13 }
 0x4c7   : > { %v9383_v20 = vrot.slane %v9022_v7, %v15524_v17  ;;  %v9807_v43 = vrot.slane %v9799_v37, %v15524_v17  ;;  %v9376_v5 = vcombine.high %v9022_v7, %v9022_v7 }
 0x4c8   : > { %9980 = vst.msk [vmem:[%s15542_s30 + $0x98] sm:$0x3f] %vm9961_vm8, %v9798_v25  ;;  %v9375_v30 = vcombine.high %v9373_v61, %v9373_v61  ;;  %v9800_v36 = vcombine.low %v9366_v13, %v9374_v8 }
 0x4c9   : > { %v9830_v52 = vrot.slane %v9383_v20, %v15524_v17  ;;  %v9391_v42 = vcombine.high %v9383_v20, %v9383_v20  ;;  %v9390_v0 = vrot.slane %v9376_v5, %v15524_v17 }
 0x4ca   : > { %v9814_v62 = vrot.slane %v9800_v36, %v15524_v17  ;;  %v9816_v50 = vcombine.low %v9373_v61, %v9375_v30 }
 0x4cb   : > { %v9832_v22 = vcombine.low %v9391_v42, %v9390_v0  ;;  %v9392_v1 = vcombine.high %v9390_v0, %v9390_v0 }
 0x4cc   : > { %v9815_v39 = vcombine.low %v9807_v43, %v9814_v62  ;;  %v9823_v38 = vrot.slane %v9816_v50, %v15524_v17 }
 0x4cd   : > { %v9840_v47 = vrot.slane %v9832_v22, %v15524_v17 }
 0x4ce   : > { %9981 = vst.msk [vmem:[%s15542_s30 + $0xa0] sm:$0xff] %vm9959_vm7, %v9815_v39  ;;  %v9831_v44 = vcombine.low %v9823_v38, %v9830_v52 }
 0x4d0   : > { %9982 = vst.msk [vmem:[%s15542_s30 + $0xa8] sm:$0x3f] %vm9961_vm8, %v9831_v44 }
 0x4dd   : > { %v8981_v58 = vpop.f32.mrb[56].mxu0 }
 0x4de   : > { %v8982_v40 = vadd.f32 %v15517_v26, %v8981_v58  ;;  %v10545_v4 = vpop.f32.mrb[57].mxu0 }
 0x4df   : > { %v8984_v23 = vpop.f32.mrb[58].mxu0 }
 0x4e0   : > { %v9023_v53 = vmax.f32 %v8982_v40, 0.0  ;;  %v8985_v19 = vadd.f32 %v15517_v26, %v8984_v23  ;;  %v10546_v3 = vpop.f32.mrb[59].mxu0 }
 0x4e2   : > { %v9393_v54 = vcombine.high %v9023_v53, %v9023_v53  ;;  %v9400_v48 = vrot.slane %v9023_v53, %v15524_v17  ;;  %v9024_v10 = vmax.f32 %v8985_v19, 0.0 }
 0x4e4   : > { %v9407_v45 = vrot.slane %v9393_v54, %v15524_v17  ;;  %v9408_v51 = vcombine.high %v9400_v48, %v9400_v48  ;;  %v9833_v2 = vcombine.low %v9392_v1, %v9400_v48  ;;  %v9410_v12 = vcombine.high %v9024_v10, %v9024_v10 }
 0x4e5   : > { %v9417_v14 = vrot.slane %v9024_v10, %v15524_v17 }
 0x4e6   : > { %v9409_v59 = vcombine.high %v9407_v45, %v9407_v45  ;;  %v9847_v60 = vrot.slane %v9833_v2, %v15524_v17  ;;  %v9849_v9 = vcombine.low %v9408_v51, %v9407_v45  ;;  %v9424_v18 = vrot.slane %v9410_v12, %v15524_v17 }
 0x4e7   : > { %v9425_v55 = vcombine.high %v9417_v14, %v9417_v14 }
 0x4e8   : > { %v9848_v29 = vcombine.low %v9840_v47, %v9847_v60  ;;  %v9856_v6 = vrot.slane %v9849_v9, %v15524_v17  ;;  %v9863_v33 = vrot.slane %v9409_v59, %v15524_v17  ;;  %v9426_v34 = vcombine.high %v9424_v18, %v9424_v18 }
 0x4e9   : > { %v9865_v27 = vcombine.low %v9417_v14, %v9425_v55 }
 0x4ea   : > { %v9864_v41 = vcombine.low %v9856_v6, %v9863_v33  ;;  %9983 = vst.msk [vmem:[%s15542_s30 + $0xb0] sm:$0xff] %vm9959_vm7, %v9848_v29  ;;  %v9866_v35 = vcombine.low %v9424_v18, %v9426_v34 }
 0x4eb   : > { %v9873_v32 = vrot.slane %v9865_v27, %v15524_v17 }
 0x4ec   : > { %9984 = vst.msk [vmem:[%s15542_s30 + $0xb8] sm:$0x3f] %vm9961_vm8, %v9864_v41  ;;  %v9880_v46 = vrot.slane %v9866_v35, %v15524_v17 }
 0x4ee   : > { %v9881_v28 = vcombine.low %v9873_v32, %v9880_v46 }
 0x4f0   : > { %9985 = vst.msk [vmem:[%s15542_s30 + $0xc0] sm:$0xff] %vm9959_vm7, %v9881_v28 }
 0x4fd   : > { %v8989_v57 = vpop.f32.mrb[60].mxu0 }
 0x4fe   : > { %v8990_v56 = vadd.f32 %v15517_v26, %v8989_v57  ;;  %v10549_v21 = vpop.f32.mrb[61].mxu0 }
 0x4ff   : > { %v8992_v24 = vpop.f32.mrb[62].mxu0 }
 0x500   : > { %v9025_v49 = vmax.f32 %v8990_v56, 0.0  ;;  %v8993_v15 = vadd.f32 %v15517_v26, %v8992_v24  ;;  %v10550_v16 = vpop.f32.mrb[63].mxu0 }
 0x502   : > { %v9427_v11 = vcombine.high %v9025_v49, %v9025_v49  ;;  %v9434_v31 = vrot.slane %v9025_v49, %v15524_v17  ;;  %v9026_v63 = vmax.f32 %v8993_v15, 0.0 }
 0x504   : > { %v9441_v13 = vrot.slane %v9427_v11, %v15524_v17  ;;  %v9442_v37 = vcombine.high %v9434_v31, %v9434_v31  ;;  %v9444_v7 = vcombine.high %v9026_v63, %v9026_v63  ;;  %v9451_v25 = vrot.slane %v9026_v63, %v15524_v17 }
 0x506   : > { %v9882_v61 = vcombine.low %v9434_v31, %v9442_v37  ;;  %v9896_v8 = vrot.slane %v9441_v13, %v15524_v17  ;;  %v9443_v20 = vcombine.high %v9441_v13, %v9441_v13  ;;  %v9458_v43 = vrot.slane %v9444_v7, %v15524_v17 }
 0x507   : > { %v9459_v30 = vcombine.high %v9451_v25, %v9451_v25 }
 0x508   : > { %v9889_v36 = vrot.slane %v9882_v61, %v15524_v17  ;;  %v9898_v62 = vcombine.low %v9443_v20, %v9451_v25  ;;  %v9460_v22 = vcombine.high %v9458_v43, %v9458_v43 }
 0x509   : > { %v9899_v50 = vcombine.low %v9459_v30, %v9458_v43 }
 0x50a   : > { %v9897_v52 = vcombine.low %v9889_v36, %v9896_v8  ;;  %v9906_v39 = vrot.slane %v9898_v62, %v15524_v17 }
 0x50b   : > { %v9913_v38 = vrot.slane %v9899_v50, %v15524_v17 }
 0x50c   : > { %9986 = vst.msk [vmem:[%s15542_s30 + $0xc8] sm:$0x3f] %vm9961_vm8, %v9897_v52  ;;  %v8997_v44 = vpop.f32.mrb[64].mxu0 }
 0x50d   : > { %v9914_v5 = vcombine.low %v9906_v39, %v9913_v38  ;;  %v8998_v42 = vadd.f32 %v15517_v26, %v8997_v44  ;;  %v10553_v0 = vpop.f32.mrb[65].mxu0 }
 0x50e   : > { %v9000_v58 = vpop.f32.mrb[66].mxu0 }
 0x50f   : > { %9987 = vst.msk [vmem:[%s15542_s30 + $0xd0] sm:$0xff] %vm9959_vm7, %v9914_v5  ;;  %v9027_v40 = vmax.f32 %v8998_v42, 0.0  ;;  %v10554_v4 = vpop.f32.mrb[67].mxu0 }
 0x511   : > { %v9467_v23 = vrot.slane %v9027_v40, %v15524_v17 }
 0x513   : > { %v9468_v53 = vcombine.high %v9467_v23, %v9467_v23  ;;  %v9915_v1 = vcombine.low %v9460_v22, %v9467_v23 }
 0x515   : > { %v9922_v19 = vrot.slane %v9915_v1, %v15524_v17  ;;  %v9929_v3 = vrot.slane %v9468_v53, %v15524_v17 }
 0x517   : > { %v9930_v54 = vcombine.low %v9922_v19, %v9929_v3 }
 0x519   : > { %9988 = vst.msk [vmem:[%s15542_s30 + $0xd8] sm:$0x3f] %vm9961_vm8, %v9930_v54 }
 0x51a PF: > { %p17_p8 = scmp.ge.s32.totalorder %s10863_s29, 4   ;;  %s16452_s24 = smov %s10775_s25 }
 0x51b   : > { %s16453_s25 = smov %s10779_s26  ;;  %s16454_s26 = smov %s10873_s9 }
 0x51c   : > { %s16455_s27 = smov %s10863_s29  ;;  %19 = sbr.rel (!%p17_p8) target bundleno = 3 (0x3), region = 88 }
 0x523   :  { %10010 = vsyncpa [#allocation5], 1 }
 0x524   :  { %10012 = vsyncpa [#allocation5 + $0x1], 1 }

</bundles_post_ra>
